<compile_context>
chip_gen: v7x
topology: tpu7x:2x2x1
jax: 0.10.0
libtpu: 0.0.40
codegen_flags: <defaults>
</compile_context>

<pallas_src>
import functools

import jax
import jax.numpy as jnp
from jax.experimental import pallas as pl
from jax.experimental.pallas import tpu as pltpu


# -----------------------------------------------------------------------------
# Small helpers
# -----------------------------------------------------------------------------
def _ln(x, g, b, eps):
    """LayerNorm over the last dim, f32 math. g/b are (1, D)."""
    mu = jnp.mean(x, axis=-1, keepdims=True)
    xc = x - mu
    var = jnp.mean(xc * xc, axis=-1, keepdims=True)
    return xc * jax.lax.rsqrt(var + eps) * g + b


def _full_spec(a):
    """BlockSpec covering the whole (small) array, constant across the grid."""
    return pl.BlockSpec(a.shape, lambda *_, n=a.ndim: (0,) * n)


# -----------------------------------------------------------------------------
# Kernel 1: plain linear (used only for the embedding projection, single block)
# -----------------------------------------------------------------------------
def _linear_kernel(x_ref, w_ref, b_ref, o_ref, *, relu):
    acc = jnp.dot(x_ref[...], w_ref[...], preferred_element_type=jnp.float32)
    acc = acc + b_ref[...]
    if relu:
        acc = jnp.maximum(acc, 0.0)
    o_ref[...] = acc.astype(o_ref.dtype)


def pallas_linear(x, w, b, *, relu=False):
    """y = x @ w + b.  x: (M, K), w: (K, N), b: (N,)."""
    M, K = x.shape
    Kw, N = w.shape
    assert K == Kw
    # Capped tile: single block for small M, otherwise 256/128-row tiles.
    if M <= 512:
        tm = M
    elif M % 256 == 0:
        tm = 256
    elif M % 128 == 0:
        tm = 128
    else:
        tm = M  # TODO(synk): pad/ragged tiling for large M not divisible by 128
    grid = (M // tm,)
    kernel = functools.partial(_linear_kernel, relu=relu)
    return pl.pallas_call(
        kernel,
        out_shape=jax.ShapeDtypeStruct((M, N), x.dtype),
        grid_spec=pltpu.PrefetchScalarGridSpec(
            num_scalar_prefetch=0,
            grid=grid,
            in_specs=[
                pl.BlockSpec((tm, K), lambda i: (i, 0)),
                pl.BlockSpec((K, N), lambda i: (0, 0)),
                pl.BlockSpec((1, N), lambda i: (0, 0)),
            ],
            out_specs=pl.BlockSpec((tm, N), lambda i: (i, 0)),
        ),
        compiler_params=pltpu.CompilerParams(dimension_semantics=("parallel",)),
    )(x, w, b.reshape(1, N))


# -----------------------------------------------------------------------------
# Kernel 2: fused transformer encoder layer (per batch element)
# -----------------------------------------------------------------------------
def _encoder_layer_kernel(x_ref, qkvw_ref, qkvb_ref, ow_ref, ob_ref,
                          ln1g_ref, ln1b_ref, ff1w_ref, ff1b_ref,
                          ff2w_ref, ff2b_ref, ln2g_ref, ln2b_ref,
                          o_ref, *, num_heads, eps):
    x = x_ref[0].astype(jnp.float32)               # (S, D)
    D = x.shape[-1]
    dh = D // num_heads
    scale = 1.0 / float(dh) ** 0.5

    # ---- multi-head self-attention fused with the output projection ----
    # attn_out accumulates  sum_h softmax(q_h k_h^T) v_h @ W_out[h]  (+ bias)
    attn_out = ob_ref[...].astype(jnp.float32)     # (1, D) broadcasts over S
    for h in range(num_heads):                     # static, small H
        wq = qkvw_ref[0, h]                        # (D, dh)
        wk = qkvw_ref[1, h]
        wv = qkvw_ref[2, h]
        qh = jnp.dot(x, wq, preferred_element_type=jnp.float32) + qkvb_ref[0, h]
        kh = jnp.dot(x, wk, preferred_element_type=jnp.float32) + qkvb_ref[1, h]
        vh = jnp.dot(x, wv, preferred_element_type=jnp.float32) + qkvb_ref[2, h]
        # scores (S, S): contract over dh without an explicit transpose
        s = jax.lax.dot_general(qh, kh, (((1,), (1,)), ((), ())),
                                preferred_element_type=jnp.float32) * scale
        m = jnp.max(s, axis=-1, keepdims=True)
        p = jnp.exp(s - m)
        p = p / jnp.sum(p, axis=-1, keepdims=True)
        oh = jnp.dot(p, vh, preferred_element_type=jnp.float32)        # (S, dh)
        attn_out = attn_out + jnp.dot(oh, ow_ref[h],                    # (dh, D)
                                      preferred_element_type=jnp.float32)

    # ---- residual + LayerNorm1 ----
    h1 = _ln(x + attn_out, ln1g_ref[...], ln1b_ref[...], eps)

    # ---- feed-forward (ReLU) + residual + LayerNorm2 (FF intermediate stays in VMEM) ----
    ff = jnp.dot(h1, ff1w_ref[...], preferred_element_type=jnp.float32) + ff1b_ref[...]
    ff = jnp.maximum(ff, 0.0)
    ff = jnp.dot(ff, ff2w_ref[...], preferred_element_type=jnp.float32) + ff2b_ref[...]
    y = _ln(h1 + ff, ln2g_ref[...], ln2b_ref[...], eps)

    o_ref[0] = y.astype(o_ref.dtype)


def pallas_encoder_layer(x, p, *, num_heads, eps=1e-5):
    """One nn.TransformerEncoderLayer (batch_first, post-norm, relu), eval mode.

    x: (B, S, D) -> (B, S, D).  One fused pallas_call, grid over batch.
    """
    B, S, D = x.shape
    dh = D // num_heads

    # Pre-split weights per head (plain JAX reshapes of tiny weight tensors).
    qkv_w = p["qkv_w"].reshape(D, 3, num_heads, dh).transpose(1, 2, 0, 3)  # (3,H,D,dh)
    qkv_b = p["qkv_b"].reshape(3, num_heads, 1, dh)                        # (3,H,1,dh)
    out_w = p["out_w"].reshape(num_heads, dh, D)                           # (H,dh,D)
    out_b = p["out_b"].reshape(1, D)
    ln1_g = p["ln1_g"].reshape(1, D)
    ln1_b = p["ln1_b"].reshape(1, D)
    ln2_g = p["ln2_g"].reshape(1, D)
    ln2_b = p["ln2_b"].reshape(1, D)
    ff1_w, ff1_b = p["ff1_w"], p["ff1_b"].reshape(1, -1)
    ff2_w, ff2_b = p["ff2_w"], p["ff2_b"].reshape(1, D)

    weights = (qkv_w, qkv_b, out_w, out_b, ln1_g, ln1_b,
               ff1_w, ff1_b, ff2_w, ff2_b, ln2_g, ln2_b)

    x_spec = pl.BlockSpec((1, S, D), lambda b: (b, 0, 0))
    kernel = functools.partial(_encoder_layer_kernel, num_heads=num_heads, eps=eps)

    return pl.pallas_call(
        kernel,
        out_shape=jax.ShapeDtypeStruct((B, S, D), x.dtype),
        grid_spec=pltpu.PrefetchScalarGridSpec(
            num_scalar_prefetch=0,
            grid=(B,),
            in_specs=[x_spec] + [_full_spec(a) for a in weights],
            out_specs=x_spec,
        ),
        # batch axis parallel -> v7x megacore splits it across its 2 TCs
        compiler_params=pltpu.CompilerParams(dimension_semantics=("parallel",)),
    )(x, *weights)


# -----------------------------------------------------------------------------
# Kernel 3: fused mean-pool over sequence + classifier (Linear->ReLU->Linear)
# -----------------------------------------------------------------------------
def _pool_classifier_kernel(x_ref, w1_ref, b1_ref, w2_ref, b2_ref, o_ref):
    B = x_ref.shape[0]
    rows = []
    for b in range(B):                                   # static, tiny B
        xb = x_ref[b].astype(jnp.float32)                # (S, D)
        rows.append(jnp.mean(xb, axis=0, keepdims=True))  # (1, D)
    pooled = jnp.concatenate(rows, axis=0)               # (B, D)
    h = jnp.dot(pooled, w1_ref[...], preferred_element_type=jnp.float32) + b1_ref[...]
    h = jnp.maximum(h, 0.0)
    logits = jnp.dot(h, w2_ref[...], preferred_element_type=jnp.float32) + b2_ref[...]
    o_ref[...] = logits.astype(o_ref.dtype)


def pallas_pool_classifier(x, w1, b1, w2, b2):
    """x: (B, S, D) -> logits (B, num_primitives).  Single fused pallas_call."""
    B, S, D = x.shape
    N1 = w1.shape[1]
    N2 = w2.shape[1]
    return pl.pallas_call(
        _pool_classifier_kernel,
        out_shape=jax.ShapeDtypeStruct((B, N2), x.dtype),
        grid_spec=pltpu.PrefetchScalarGridSpec(
            num_scalar_prefetch=0,
            grid=(1,),
            in_specs=[
                pl.BlockSpec((B, S, D), lambda i: (0, 0, 0)),
                pl.BlockSpec((D, N1), lambda i: (0, 0)),
                pl.BlockSpec((1, N1), lambda i: (0, 0)),
                pl.BlockSpec((N1, N2), lambda i: (0, 0)),
                pl.BlockSpec((1, N2), lambda i: (0, 0)),
            ],
            out_specs=pl.BlockSpec((B, N2), lambda i: (0, 0)),
        ),
    )(x, w1, b1.reshape(1, N1), w2, b2.reshape(1, N2))


# -----------------------------------------------------------------------------
# Model (JAX glue composing the Pallas kernels)
# -----------------------------------------------------------------------------
def neural_guide_forward(params, input_grids, output_grids, *, num_heads):
    """input_grids / output_grids: (B, G, G) int32 color indices -> (B, num_primitives)."""
    B, G, _ = input_grids.shape
    D = params["proj_w"].shape[0]
    half = D // 2

    # GridEmbedding (gather + concat in plain JAX; projection in Pallas)
    grids = jnp.stack([input_grids, output_grids], axis=1)     # (B, 2, G, G)
    grids_flat = grids.reshape(B * 2, G * G)                   # (B*2, G*G)
    color = jnp.take(params["color_emb"], grids_flat, axis=0)  # (B*2, G*G, D/2)
    pos = jnp.broadcast_to(params["pos_emb"][None], (B * 2, G * G, half))
    combined = jnp.concatenate([color, pos], axis=-1)          # (B*2, G*G, D)
    x2d = combined.reshape(B * 2 * G * G, D)
    emb = pallas_linear(x2d, params["proj_w"], params["proj_b"])
    S = 2 * G * G
    x = emb.reshape(B, S, D)

    # Transformer encoder: one fused pallas_call per layer
    for layer_p in params["layers"]:
        x = pallas_encoder_layer(x, layer_p, num_heads=num_heads)

    # Fused global average pool + classifier head
    logits = pallas_pool_classifier(
        x, params["cls1_w"], params["cls1_b"], params["cls2_w"], params["cls2_b"])
    return logits


# -----------------------------------------------------------------------------
# Deterministic parameter initialization (shapes follow the torch module)
# -----------------------------------------------------------------------------
def init_params(key, *, grid_size, embed_dim, num_layers, max_colors, num_primitives):
    D = embed_dim
    half = D // 2
    ffn = 4 * D

    def linear_init(k, fan_in, fan_out):
        kw, kb = jax.random.split(k)
        bound = 1.0 / (fan_in ** 0.5)
        w = jax.random.uniform(kw, (fan_in, fan_out), jnp.float32, -bound, bound)
        b = jax.random.uniform(kb, (fan_out,), jnp.float32, -bound, bound)
        return w, b

    keys = jax.random.split(key, 8 + num_layers)
    params = {}
    params["color_emb"] = jax.random.normal(keys[0], (max_colors + 1, half), jnp.float32)
    params["pos_emb"] = jax.random.normal(keys[1], (grid_size * grid_size, half), jnp.float32)
    params["proj_w"], params["proj_b"] = linear_init(keys[2], D, D)

    layers = []
    for li in range(num_layers):
        lk = jax.random.split(keys[3 + li], 4)
        lp = {}
        lp["qkv_w"], lp["qkv_b"] = linear_init(lk[0], D, 3 * D)
        lp["out_w"], lp["out_b"] = linear_init(lk[1], D, D)
        lp["ff1_w"], lp["ff1_b"] = linear_init(lk[2], D, ffn)
        lp["ff2_w"], lp["ff2_b"] = linear_init(lk[3], ffn, D)
        lp["ln1_g"] = jnp.ones((D,), jnp.float32)
        lp["ln1_b"] = jnp.zeros((D,), jnp.float32)
        lp["ln2_g"] = jnp.ones((D,), jnp.float32)
        lp["ln2_b"] = jnp.zeros((D,), jnp.float32)
        layers.append(lp)
    params["layers"] = layers

    params["cls1_w"], params["cls1_b"] = linear_init(keys[3 + num_layers], D, D // 2)
    params["cls2_w"], params["cls2_b"] = linear_init(keys[4 + num_layers], D // 2, num_primitives)
    return params


# -----------------------------------------------------------------------------
# Main
# -----------------------------------------------------------------------------
if __name__ == "__main__":
    # Small, module-consistent configuration.
    GRID_SIZE = 8
    EMBED_DIM = 32
    NUM_HEADS = 4
    NUM_LAYERS = 2
    MAX_COLORS = 10
    NUM_PRIMITIVES = 6
    BATCH = 2

    key = jax.random.PRNGKey(0)
    pkey, ikey, okey = jax.random.split(key, 3)

    params = init_params(
        pkey,
        grid_size=GRID_SIZE,
        embed_dim=EMBED_DIM,
        num_layers=NUM_LAYERS,
        max_colors=MAX_COLORS,
        num_primitives=NUM_PRIMITIVES,
    )

    input_grids = jax.random.randint(ikey, (BATCH, GRID_SIZE, GRID_SIZE), 0, MAX_COLORS + 1, jnp.int32)
    output_grids = jax.random.randint(okey, (BATCH, GRID_SIZE, GRID_SIZE), 0, MAX_COLORS + 1, jnp.int32)

    fwd = jax.jit(functools.partial(neural_guide_forward, num_heads=NUM_HEADS))
    logits = fwd(params, input_grids, output_grids)
    logits = jax.block_until_ready(logits)

    assert logits.shape == (BATCH, NUM_PRIMITIVES), logits.shape
    assert bool(jnp.all(jnp.isfinite(logits)))
    print("KERNEL_OK")
</pallas_src>

<mosaic_0001>
module attributes {stable_mosaic.version = 11 : i64} {
  func.func @_linear_kernel(%arg0: i32, %arg1: memref<256x32xf32, #tpu.memory_space<vmem>>, %arg2: memref<32x32xf32, #tpu.memory_space<vmem>>, %arg3: memref<1x32xf32, #tpu.memory_space<vmem>>, %arg4: memref<256x32xf32, #tpu.memory_space<vmem>>) attributes {dimension_semantics = [#tpu.dimension_semantics<parallel>], iteration_bounds = array<i64: 1>, scalar_prefetch = 0 : i64, scratch_operands = 0 : i64, tpu.core_type = #tpu.core_type<tc>, window_params = [{transform_indices = @transform_0, window_bounds = array<i64: 256, 32>}, {pipeline_mode = #tpu.pipeline_mode<synchronous>, transform_indices = @transform_1, window_bounds = array<i64: 32, 32>}, {pipeline_mode = #tpu.pipeline_mode<synchronous>, transform_indices = @transform_2, window_bounds = array<i64: 1, 32>}, {transform_indices = @transform_3, window_bounds = array<i64: 256, 32>}]} {
    %c0 = arith.constant 0 : index
    %c0_0 = arith.constant 0 : index
    %0 = vector.load %arg1[%c0, %c0_0] : memref<256x32xf32, #tpu.memory_space<vmem>>, vector<256x32xf32>
    %c0_1 = arith.constant 0 : index
    %c0_2 = arith.constant 0 : index
    %1 = vector.load %arg2[%c0_1, %c0_2] : memref<32x32xf32, #tpu.memory_space<vmem>>, vector<32x32xf32>
    %cst = arith.constant dense<0.000000e+00> : vector<256x32xf32>
    %2 = tpu.matmul %0, %1, %cst {dimension_numbers = #tpu.dot_dimension_numbers<[1], [0], [0], [1], [0, 0, 1, 1], [], []>} : vector<256x32xf32>, vector<32x32xf32>, vector<256x32xf32> -> vector<256x32xf32>
    %c0_3 = arith.constant 0 : index
    %c0_4 = arith.constant 0 : index
    %3 = vector.load %arg3[%c0_3, %c0_4] : memref<1x32xf32, #tpu.memory_space<vmem>>, vector<1x32xf32>
    %4 = vector.broadcast %3 : vector<1x32xf32> to vector<256x32xf32>
    %5 = arith.addf %2, %4 : vector<256x32xf32>
    %c0_5 = arith.constant 0 : index
    %c0_6 = arith.constant 0 : index
    %6 = vector.load %arg4[%c0_5, %c0_6] : memref<256x32xf32, #tpu.memory_space<vmem>>, vector<256x32xf32>
    tpu.vector_store %arg4[%c0_5, %c0_6], %5 {strides = array<i32>} : memref<256x32xf32, #tpu.memory_space<vmem>>, vector<256x32xf32>,
    return
  }
  func.func @transform_0(%arg0: i32) -> (i32, i32) {
    %c0_i32 = arith.constant 0 : i32
    %c0_i32_0 = arith.constant 0 : i32
    return %arg0, %c0_i32 : i32, i32
  }
  func.func @transform_1(%arg0: i32) -> (i32, i32) {
    %c0_i32 = arith.constant 0 : i32
    %c0_i32_0 = arith.constant 0 : i32
    %c0_i32_1 = arith.constant 0 : i32
    return %c0_i32, %c0_i32_0 : i32, i32
  }
  func.func @transform_2(%arg0: i32) -> (i32, i32) {
    %c0_i32 = arith.constant 0 : i32
    %c0_i32_0 = arith.constant 0 : i32
    %c0_i32_1 = arith.constant 0 : i32
    return %c0_i32, %c0_i32_0 : i32, i32
  }
  func.func @transform_3(%arg0: i32) -> (i32, i32) {
    %c0_i32 = arith.constant 0 : i32
    %c0_i32_0 = arith.constant 0 : i32
    return %arg0, %c0_i32 : i32, i32
  }
}

module attributes {stable_mosaic.version = 11 : i64} {
  func.func @_encoder_layer_kernel(%arg0: i32, %arg1: memref<1x128x32xf32, #tpu.memory_space<vmem>>, %arg2: memref<3x4x32x8xf32, #tpu.memory_space<vmem>>, %arg3: memref<3x4x1x8xf32, #tpu.memory_space<vmem>>, %arg4: memref<4x8x32xf32, #tpu.memory_space<vmem>>, %arg5: memref<1x32xf32, #tpu.memory_space<vmem>>, %arg6: memref<1x32xf32, #tpu.memory_space<vmem>>, %arg7: memref<1x32xf32, #tpu.memory_space<vmem>>, %arg8: memref<32x128xf32, #tpu.memory_space<vmem>>, %arg9: memref<1x128xf32, #tpu.memory_space<vmem>>, %arg10: memref<128x32xf32, #tpu.memory_space<vmem>>, %arg11: memref<1x32xf32, #tpu.memory_space<vmem>>, %arg12: memref<1x32xf32, #tpu.memory_space<vmem>>, %arg13: memref<1x32xf32, #tpu.memory_space<vmem>>, %arg14: memref<1x128x32xf32, #tpu.memory_space<vmem>>) attributes {dimension_semantics = [#tpu.dimension_semantics<parallel>], iteration_bounds = array<i64: 2>, scalar_prefetch = 0 : i64, scratch_operands = 0 : i64, tpu.core_type = #tpu.core_type<tc>, window_params = [{transform_indices = @transform_0, window_bounds = array<i64: 1, 128, 32>}, {pipeline_mode = #tpu.pipeline_mode<synchronous>, transform_indices = @transform_1, window_bounds = array<i64: 3, 4, 32, 8>}, {pipeline_mode = #tpu.pipeline_mode<synchronous>, transform_indices = @transform_2, window_bounds = array<i64: 3, 4, 1, 8>}, {pipeline_mode = #tpu.pipeline_mode<synchronous>, transform_indices = @transform_3, window_bounds = array<i64: 4, 8, 32>}, {pipeline_mode = #tpu.pipeline_mode<synchronous>, transform_indices = @transform_4, window_bounds = array<i64: 1, 32>}, {pipeline_mode = #tpu.pipeline_mode<synchronous>, transform_indices = @transform_5, window_bounds = array<i64: 1, 32>}, {pipeline_mode = #tpu.pipeline_mode<synchronous>, transform_indices = @transform_6, window_bounds = array<i64: 1, 32>}, {pipeline_mode = #tpu.pipeline_mode<synchronous>, transform_indices = @transform_7, window_bounds = array<i64: 32, 128>}, {pipeline_mode = #tpu.pipeline_mode<synchronous>, transform_indices = @transform_8, window_bounds = array<i64: 1, 128>}, {pipeline_mode = #tpu.pipeline_mode<synchronous>, transform_indices = @transform_9, window_bounds = array<i64: 128, 32>}, {pipeline_mode = #tpu.pipeline_mode<synchronous>, transform_indices = @transform_10, window_bounds = array<i64: 1, 32>}, {pipeline_mode = #tpu.pipeline_mode<synchronous>, transform_indices = @transform_11, window_bounds = array<i64: 1, 32>}, {pipeline_mode = #tpu.pipeline_mode<synchronous>, transform_indices = @transform_12, window_bounds = array<i64: 1, 32>}, {transform_indices = @transform_13, window_bounds = array<i64: 1, 128, 32>}]} {
    %c0 = arith.constant 0 : index
    %c0_0 = arith.constant 0 : index
    %c0_1 = arith.constant 0 : index
    %0 = vector.load %arg1[%c0, %c0_0, %c0_1] : memref<1x128x32xf32, #tpu.memory_space<vmem>>, vector<1x128x32xf32>
    %1 = vector.shape_cast %0 : vector<1x128x32xf32> to vector<128x32xf32>
    %c0_2 = arith.constant 0 : index
    %c0_3 = arith.constant 0 : index
    %2 = vector.load %arg5[%c0_2, %c0_3] : memref<1x32xf32, #tpu.memory_space<vmem>>, vector<1x32xf32>
    %c0_4 = arith.constant 0 : index
    %c0_5 = arith.constant 0 : index
    %c0_6 = arith.constant 0 : index
    %c0_7 = arith.constant 0 : index
    %3 = vector.load %arg2[%c0_4, %c0_5, %c0_6, %c0_7] : memref<3x4x32x8xf32, #tpu.memory_space<vmem>>, vector<1x1x32x8xf32>
    %4 = vector.shape_cast %3 : vector<1x1x32x8xf32> to vector<32x8xf32>
    %c1 = arith.constant 1 : index
    %c0_8 = arith.constant 0 : index
    %c0_9 = arith.constant 0 : index
    %c0_10 = arith.constant 0 : index
    %5 = vector.load %arg2[%c1, %c0_8, %c0_9, %c0_10] : memref<3x4x32x8xf32, #tpu.memory_space<vmem>>, vector<1x1x32x8xf32>
    %6 = vector.shape_cast %5 : vector<1x1x32x8xf32> to vector<32x8xf32>
    %c2 = arith.constant 2 : index
    %c0_11 = arith.constant 0 : index
    %c0_12 = arith.constant 0 : index
    %c0_13 = arith.constant 0 : index
    %7 = vector.load %arg2[%c2, %c0_11, %c0_12, %c0_13] : memref<3x4x32x8xf32, #tpu.memory_space<vmem>>, vector<1x1x32x8xf32>
    %8 = vector.shape_cast %7 : vector<1x1x32x8xf32> to vector<32x8xf32>
    %cst = arith.constant dense<0.000000e+00> : vector<128x8xf32>
    %9 = tpu.matmul %1, %4, %cst {dimension_numbers = #tpu.dot_dimension_numbers<[1], [0], [0], [1], [0, 0, 1, 1], [], []>} : vector<128x32xf32>, vector<32x8xf32>, vector<128x8xf32> -> vector<128x8xf32>
    %c0_14 = arith.constant 0 : index
    %c0_15 = arith.constant 0 : index
    %c0_16 = arith.constant 0 : index
    %c0_17 = arith.constant 0 : index
    %10 = vector.load %arg3[%c0_14, %c0_15, %c0_16, %c0_17] : memref<3x4x1x8xf32, #tpu.memory_space<vmem>>, vector<1x1x1x8xf32>
    %11 = vector.shape_cast %10 : vector<1x1x1x8xf32> to vector<1x8xf32>
    %12 = vector.broadcast %11 : vector<1x8xf32> to vector<128x8xf32>
    %13 = arith.addf %9, %12 : vector<128x8xf32>
    %cst_18 = arith.constant dense<0.000000e+00> : vector<128x8xf32>
    %14 = tpu.matmul %1, %6, %cst_18 {dimension_numbers = #tpu.dot_dimension_numbers<[1], [0], [0], [1], [0, 0, 1, 1], [], []>} : vector<128x32xf32>, vector<32x8xf32>, vector<128x8xf32> -> vector<128x8xf32>
    %c1_19 = arith.constant 1 : index
    %c0_20 = arith.constant 0 : index
    %c0_21 = arith.constant 0 : index
    %c0_22 = arith.constant 0 : index
    %15 = vector.load %arg3[%c1_19, %c0_20, %c0_21, %c0_22] : memref<3x4x1x8xf32, #tpu.memory_space<vmem>>, vector<1x1x1x8xf32>
    %16 = vector.shape_cast %15 : vector<1x1x1x8xf32> to vector<1x8xf32>
    %17 = vector.broadcast %16 : vector<1x8xf32> to vector<128x8xf32>
    %18 = arith.addf %14, %17 : vector<128x8xf32>
    %cst_23 = arith.constant dense<0.000000e+00> : vector<128x8xf32>
    %19 = tpu.matmul %1, %8, %cst_23 {dimension_numbers = #tpu.dot_dimension_numbers<[1], [0], [0], [1], [0, 0, 1, 1], [], []>} : vector<128x32xf32>, vector<32x8xf32>, vector<128x8xf32> -> vector<128x8xf32>
    %c2_24 = arith.constant 2 : index
    %c0_25 = arith.constant 0 : index
    %c0_26 = arith.constant 0 : index
    %c0_27 = arith.constant 0 : index
    %20 = vector.load %arg3[%c2_24, %c0_25, %c0_26, %c0_27] : memref<3x4x1x8xf32, #tpu.memory_space<vmem>>, vector<1x1x1x8xf32>
    %21 = vector.shape_cast %20 : vector<1x1x1x8xf32> to vector<1x8xf32>
    %22 = vector.broadcast %21 : vector<1x8xf32> to vector<128x8xf32>
    %23 = arith.addf %19, %22 : vector<128x8xf32>
    %cst_28 = arith.constant dense<0.000000e+00> : vector<128x128xf32>
    %24 = tpu.matmul %13, %18, %cst_28 {dimension_numbers = #tpu.dot_dimension_numbers<[1], [1], [0], [0], [0, 0, 1, 0], [], []>} : vector<128x8xf32>, vector<128x8xf32>, vector<128x128xf32> -> vector<128x128xf32>
    %cst_29 = arith.constant 0.353553385 : f32
    %25 = vector.broadcast %cst_29 : f32 to vector<128x128xf32>
    %26 = arith.mulf %24, %25 : vector<128x128xf32>
    %cst_30 = arith.constant dense<0xFF800000> : vector<128xf32>
    %27 = vector.multi_reduction <maximumf>, %26, %cst_30 [1] : vector<128x128xf32> to vector<128xf32>
    %28 = vector.shape_cast %27 : vector<128xf32> to vector<128x1xf32>
    %29 = vector.broadcast %28 : vector<128x1xf32> to vector<128x128xf32>
    %30 = arith.subf %26, %29 : vector<128x128xf32>
    %31 = math.exp %30 : vector<128x128xf32>
    %cst_31 = arith.constant dense<0.000000e+00> : vector<128xf32>
    %32 = vector.multi_reduction <add>, %31, %cst_31 [1] : vector<128x128xf32> to vector<128xf32>
    %33 = vector.shape_cast %32 : vector<128xf32> to vector<128x1xf32>
    %34 = vector.broadcast %33 : vector<128x1xf32> to vector<128x128xf32>
    %35 = arith.divf %31, %34 : vector<128x128xf32>
    %cst_32 = arith.constant dense<0.000000e+00> : vector<128x8xf32>
    %36 = tpu.matmul %35, %23, %cst_32 {dimension_numbers = #tpu.dot_dimension_numbers<[1], [0], [0], [1], [0, 0, 1, 1], [], []>} : vector<128x128xf32>, vector<128x8xf32>, vector<128x8xf32> -> vector<128x8xf32>
    %c0_33 = arith.constant 0 : index
    %c0_34 = arith.constant 0 : index
    %c0_35 = arith.constant 0 : index
    %37 = vector.load %arg4[%c0_33, %c0_34, %c0_35] : memref<4x8x32xf32, #tpu.memory_space<vmem>>, vector<1x8x32xf32>
    %38 = vector.shape_cast %37 : vector<1x8x32xf32> to vector<8x32xf32>
    %cst_36 = arith.constant dense<0.000000e+00> : vector<128x32xf32>
    %39 = tpu.matmul %36, %38, %cst_36 {dimension_numbers = #tpu.dot_dimension_numbers<[1], [0], [0], [1], [0, 0, 1, 1], [], []>} : vector<128x8xf32>, vector<8x32xf32>, vector<128x32xf32> -> vector<128x32xf32>
    %40 = vector.broadcast %2 : vector<1x32xf32> to vector<128x32xf32>
    %41 = arith.addf %40, %39 : vector<128x32xf32>
    %c0_37 = arith.constant 0 : index
    %c1_38 = arith.constant 1 : index
    %c0_39 = arith.constant 0 : index
    %c0_40 = arith.constant 0 : index
    %42 = vector.load %arg2[%c0_37, %c1_38, %c0_39, %c0_40] : memref<3x4x32x8xf32, #tpu.memory_space<vmem>>, vector<1x1x32x8xf32>
    %43 = vector.shape_cast %42 : vector<1x1x32x8xf32> to vector<32x8xf32>
    %c1_41 = arith.constant 1 : index
    %c1_42 = arith.constant 1 : index
    %c0_43 = arith.constant 0 : index
    %c0_44 = arith.constant 0 : index
    %44 = vector.load %arg2[%c1_41, %c1_42, %c0_43, %c0_44] : memref<3x4x32x8xf32, #tpu.memory_space<vmem>>, vector<1x1x32x8xf32>
    %45 = vector.shape_cast %44 : vector<1x1x32x8xf32> to vector<32x8xf32>
    %c2_45 = arith.constant 2 : index
    %c1_46 = arith.constant 1 : index
    %c0_47 = arith.constant 0 : index
    %c0_48 = arith.constant 0 : index
    %46 = vector.load %arg2[%c2_45, %c1_46, %c0_47, %c0_48] : memref<3x4x32x8xf32, #tpu.memory_space<vmem>>, vector<1x1x32x8xf32>
    %47 = vector.shape_cast %46 : vector<1x1x32x8xf32> to vector<32x8xf32>
    %cst_49 = arith.constant dense<0.000000e+00> : vector<128x8xf32>
    %48 = tpu.matmul %1, %43, %cst_49 {dimension_numbers = #tpu.dot_dimension_numbers<[1], [0], [0], [1], [0, 0, 1, 1], [], []>} : vector<128x32xf32>, vector<32x8xf32>, vector<128x8xf32> -> vector<128x8xf32>
    %c0_50 = arith.constant 0 : index
    %c1_51 = arith.constant 1 : index
    %c0_52 = arith.constant 0 : index
    %c0_53 = arith.constant 0 : index
    %49 = vector.load %arg3[%c0_50, %c1_51, %c0_52, %c0_53] : memref<3x4x1x8xf32, #tpu.memory_space<vmem>>, vector<1x1x1x8xf32>
    %50 = vector.shape_cast %49 : vector<1x1x1x8xf32> to vector<1x8xf32>
    %51 = vector.broadcast %50 : vector<1x8xf32> to vector<128x8xf32>
    %52 = arith.addf %48, %51 : vector<128x8xf32>
    %cst_54 = arith.constant dense<0.000000e+00> : vector<128x8xf32>
    %53 = tpu.matmul %1, %45, %cst_54 {dimension_numbers = #tpu.dot_dimension_numbers<[1], [0], [0], [1], [0, 0, 1, 1], [], []>} : vector<128x32xf32>, vector<32x8xf32>, vector<128x8xf32> -> vector<128x8xf32>
    %c1_55 = arith.constant 1 : index
    %c1_56 = arith.constant 1 : index
    %c0_57 = arith.constant 0 : index
    %c0_58 = arith.constant 0 : index
    %54 = vector.load %arg3[%c1_55, %c1_56, %c0_57, %c0_58] : memref<3x4x1x8xf32, #tpu.memory_space<vmem>>, vector<1x1x1x8xf32>
    %55 = vector.shape_cast %54 : vector<1x1x1x8xf32> to vector<1x8xf32>
    %56 = vector.broadcast %55 : vector<1x8xf32> to vector<128x8xf32>
    %57 = arith.addf %53, %56 : vector<128x8xf32>
    %cst_59 = arith.constant dense<0.000000e+00> : vector<128x8xf32>
    %58 = tpu.matmul %1, %47, %cst_59 {dimension_numbers = #tpu.dot_dimension_numbers<[1], [0], [0], [1], [0, 0, 1, 1], [], []>} : vector<128x32xf32>, vector<32x8xf32>, vector<128x8xf32> -> vector<128x8xf32>
    %c2_60 = arith.constant 2 : index
    %c1_61 = arith.constant 1 : index
    %c0_62 = arith.constant 0 : index
    %c0_63 = arith.constant 0 : index
    %59 = vector.load %arg3[%c2_60, %c1_61, %c0_62, %c0_63] : memref<3x4x1x8xf32, #tpu.memory_space<vmem>>, vector<1x1x1x8xf32>
    %60 = vector.shape_cast %59 : vector<1x1x1x8xf32> to vector<1x8xf32>
    %61 = vector.broadcast %60 : vector<1x8xf32> to vector<128x8xf32>
    %62 = arith.addf %58, %61 : vector<128x8xf32>
    %cst_64 = arith.constant dense<0.000000e+00> : vector<128x128xf32>
    %63 = tpu.matmul %52, %57, %cst_64 {dimension_numbers = #tpu.dot_dimension_numbers<[1], [1], [0], [0], [0, 0, 1, 0], [], []>} : vector<128x8xf32>, vector<128x8xf32>, vector<128x128xf32> -> vector<128x128xf32>
    %cst_65 = arith.constant 0.353553385 : f32
    %64 = vector.broadcast %cst_65 : f32 to vector<128x128xf32>
    %65 = arith.mulf %63, %64 : vector<128x128xf32>
    %cst_66 = arith.constant dense<0xFF800000> : vector<128xf32>
    %66 = vector.multi_reduction <maximumf>, %65, %cst_66 [1] : vector<128x128xf32> to vector<128xf32>
    %67 = vector.shape_cast %66 : vector<128xf32> to vector<128x1xf32>
    %68 = vector.broadcast %67 : vector<128x1xf32> to vector<128x128xf32>
    %69 = arith.subf %65, %68 : vector<128x128xf32>
    %70 = math.exp %69 : vector<128x128xf32>
    %cst_67 = arith.constant dense<0.000000e+00> : vector<128xf32>
    %71 = vector.multi_reduction <add>, %70, %cst_67 [1] : vector<128x128xf32> to vector<128xf32>
    %72 = vector.shape_cast %71 : vector<128xf32> to vector<128x1xf32>
    %73 = vector.broadcast %72 : vector<128x1xf32> to vector<128x128xf32>
    %74 = arith.divf %70, %73 : vector<128x128xf32>
    %cst_68 = arith.constant dense<0.000000e+00> : vector<128x8xf32>
    %75 = tpu.matmul %74, %62, %cst_68 {dimension_numbers = #tpu.dot_dimension_numbers<[1], [0], [0], [1], [0, 0, 1, 1], [], []>} : vector<128x128xf32>, vector<128x8xf32>, vector<128x8xf32> -> vector<128x8xf32>
    %c1_69 = arith.constant 1 : index
    %c0_70 = arith.constant 0 : index
    %c0_71 = arith.constant 0 : index
    %76 = vector.load %arg4[%c1_69, %c0_70, %c0_71] : memref<4x8x32xf32, #tpu.memory_space<vmem>>, vector<1x8x32xf32>
    %77 = vector.shape_cast %76 : vector<1x8x32xf32> to vector<8x32xf32>
    %cst_72 = arith.constant dense<0.000000e+00> : vector<128x32xf32>
    %78 = tpu.matmul %75, %77, %cst_72 {dimension_numbers = #tpu.dot_dimension_numbers<[1], [0], [0], [1], [0, 0, 1, 1], [], []>} : vector<128x8xf32>, vector<8x32xf32>, vector<128x32xf32> -> vector<128x32xf32>
    %79 = arith.addf %41, %78 : vector<128x32xf32>
    %c0_73 = arith.constant 0 : index
    %c2_74 = arith.constant 2 : index
    %c0_75 = arith.constant 0 : index
    %c0_76 = arith.constant 0 : index
    %80 = vector.load %arg2[%c0_73, %c2_74, %c0_75, %c0_76] : memref<3x4x32x8xf32, #tpu.memory_space<vmem>>, vector<1x1x32x8xf32>
    %81 = vector.shape_cast %80 : vector<1x1x32x8xf32> to vector<32x8xf32>
    %c1_77 = arith.constant 1 : index
    %c2_78 = arith.constant 2 : index
    %c0_79 = arith.constant 0 : index
    %c0_80 = arith.constant 0 : index
    %82 = vector.load %arg2[%c1_77, %c2_78, %c0_79, %c0_80] : memref<3x4x32x8xf32, #tpu.memory_space<vmem>>, vector<1x1x32x8xf32>
    %83 = vector.shape_cast %82 : vector<1x1x32x8xf32> to vector<32x8xf32>
    %c2_81 = arith.constant 2 : index
    %c2_82 = arith.constant 2 : index
    %c0_83 = arith.constant 0 : index
    %c0_84 = arith.constant 0 : index
    %84 = vector.load %arg2[%c2_81, %c2_82, %c0_83, %c0_84] : memref<3x4x32x8xf32, #tpu.memory_space<vmem>>, vector<1x1x32x8xf32>
    %85 = vector.shape_cast %84 : vector<1x1x32x8xf32> to vector<32x8xf32>
    %cst_85 = arith.constant dense<0.000000e+00> : vector<128x8xf32>
    %86 = tpu.matmul %1, %81, %cst_85 {dimension_numbers = #tpu.dot_dimension_numbers<[1], [0], [0], [1], [0, 0, 1, 1], [], []>} : vector<128x32xf32>, vector<32x8xf32>, vector<128x8xf32> -> vector<128x8xf32>
    %c0_86 = arith.constant 0 : index
    %c2_87 = arith.constant 2 : index
    %c0_88 = arith.constant 0 : index
    %c0_89 = arith.constant 0 : index
    %87 = vector.load %arg3[%c0_86, %c2_87, %c0_88, %c0_89] : memref<3x4x1x8xf32, #tpu.memory_space<vmem>>, vector<1x1x1x8xf32>
    %88 = vector.shape_cast %87 : vector<1x1x1x8xf32> to vector<1x8xf32>
    %89 = vector.broadcast %88 : vector<1x8xf32> to vector<128x8xf32>
    %90 = arith.addf %86, %89 : vector<128x8xf32>
    %cst_90 = arith.constant dense<0.000000e+00> : vector<128x8xf32>
    %91 = tpu.matmul %1, %83, %cst_90 {dimension_numbers = #tpu.dot_dimension_numbers<[1], [0], [0], [1], [0, 0, 1, 1], [], []>} : vector<128x32xf32>, vector<32x8xf32>, vector<128x8xf32> -> vector<128x8xf32>
    %c1_91 = arith.constant 1 : index
    %c2_92 = arith.constant 2 : index
    %c0_93 = arith.constant 0 : index
    %c0_94 = arith.constant 0 : index
    %92 = vector.load %arg3[%c1_91, %c2_92, %c0_93, %c0_94] : memref<3x4x1x8xf32, #tpu.memory_space<vmem>>, vector<1x1x1x8xf32>
    %93 = vector.shape_cast %92 : vector<1x1x1x8xf32> to vector<1x8xf32>
    %94 = vector.broadcast %93 : vector<1x8xf32> to vector<128x8xf32>
    %95 = arith.addf %91, %94 : vector<128x8xf32>
    %cst_95 = arith.constant dense<0.000000e+00> : vector<128x8xf32>
    %96 = tpu.matmul %1, %85, %cst_95 {dimension_numbers = #tpu.dot_dimension_numbers<[1], [0], [0], [1], [0, 0, 1, 1], [], []>} : vector<128x32xf32>, vector<32x8xf32>, vector<128x8xf32> -> vector<128x8xf32>
    %c2_96 = arith.constant 2 : index
    %c2_97 = arith.constant 2 : index
    %c0_98 = arith.constant 0 : index
    %c0_99 = arith.constant 0 : index
    %97 = vector.load %arg3[%c2_96, %c2_97, %c0_98, %c0_99] : memref<3x4x1x8xf32, #tpu.memory_space<vmem>>, vector<1x1x1x8xf32>
    %98 = vector.shape_cast %97 : vector<1x1x1x8xf32> to vector<1x8xf32>
    %99 = vector.broadcast %98 : vector<1x8xf32> to vector<128x8xf32>
    %100 = arith.addf %96, %99 : vector<128x8xf32>
    %cst_100 = arith.constant dense<0.000000e+00> : vector<128x128xf32>
    %101 = tpu.matmul %90, %95, %cst_100 {dimension_numbers = #tpu.dot_dimension_numbers<[1], [1], [0], [0], [0, 0, 1, 0], [], []>} : vector<128x8xf32>, vector<128x8xf32>, vector<128x128xf32> -> vector<128x128xf32>
    %cst_101 = arith.constant 0.353553385 : f32
    %102 = vector.broadcast %cst_101 : f32 to vector<128x128xf32>
    %103 = arith.mulf %101, %102 : vector<128x128xf32>
    %cst_102 = arith.constant dense<0xFF800000> : vector<128xf32>
    %104 = vector.multi_reduction <maximumf>, %103, %cst_102 [1] : vector<128x128xf32> to vector<128xf32>
    %105 = vector.shape_cast %104 : vector<128xf32> to vector<128x1xf32>
    %106 = vector.broadcast %105 : vector<128x1xf32> to vector<128x128xf32>
    %107 = arith.subf %103, %106 : vector<128x128xf32>
    %108 = math.exp %107 : vector<128x128xf32>
    %cst_103 = arith.constant dense<0.000000e+00> : vector<128xf32>
    %109 = vector.multi_reduction <add>, %108, %cst_103 [1] : vector<128x128xf32> to vector<128xf32>
    %110 = vector.shape_cast %109 : vector<128xf32> to vector<128x1xf32>
    %111 = vector.broadcast %110 : vector<128x1xf32> to vector<128x128xf32>
    %112 = arith.divf %108, %111 : vector<128x128xf32>
    %cst_104 = arith.constant dense<0.000000e+00> : vector<128x8xf32>
    %113 = tpu.matmul %112, %100, %cst_104 {dimension_numbers = #tpu.dot_dimension_numbers<[1], [0], [0], [1], [0, 0, 1, 1], [], []>} : vector<128x128xf32>, vector<128x8xf32>, vector<128x8xf32> -> vector<128x8xf32>
    %c2_105 = arith.constant 2 : index
    %c0_106 = arith.constant 0 : index
    %c0_107 = arith.constant 0 : index
    %114 = vector.load %arg4[%c2_105, %c0_106, %c0_107] : memref<4x8x32xf32, #tpu.memory_space<vmem>>, vector<1x8x32xf32>
    %115 = vector.shape_cast %114 : vector<1x8x32xf32> to vector<8x32xf32>
    %cst_108 = arith.constant dense<0.000000e+00> : vector<128x32xf32>
    %116 = tpu.matmul %113, %115, %cst_108 {dimension_numbers = #tpu.dot_dimension_numbers<[1], [0], [0], [1], [0, 0, 1, 1], [], []>} : vector<128x8xf32>, vector<8x32xf32>, vector<128x32xf32> -> vector<128x32xf32>
    %117 = arith.addf %79, %116 : vector<128x32xf32>
    %c0_109 = arith.constant 0 : index
    %c3 = arith.constant 3 : index
    %c0_110 = arith.constant 0 : index
    %c0_111 = arith.constant 0 : index
    %118 = vector.load %arg2[%c0_109, %c3, %c0_110, %c0_111] : memref<3x4x32x8xf32, #tpu.memory_space<vmem>>, vector<1x1x32x8xf32>
    %119 = vector.shape_cast %118 : vector<1x1x32x8xf32> to vector<32x8xf32>
    %c1_112 = arith.constant 1 : index
    %c3_113 = arith.constant 3 : index
    %c0_114 = arith.constant 0 : index
    %c0_115 = arith.constant 0 : index
    %120 = vector.load %arg2[%c1_112, %c3_113, %c0_114, %c0_115] : memref<3x4x32x8xf32, #tpu.memory_space<vmem>>, vector<1x1x32x8xf32>
    %121 = vector.shape_cast %120 : vector<1x1x32x8xf32> to vector<32x8xf32>
    %c2_116 = arith.constant 2 : index
    %c3_117 = arith.constant 3 : index
    %c0_118 = arith.constant 0 : index
    %c0_119 = arith.constant 0 : index
    %122 = vector.load %arg2[%c2_116, %c3_117, %c0_118, %c0_119] : memref<3x4x32x8xf32, #tpu.memory_space<vmem>>, vector<1x1x32x8xf32>
    %123 = vector.shape_cast %122 : vector<1x1x32x8xf32> to vector<32x8xf32>
    %cst_120 = arith.constant dense<0.000000e+00> : vector<128x8xf32>
    %124 = tpu.matmul %1, %119, %cst_120 {dimension_numbers = #tpu.dot_dimension_numbers<[1], [0], [0], [1], [0, 0, 1, 1], [], []>} : vector<128x32xf32>, vector<32x8xf32>, vector<128x8xf32> -> vector<128x8xf32>
    %c0_121 = arith.constant 0 : index
    %c3_122 = arith.constant 3 : index
    %c0_123 = arith.constant 0 : index
    %c0_124 = arith.constant 0 : index
    %125 = vector.load %arg3[%c0_121, %c3_122, %c0_123, %c0_124] : memref<3x4x1x8xf32, #tpu.memory_space<vmem>>, vector<1x1x1x8xf32>
    %126 = vector.shape_cast %125 : vector<1x1x1x8xf32> to vector<1x8xf32>
    %127 = vector.broadcast %126 : vector<1x8xf32> to vector<128x8xf32>
    %128 = arith.addf %124, %127 : vector<128x8xf32>
    %cst_125 = arith.constant dense<0.000000e+00> : vector<128x8xf32>
    %129 = tpu.matmul %1, %121, %cst_125 {dimension_numbers = #tpu.dot_dimension_numbers<[1], [0], [0], [1], [0, 0, 1, 1], [], []>} : vector<128x32xf32>, vector<32x8xf32>, vector<128x8xf32> -> vector<128x8xf32>
    %c1_126 = arith.constant 1 : index
    %c3_127 = arith.constant 3 : index
    %c0_128 = arith.constant 0 : index
    %c0_129 = arith.constant 0 : index
    %130 = vector.load %arg3[%c1_126, %c3_127, %c0_128, %c0_129] : memref<3x4x1x8xf32, #tpu.memory_space<vmem>>, vector<1x1x1x8xf32>
    %131 = vector.shape_cast %130 : vector<1x1x1x8xf32> to vector<1x8xf32>
    %132 = vector.broadcast %131 : vector<1x8xf32> to vector<128x8xf32>
    %133 = arith.addf %129, %132 : vector<128x8xf32>
    %cst_130 = arith.constant dense<0.000000e+00> : vector<128x8xf32>
    %134 = tpu.matmul %1, %123, %cst_130 {dimension_numbers = #tpu.dot_dimension_numbers<[1], [0], [0], [1], [0, 0, 1, 1], [], []>} : vector<128x32xf32>, vector<32x8xf32>, vector<128x8xf32> -> vector<128x8xf32>
    %c2_131 = arith.constant 2 : index
    %c3_132 = arith.constant 3 : index
    %c0_133 = arith.constant 0 : index
    %c0_134 = arith.constant 0 : index
    %135 = vector.load %arg3[%c2_131, %c3_132, %c0_133, %c0_134] : memref<3x4x1x8xf32, #tpu.memory_space<vmem>>, vector<1x1x1x8xf32>
    %136 = vector.shape_cast %135 : vector<1x1x1x8xf32> to vector<1x8xf32>
    %137 = vector.broadcast %136 : vector<1x8xf32> to vector<128x8xf32>
    %138 = arith.addf %134, %137 : vector<128x8xf32>
    %cst_135 = arith.constant dense<0.000000e+00> : vector<128x128xf32>
    %139 = tpu.matmul %128, %133, %cst_135 {dimension_numbers = #tpu.dot_dimension_numbers<[1], [1], [0], [0], [0, 0, 1, 0], [], []>} : vector<128x8xf32>, vector<128x8xf32>, vector<128x128xf32> -> vector<128x128xf32>
    %cst_136 = arith.constant 0.353553385 : f32
    %140 = vector.broadcast %cst_136 : f32 to vector<128x128xf32>
    %141 = arith.mulf %139, %140 : vector<128x128xf32>
    %cst_137 = arith.constant dense<0xFF800000> : vector<128xf32>
    %142 = vector.multi_reduction <maximumf>, %141, %cst_137 [1] : vector<128x128xf32> to vector<128xf32>
    %143 = vector.shape_cast %142 : vector<128xf32> to vector<128x1xf32>
    %144 = vector.broadcast %143 : vector<128x1xf32> to vector<128x128xf32>
    %145 = arith.subf %141, %144 : vector<128x128xf32>
    %146 = math.exp %145 : vector<128x128xf32>
    %cst_138 = arith.constant dense<0.000000e+00> : vector<128xf32>
    %147 = vector.multi_reduction <add>, %146, %cst_138 [1] : vector<128x128xf32> to vector<128xf32>
    %148 = vector.shape_cast %147 : vector<128xf32> to vector<128x1xf32>
    %149 = vector.broadcast %148 : vector<128x1xf32> to vector<128x128xf32>
    %150 = arith.divf %146, %149 : vector<128x128xf32>
    %cst_139 = arith.constant dense<0.000000e+00> : vector<128x8xf32>
    %151 = tpu.matmul %150, %138, %cst_139 {dimension_numbers = #tpu.dot_dimension_numbers<[1], [0], [0], [1], [0, 0, 1, 1], [], []>} : vector<128x128xf32>, vector<128x8xf32>, vector<128x8xf32> -> vector<128x8xf32>
    %c3_140 = arith.constant 3 : index
    %c0_141 = arith.constant 0 : index
    %c0_142 = arith.constant 0 : index
    %152 = vector.load %arg4[%c3_140, %c0_141, %c0_142] : memref<4x8x32xf32, #tpu.memory_space<vmem>>, vector<1x8x32xf32>
    %153 = vector.shape_cast %152 : vector<1x8x32xf32> to vector<8x32xf32>
    %cst_143 = arith.constant dense<0.000000e+00> : vector<128x32xf32>
    %154 = tpu.matmul %151, %153, %cst_143 {dimension_numbers = #tpu.dot_dimension_numbers<[1], [0], [0], [1], [0, 0, 1, 1], [], []>} : vector<128x8xf32>, vector<8x32xf32>, vector<128x32xf32> -> vector<128x32xf32>
    %155 = arith.addf %117, %154 : vector<128x32xf32>
    %156 = arith.addf %1, %155 : vector<128x32xf32>
    %c0_144 = arith.constant 0 : index
    %c0_145 = arith.constant 0 : index
    %157 = vector.load %arg6[%c0_144, %c0_145] : memref<1x32xf32, #tpu.memory_space<vmem>>, vector<1x32xf32>
    %c0_146 = arith.constant 0 : index
    %c0_147 = arith.constant 0 : index
    %158 = vector.load %arg7[%c0_146, %c0_147] : memref<1x32xf32, #tpu.memory_space<vmem>>, vector<1x32xf32>
    %cst_148 = arith.constant dense<0.000000e+00> : vector<128xf32>
    %159 = vector.multi_reduction <add>, %156, %cst_148 [1] : vector<128x32xf32> to vector<128xf32>
    %160 = vector.shape_cast %159 : vector<128xf32> to vector<128x1xf32>
    %cst_149 = arith.constant 3.200000e+01 : f32
    %161 = vector.broadcast %cst_149 : f32 to vector<128x1xf32>
    %162 = arith.divf %160, %161 : vector<128x1xf32>
    %163 = vector.broadcast %162 : vector<128x1xf32> to vector<128x32xf32>
    %164 = arith.subf %156, %163 : vector<128x32xf32>
    %165 = arith.mulf %164, %164 : vector<128x32xf32>
    %cst_150 = arith.constant dense<0.000000e+00> : vector<128xf32>
    %166 = vector.multi_reduction <add>, %165, %cst_150 [1] : vector<128x32xf32> to vector<128xf32>
    %167 = vector.shape_cast %166 : vector<128xf32> to vector<128x1xf32>
    %cst_151 = arith.constant 3.200000e+01 : f32
    %168 = vector.broadcast %cst_151 : f32 to vector<128x1xf32>
    %169 = arith.divf %167, %168 : vector<128x1xf32>
    %cst_152 = arith.constant 9.99999974E-6 : f32
    %170 = vector.broadcast %cst_152 : f32 to vector<128x1xf32>
    %171 = arith.addf %169, %170 : vector<128x1xf32>
    %172 = math.rsqrt %171 : vector<128x1xf32>
    %173 = vector.broadcast %172 : vector<128x1xf32> to vector<128x32xf32>
    %174 = arith.mulf %164, %173 : vector<128x32xf32>
    %175 = vector.broadcast %157 : vector<1x32xf32> to vector<128x32xf32>
    %176 = arith.mulf %174, %175 : vector<128x32xf32>
    %177 = vector.broadcast %158 : vector<1x32xf32> to vector<128x32xf32>
    %178 = arith.addf %176, %177 : vector<128x32xf32>
    %c0_153 = arith.constant 0 : index
    %c0_154 = arith.constant 0 : index
    %179 = vector.load %arg8[%c0_153, %c0_154] : memref<32x128xf32, #tpu.memory_space<vmem>>, vector<32x128xf32>
    %cst_155 = arith.constant dense<0.000000e+00> : vector<128x128xf32>
    %180 = tpu.matmul %178, %179, %cst_155 {dimension_numbers = #tpu.dot_dimension_numbers<[1], [0], [0], [1], [0, 0, 1, 1], [], []>} : vector<128x32xf32>, vector<32x128xf32>, vector<128x128xf32> -> vector<128x128xf32>
    %c0_156 = arith.constant 0 : index
    %c0_157 = arith.constant 0 : index
    %181 = vector.load %arg9[%c0_156, %c0_157] : memref<1x128xf32, #tpu.memory_space<vmem>>, vector<1x128xf32>
    %182 = vector.broadcast %181 : vector<1x128xf32> to vector<128x128xf32>
    %183 = arith.addf %180, %182 : vector<128x128xf32>
    %cst_158 = arith.constant 0.000000e+00 : f32
    %184 = vector.broadcast %cst_158 : f32 to vector<128x128xf32>
    %185 = arith.maximumf %183, %184 : vector<128x128xf32>
    %c0_159 = arith.constant 0 : index
    %c0_160 = arith.constant 0 : index
    %186 = vector.load %arg10[%c0_159, %c0_160] : memref<128x32xf32, #tpu.memory_space<vmem>>, vector<128x32xf32>
    %cst_161 = arith.constant dense<0.000000e+00> : vector<128x32xf32>
    %187 = tpu.matmul %185, %186, %cst_161 {dimension_numbers = #tpu.dot_dimension_numbers<[1], [0], [0], [1], [0, 0, 1, 1], [], []>} : vector<128x128xf32>, vector<128x32xf32>, vector<128x32xf32> -> vector<128x32xf32>
    %c0_162 = arith.constant 0 : index
    %c0_163 = arith.constant 0 : index
    %188 = vector.load %arg11[%c0_162, %c0_163] : memref<1x32xf32, #tpu.memory_space<vmem>>, vector<1x32xf32>
    %189 = vector.broadcast %188 : vector<1x32xf32> to vector<128x32xf32>
    %190 = arith.addf %187, %189 : vector<128x32xf32>
    %191 = arith.addf %178, %190 : vector<128x32xf32>
    %c0_164 = arith.constant 0 : index
    %c0_165 = arith.constant 0 : index
    %192 = vector.load %arg12[%c0_164, %c0_165] : memref<1x32xf32, #tpu.memory_space<vmem>>, vector<1x32xf32>
    %c0_166 = arith.constant 0 : index
    %c0_167 = arith.constant 0 : index
    %193 = vector.load %arg13[%c0_166, %c0_167] : memref<1x32xf32, #tpu.memory_space<vmem>>, vector<1x32xf32>
    %cst_168 = arith.constant dense<0.000000e+00> : vector<128xf32>
    %194 = vector.multi_reduction <add>, %191, %cst_168 [1] : vector<128x32xf32> to vector<128xf32>
    %195 = vector.shape_cast %194 : vector<128xf32> to vector<128x1xf32>
    %cst_169 = arith.constant 3.200000e+01 : f32
    %196 = vector.broadcast %cst_169 : f32 to vector<128x1xf32>
    %197 = arith.divf %195, %196 : vector<128x1xf32>
    %198 = vector.broadcast %197 : vector<128x1xf32> to vector<128x32xf32>
    %199 = arith.subf %191, %198 : vector<128x32xf32>
    %200 = arith.mulf %199, %199 : vector<128x32xf32>
    %cst_170 = arith.constant dense<0.000000e+00> : vector<128xf32>
    %201 = vector.multi_reduction <add>, %200, %cst_170 [1] : vector<128x32xf32> to vector<128xf32>
    %202 = vector.shape_cast %201 : vector<128xf32> to vector<128x1xf32>
    %cst_171 = arith.constant 3.200000e+01 : f32
    %203 = vector.broadcast %cst_171 : f32 to vector<128x1xf32>
    %204 = arith.divf %202, %203 : vector<128x1xf32>
    %cst_172 = arith.constant 9.99999974E-6 : f32
    %205 = vector.broadcast %cst_172 : f32 to vector<128x1xf32>
    %206 = arith.addf %204, %205 : vector<128x1xf32>
    %207 = math.rsqrt %206 : vector<128x1xf32>
    %208 = vector.broadcast %207 : vector<128x1xf32> to vector<128x32xf32>
    %209 = arith.mulf %199, %208 : vector<128x32xf32>
    %210 = vector.broadcast %192 : vector<1x32xf32> to vector<128x32xf32>
    %211 = arith.mulf %209, %210 : vector<128x32xf32>
    %212 = vector.broadcast %193 : vector<1x32xf32> to vector<128x32xf32>
    %213 = arith.addf %211, %212 : vector<128x32xf32>
    %c0_173 = arith.constant 0 : index
    %c0_174 = arith.constant 0 : index
    %c0_175 = arith.constant 0 : index
    %214 = vector.load %arg14[%c0_173, %c0_174, %c0_175] : memref<1x128x32xf32, #tpu.memory_space<vmem>>, vector<1x128x32xf32>
    %215 = vector.shape_cast %214 : vector<1x128x32xf32> to vector<128x32xf32>
    %216 = vector.shape_cast %213 : vector<128x32xf32> to vector<1x128x32xf32>
    tpu.vector_store %arg14[%c0_173, %c0_174, %c0_175], %216 {strides = array<i32>} : memref<1x128x32xf32, #tpu.memory_space<vmem>>, vector<1x128x32xf32>,
    return
  }
  func.func @transform_0(%arg0: i32) -> (i32, i32, i32) {
    %c0_i32 = arith.constant 0 : i32
    %c0_i32_0 = arith.constant 0 : i32
    %c0_i32_1 = arith.constant 0 : i32
    return %arg0, %c0_i32, %c0_i32_0 : i32, i32, i32
  }
  func.func @transform_1(%arg0: i32) -> (i32, i32, i32, i32) {
    %c0_i32 = arith.constant 0 : i32
    %c0_i32_0 = arith.constant 0 : i32
    %c0_i32_1 = arith.constant 0 : i32
    %c0_i32_2 = arith.constant 0 : i32
    %c0_i32_3 = arith.constant 0 : i32
    return %c0_i32, %c0_i32_0, %c0_i32_1, %c0_i32_2 : i32, i32, i32, i32
  }
  func.func @transform_2(%arg0: i32) -> (i32, i32, i32, i32) {
    %c0_i32 = arith.constant 0 : i32
    %c0_i32_0 = arith.constant 0 : i32
    %c0_i32_1 = arith.constant 0 : i32
    %c0_i32_2 = arith.constant 0 : i32
    %c0_i32_3 = arith.constant 0 : i32
    return %c0_i32, %c0_i32_0, %c0_i32_1, %c0_i32_2 : i32, i32, i32, i32
  }
  func.func @transform_3(%arg0: i32) -> (i32, i32, i32) {
    %c0_i32 = arith.constant 0 : i32
    %c0_i32_0 = arith.constant 0 : i32
    %c0_i32_1 = arith.constant 0 : i32
    %c0_i32_2 = arith.constant 0 : i32
    return %c0_i32, %c0_i32_0, %c0_i32_1 : i32, i32, i32
  }
  func.func @transform_4(%arg0: i32) -> (i32, i32) {
    %c0_i32 = arith.constant 0 : i32
    %c0_i32_0 = arith.constant 0 : i32
    %c0_i32_1 = arith.constant 0 : i32
    return %c0_i32, %c0_i32_0 : i32, i32
  }
  func.func @transform_5(%arg0: i32) -> (i32, i32) {
    %c0_i32 = arith.constant 0 : i32
    %c0_i32_0 = arith.constant 0 : i32
    %c0_i32_1 = arith.constant 0 : i32
    return %c0_i32, %c0_i32_0 : i32, i32
  }
  func.func @transform_6(%arg0: i32) -> (i32, i32) {
    %c0_i32 = arith.constant 0 : i32
    %c0_i32_0 = arith.constant 0 : i32
    %c0_i32_1 = arith.constant 0 : i32
    return %c0_i32, %c0_i32_0 : i32, i32
  }
  func.func @transform_7(%arg0: i32) -> (i32, i32) {
    %c0_i32 = arith.constant 0 : i32
    %c0_i32_0 = arith.constant 0 : i32
    %c0_i32_1 = arith.constant 0 : i32
    return %c0_i32, %c0_i32_0 : i32, i32
  }
  func.func @transform_8(%arg0: i32) -> (i32, i32) {
    %c0_i32 = arith.constant 0 : i32
    %c0_i32_0 = arith.constant 0 : i32
    %c0_i32_1 = arith.constant 0 : i32
    return %c0_i32, %c0_i32_0 : i32, i32
  }
  func.func @transform_9(%arg0: i32) -> (i32, i32) {
    %c0_i32 = arith.constant 0 : i32
    %c0_i32_0 = arith.constant 0 : i32
    %c0_i32_1 = arith.constant 0 : i32
    return %c0_i32, %c0_i32_0 : i32, i32
  }
  func.func @transform_10(%arg0: i32) -> (i32, i32) {
    %c0_i32 = arith.constant 0 : i32
    %c0_i32_0 = arith.constant 0 : i32
    %c0_i32_1 = arith.constant 0 : i32
    return %c0_i32, %c0_i32_0 : i32, i32
  }
  func.func @transform_11(%arg0: i32) -> (i32, i32) {
    %c0_i32 = arith.constant 0 : i32
    %c0_i32_0 = arith.constant 0 : i32
    %c0_i32_1 = arith.constant 0 : i32
    return %c0_i32, %c0_i32_0 : i32, i32
  }
  func.func @transform_12(%arg0: i32) -> (i32, i32) {
    %c0_i32 = arith.constant 0 : i32
    %c0_i32_0 = arith.constant 0 : i32
    %c0_i32_1 = arith.constant 0 : i32
    return %c0_i32, %c0_i32_0 : i32, i32
  }
  func.func @transform_13(%arg0: i32) -> (i32, i32, i32) {
    %c0_i32 = arith.constant 0 : i32
    %c0_i32_0 = arith.constant 0 : i32
    %c0_i32_1 = arith.constant 0 : i32
    return %arg0, %c0_i32, %c0_i32_0 : i32, i32, i32
  }
}

module attributes {stable_mosaic.version = 11 : i64} {
  func.func @_pool_classifier_kernel(%arg0: i32, %arg1: memref<2x128x32xf32, #tpu.memory_space<vmem>>, %arg2: memref<32x16xf32, #tpu.memory_space<vmem>>, %arg3: memref<1x16xf32, #tpu.memory_space<vmem>>, %arg4: memref<16x6xf32, #tpu.memory_space<vmem>>, %arg5: memref<1x6xf32, #tpu.memory_space<vmem>>, %arg6: memref<2x6xf32, #tpu.memory_space<vmem>>) attributes {dimension_semantics = [#tpu.dimension_semantics<arbitrary>], iteration_bounds = array<i64: 1>, scalar_prefetch = 0 : i64, scratch_operands = 0 : i64, tpu.core_type = #tpu.core_type<tc>, window_params = [{pipeline_mode = #tpu.pipeline_mode<synchronous>, transform_indices = @transform_0, window_bounds = array<i64: 2, 128, 32>}, {pipeline_mode = #tpu.pipeline_mode<synchronous>, transform_indices = @transform_1, window_bounds = array<i64: 32, 16>}, {pipeline_mode = #tpu.pipeline_mode<synchronous>, transform_indices = @transform_2, window_bounds = array<i64: 1, 16>}, {pipeline_mode = #tpu.pipeline_mode<synchronous>, transform_indices = @transform_3, window_bounds = array<i64: 16, 6>}, {pipeline_mode = #tpu.pipeline_mode<synchronous>, transform_indices = @transform_4, window_bounds = array<i64: 1, 6>}, {pipeline_mode = #tpu.pipeline_mode<synchronous>, transform_indices = @transform_5, window_bounds = array<i64: 2, 6>}]} {
    %c0 = arith.constant 0 : index
    %c0_0 = arith.constant 0 : index
    %c0_1 = arith.constant 0 : index
    %0 = vector.load %arg1[%c0, %c0_0, %c0_1] : memref<2x128x32xf32, #tpu.memory_space<vmem>>, vector<1x128x32xf32>
    %1 = vector.shape_cast %0 : vector<1x128x32xf32> to vector<128x32xf32>
    %cst = arith.constant dense<0.000000e+00> : vector<32xf32>
    %2 = vector.multi_reduction <add>, %1, %cst [0] : vector<128x32xf32> to vector<32xf32>
    %3 = vector.shape_cast %2 : vector<32xf32> to vector<1x32xf32>
    %cst_2 = arith.constant 1.280000e+02 : f32
    %4 = vector.broadcast %cst_2 : f32 to vector<1x32xf32>
    %5 = arith.divf %3, %4 : vector<1x32xf32>
    %c1 = arith.constant 1 : index
    %c0_3 = arith.constant 0 : index
    %c0_4 = arith.constant 0 : index
    %6 = vector.load %arg1[%c1, %c0_3, %c0_4] : memref<2x128x32xf32, #tpu.memory_space<vmem>>, vector<1x128x32xf32>
    %7 = vector.shape_cast %6 : vector<1x128x32xf32> to vector<128x32xf32>
    %cst_5 = arith.constant dense<0.000000e+00> : vector<32xf32>
    %8 = vector.multi_reduction <add>, %7, %cst_5 [0] : vector<128x32xf32> to vector<32xf32>
    %9 = vector.shape_cast %8 : vector<32xf32> to vector<1x32xf32>
    %cst_6 = arith.constant 1.280000e+02 : f32
    %10 = vector.broadcast %cst_6 : f32 to vector<1x32xf32>
    %11 = arith.divf %9, %10 : vector<1x32xf32>
    %12 = tpu.concatenate %5, %11 in 0 : vector<1x32xf32>, vector<1x32xf32> -> vector<2x32xf32>
    %c0_7 = arith.constant 0 : index
    %c0_8 = arith.constant 0 : index
    %13 = vector.load %arg2[%c0_7, %c0_8] : memref<32x16xf32, #tpu.memory_space<vmem>>, vector<32x16xf32>
    %cst_9 = arith.constant dense<0.000000e+00> : vector<2x16xf32>
    %14 = tpu.matmul %12, %13, %cst_9 {dimension_numbers = #tpu.dot_dimension_numbers<[1], [0], [0], [1], [0, 0, 1, 1], [], []>} : vector<2x32xf32>, vector<32x16xf32>, vector<2x16xf32> -> vector<2x16xf32>
    %c0_10 = arith.constant 0 : index
    %c0_11 = arith.constant 0 : index
    %15 = vector.load %arg3[%c0_10, %c0_11] : memref<1x16xf32, #tpu.memory_space<vmem>>, vector<1x16xf32>
    %16 = vector.broadcast %15 : vector<1x16xf32> to vector<2x16xf32>
    %17 = arith.addf %14, %16 : vector<2x16xf32>
    %cst_12 = arith.constant 0.000000e+00 : f32
    %18 = vector.broadcast %cst_12 : f32 to vector<2x16xf32>
    %19 = arith.maximumf %17, %18 : vector<2x16xf32>
    %c0_13 = arith.constant 0 : index
    %c0_14 = arith.constant 0 : index
    %20 = vector.load %arg4[%c0_13, %c0_14] : memref<16x6xf32, #tpu.memory_space<vmem>>, vector<16x6xf32>
    %cst_15 = arith.constant dense<0.000000e+00> : vector<2x6xf32>
    %21 = tpu.matmul %19, %20, %cst_15 {dimension_numbers = #tpu.dot_dimension_numbers<[1], [0], [0], [1], [0, 0, 1, 1], [], []>} : vector<2x16xf32>, vector<16x6xf32>, vector<2x6xf32> -> vector<2x6xf32>
    %c0_16 = arith.constant 0 : index
    %c0_17 = arith.constant 0 : index
    %22 = vector.load %arg5[%c0_16, %c0_17] : memref<1x6xf32, #tpu.memory_space<vmem>>, vector<1x6xf32>
    %23 = vector.broadcast %22 : vector<1x6xf32> to vector<2x6xf32>
    %24 = arith.addf %21, %23 : vector<2x6xf32>
    %c0_18 = arith.constant 0 : index
    %c0_19 = arith.constant 0 : index
    %25 = vector.load %arg6[%c0_18, %c0_19] : memref<2x6xf32, #tpu.memory_space<vmem>>, vector<2x6xf32>
    tpu.vector_store %arg6[%c0_18, %c0_19], %24 {strides = array<i32>} : memref<2x6xf32, #tpu.memory_space<vmem>>, vector<2x6xf32>,
    return
  }
  func.func @transform_0(%arg0: i32) -> (i32, i32, i32) {
    %c0_i32 = arith.constant 0 : i32
    %c0_i32_0 = arith.constant 0 : i32
    %c0_i32_1 = arith.constant 0 : i32
    %c0_i32_2 = arith.constant 0 : i32
    return %c0_i32, %c0_i32_0, %c0_i32_1 : i32, i32, i32
  }
  func.func @transform_1(%arg0: i32) -> (i32, i32) {
    %c0_i32 = arith.constant 0 : i32
    %c0_i32_0 = arith.constant 0 : i32
    %c0_i32_1 = arith.constant 0 : i32
    return %c0_i32, %c0_i32_0 : i32, i32
  }
  func.func @transform_2(%arg0: i32) -> (i32, i32) {
    %c0_i32 = arith.constant 0 : i32
    %c0_i32_0 = arith.constant 0 : i32
    %c0_i32_1 = arith.constant 0 : i32
    return %c0_i32, %c0_i32_0 : i32, i32
  }
  func.func @transform_3(%arg0: i32) -> (i32, i32) {
    %c0_i32 = arith.constant 0 : i32
    %c0_i32_0 = arith.constant 0 : i32
    %c0_i32_1 = arith.constant 0 : i32
    return %c0_i32, %c0_i32_0 : i32, i32
  }
  func.func @transform_4(%arg0: i32) -> (i32, i32) {
    %c0_i32 = arith.constant 0 : i32
    %c0_i32_0 = arith.constant 0 : i32
    %c0_i32_1 = arith.constant 0 : i32
    return %c0_i32, %c0_i32_0 : i32, i32
  }
  func.func @transform_5(%arg0: i32) -> (i32, i32) {
    %c0_i32 = arith.constant 0 : i32
    %c0_i32_0 = arith.constant 0 : i32
    %c0_i32_1 = arith.constant 0 : i32
    return %c0_i32, %c0_i32_0 : i32, i32
  }
}

</mosaic_0001>

<bundles_post_ra>
// kernel: neural_guide_forward.4
= control target key start
LH: loop header
LB: loop body
LE: loop exit
PB: predicated region body
PF: predicated region fallthrough
CT: control target
= control target key end

     0   :  { %vm57_vm0 = vcmask 261120   ;;  %s877_s1 = inlined_call_operand.vmem [shape: f32[32,32], index: 1, kind: input, shape index: {}]   ;;  %s878_s0 = inlined_call_operand.vmem [shape: f32[256,32], index: 0, kind: input, shape index: {}]   ;;  %s879_s2 = inlined_call_operand.vmem [shape: f32[1,32], index: 2, kind: input, shape index: {}]   ;;  %s880_s3 = inlined_call_operand.vmem [shape: f32[256,32], index: 3, kind: output, shape index: {}]  }
   0x1   :  { %v46_v0 = vld [vmem:[%s877_s1] sm:$0xff]  ;;  %v47_v1 = vld [vmem:[%s877_s1 + $0x8] sm:$0xff]  ;;  %v48_v2 = vld [vmem:[%s877_s1 + $0x10] sm:$0xff] }
   0x2   :  { %v540_v3 = vpack.c.bf16 %v47_v1, %v46_v0  ;;  %v49_v4 = vld [vmem:[%s877_s1 + $0x18] sm:$0xff]  ;;  %v14_v5 = vld [vmem:[%s878_s0] sm:$0xff]  ;;  %v15_v8 = vld [vmem:[%s878_s0 + $0x8] sm:$0xff] }
   0x3   :  { %v30_v6 = vld [vmem:[%s878_s0 + $0x80] sm:$0xff]  ;;  %v544_v7 = vpack.c.bf16 %v49_v4, %v48_v2  ;;  %492 = vmatprep.mubr.msk.f32.mxu0 %vm57_vm0, %v14_v5  ;;  %v31_v9 = vld [vmem:[%s878_s0 + $0x88] sm:$0xff]  ;;  %v16_v10 = vld [vmem:[%s878_s0 + $0x10] sm:$0xff] }
   0x4   :  { %516 = vmatprep.mubr.msk.f32.mxu1 %vm57_vm0, %v30_v6  ;;  %541 = vmatprep.subr.bf16.mxu0 %v540_v3  ;;  %v32_v11 = vld [vmem:[%s878_s0 + $0x90] sm:$0xff]  ;;  %v17_v12 = vld [vmem:[%s878_s0 + $0x18] sm:$0xff]  ;;  %v18_v14 = vld [vmem:[%s878_s0 + $0x20] sm:$0xff] }
   0x5   :  { %548 = vmatprep.subr.bf16.mxu1 %v540_v3  ;;  %543 = vmatpush3.bf16.msra.mxu0 %v540_v3  ;;  %v33_v13 = vld [vmem:[%s878_s0 + $0x98] sm:$0xff]  ;;  %v34_v15 = vld [vmem:[%s878_s0 + $0xa0] sm:$0xff]  ;;  %v19_v16 = vld [vmem:[%s878_s0 + $0x28] sm:$0xff] }
   0x6   :  { %550 = vmatpush3.bf16.msra.mxu1 %v540_v3  ;;  %545 = vmatprep.subr.bf16.mxu0 %v544_v7  ;;  %v35_v17 = vld [vmem:[%s878_s0 + $0xa8] sm:$0xff]  ;;  %v20_v18 = vld [vmem:[%s878_s0 + $0x30] sm:$0xff]  ;;  %v21_v20 = vld [vmem:[%s878_s0 + $0x38] sm:$0xff] }
   0x7   :  { %549 = vmatprep.subr.bf16.mxu1 %v544_v7  ;;  %v36_v19 = vld [vmem:[%s878_s0 + $0xb0] sm:$0xff]  ;;  %v37_v21 = vld [vmem:[%s878_s0 + $0xb8] sm:$0xff]  ;;  %v22_v22 = vld [vmem:[%s878_s0 + $0x40] sm:$0xff] }
   0x8   :  { %v38_v23 = vld [vmem:[%s878_s0 + $0xc0] sm:$0xff]  ;;  %v23_v24 = vld [vmem:[%s878_s0 + $0x48] sm:$0xff]  ;;  %v24_v26 = vld [vmem:[%s878_s0 + $0x50] sm:$0xff] }
   0x9   :  { %547 = vmatpush3.bf16.msra.mxu0 %v544_v7  ;;  %v39_v25 = vld [vmem:[%s878_s0 + $0xc8] sm:$0xff]  ;;  %v40_v27 = vld [vmem:[%s878_s0 + $0xd0] sm:$0xff]  ;;  %v25_v28 = vld [vmem:[%s878_s0 + $0x58] sm:$0xff] }
   0xa   :  { %551 = vmatpush3.bf16.msra.mxu1 %v544_v7  ;;  %v41_v29 = vld [vmem:[%s878_s0 + $0xd8] sm:$0xff]  ;;  %v26_v30 = vld [vmem:[%s878_s0 + $0x60] sm:$0xff]  ;;  %v27_v32 = vld [vmem:[%s878_s0 + $0x68] sm:$0xff] }
   0xb   :  { %v42_v31 = vld [vmem:[%s878_s0 + $0xe0] sm:$0xff]  ;;  %v43_v33 = vld [vmem:[%s878_s0 + $0xe8] sm:$0xff]  ;;  %v28_v34 = vld [vmem:[%s878_s0 + $0x70] sm:$0xff] }
   0xc   :  { %493 = vmatmul.mubr.msk.f32.vlgmr.msra.gmra.mrb[0].mxu0 %vm57_vm0, %v15_v8  ;;  %v44_v35 = vld [vmem:[%s878_s0 + $0xf0] sm:$0xff]  ;;  %v29_v36 = vld [vmem:[%s878_s0 + $0x78] sm:$0xff]  ;;  %v715_v38 = vld [vmem:[%s879_s2] ss:$0 sm:$0xff] }
   0xd   :  { %517 = vmatmul.mubr.msk.f32.vlgmr.msra.gmra.mrb[0].mxu1 %vm57_vm0, %v31_v9  ;;  %495 = vmatprep.mubr.msk.f32.mxu0 %vm57_vm0, %v16_v10  ;;  %v45_v37 = vld [vmem:[%s878_s0 + $0xf8] sm:$0xff] }
   0xe   :  { %519 = vmatprep.mubr.msk.f32.mxu1 %vm57_vm0, %v32_v11 }
  0x10   :  { %496 = vmatmul.mubr.msk.f32.gmra.mrb[2].mxu0 %vm57_vm0, %v17_v12 }
  0x11   :  { %520 = vmatmul.mubr.msk.f32.gmra.mrb[2].mxu1 %vm57_vm0, %v33_v13  ;;  %498 = vmatprep.mubr.msk.f32.mxu0 %vm57_vm0, %v18_v14 }
  0x12   :  { %522 = vmatprep.mubr.msk.f32.mxu1 %vm57_vm0, %v34_v15 }
  0x14   :  { %499 = vmatmul.mubr.msk.f32.gmra.mrb[4].mxu0 %vm57_vm0, %v19_v16 }
  0x15   :  { %523 = vmatmul.mubr.msk.f32.gmra.mrb[4].mxu1 %vm57_vm0, %v35_v17  ;;  %501 = vmatprep.mubr.msk.f32.mxu0 %vm57_vm0, %v20_v18 }
  0x16   :  { %525 = vmatprep.mubr.msk.f32.mxu1 %vm57_vm0, %v36_v19 }
  0x18   :  { %502 = vmatmul.mubr.msk.f32.gmra.mrb[6].mxu0 %vm57_vm0, %v21_v20 }
  0x19   :  { %526 = vmatmul.mubr.msk.f32.gmra.mrb[6].mxu1 %vm57_vm0, %v37_v21  ;;  %504 = vmatprep.mubr.msk.f32.mxu0 %vm57_vm0, %v22_v22 }
  0x1a   :  { %528 = vmatprep.mubr.msk.f32.mxu1 %vm57_vm0, %v38_v23 }
  0x1c   :  { %505 = vmatmul.mubr.msk.f32.gmra.mrb[8].mxu0 %vm57_vm0, %v23_v24 }
  0x1d   :  { %529 = vmatmul.mubr.msk.f32.gmra.mrb[8].mxu1 %vm57_vm0, %v39_v25  ;;  %507 = vmatprep.mubr.msk.f32.mxu0 %vm57_vm0, %v24_v26 }
  0x1e   :  { %531 = vmatprep.mubr.msk.f32.mxu1 %vm57_vm0, %v40_v27 }
  0x20   :  { %508 = vmatmul.mubr.msk.f32.gmra.mrb[10].mxu0 %vm57_vm0, %v25_v28 }
  0x21   :  { %532 = vmatmul.mubr.msk.f32.gmra.mrb[10].mxu1 %vm57_vm0, %v41_v29  ;;  %510 = vmatprep.mubr.msk.f32.mxu0 %vm57_vm0, %v26_v30 }
  0x22   :  { %534 = vmatprep.mubr.msk.f32.mxu1 %vm57_vm0, %v42_v31 }
  0x24   :  { %511 = vmatmul.mubr.msk.f32.gmra.mrb[12].mxu0 %vm57_vm0, %v27_v32 }
  0x25   :  { %535 = vmatmul.mubr.msk.f32.gmra.mrb[12].mxu1 %vm57_vm0, %v43_v33  ;;  %513 = vmatprep.mubr.msk.f32.mxu0 %vm57_vm0, %v28_v34 }
  0x26   :  { %537 = vmatprep.mubr.msk.f32.mxu1 %vm57_vm0, %v44_v35 }
  0x28   :  { %514 = vmatmul.mubr.msk.f32.gmra.mrb[14].mxu0 %vm57_vm0, %v29_v36 }
  0x29   :  { %538 = vmatmul.mubr.msk.f32.gmra.mrb[14].mxu1 %vm57_vm0, %v45_v37 }
  0xdf   :  { %v494_v39 = vpop.f32.mrb[0].mxu0 }
  0xe0   :  { %v518_v40 = vpop.f32.mrb[0].mxu1  ;;  %v226_v41 = vadd.f32 %v494_v39, %v715_v38  ;;  %v220_v43 = vpop.f32.mrb[1].mxu0 }
  0xe1   :  { %v306_v42 = vadd.f32 %v518_v40, %v715_v38  ;;  %v300_v44 = vpop.f32.mrb[1].mxu1  ;;  %v221_v45 = vadd.f32 %v715_v38, %v220_v43 }
  0xe2   :  { %v301_v46 = vadd.f32 %v715_v38, %v300_v44  ;;  %380 = vst.msk [vmem:[%s880_s3 + $0x8] sm:$0xff] %vm57_vm0, %v226_v41 }
  0xe3   :  { %396 = vst.msk [vmem:[%s880_s3 + $0x88] sm:$0xff] %vm57_vm0, %v306_v42  ;;  %379 = vst.msk [vmem:[%s880_s3] sm:$0xff] %vm57_vm0, %v221_v45  ;;  %v497_v47 = vpop.f32.mrb[2].mxu0 }
  0xe4   :  { %395 = vst.msk [vmem:[%s880_s3 + $0x80] sm:$0xff] %vm57_vm0, %v301_v46  ;;  %v521_v48 = vpop.f32.mrb[2].mxu1  ;;  %v236_v49 = vadd.f32 %v497_v47, %v715_v38  ;;  %v230_v51 = vpop.f32.mrb[3].mxu0 }
  0xe5   :  { %v316_v50 = vadd.f32 %v521_v48, %v715_v38  ;;  %v310_v52 = vpop.f32.mrb[3].mxu1  ;;  %v231_v53 = vadd.f32 %v715_v38, %v230_v51 }
  0xe6   :  { %v311_v54 = vadd.f32 %v715_v38, %v310_v52  ;;  %382 = vst.msk [vmem:[%s880_s3 + $0x18] sm:$0xff] %vm57_vm0, %v236_v49 }
  0xe7   :  { %398 = vst.msk [vmem:[%s880_s3 + $0x98] sm:$0xff] %vm57_vm0, %v316_v50  ;;  %381 = vst.msk [vmem:[%s880_s3 + $0x10] sm:$0xff] %vm57_vm0, %v231_v53  ;;  %v500_v55 = vpop.f32.mrb[4].mxu0 }
  0xe8   :  { %397 = vst.msk [vmem:[%s880_s3 + $0x90] sm:$0xff] %vm57_vm0, %v311_v54  ;;  %v524_v56 = vpop.f32.mrb[4].mxu1  ;;  %v246_v57 = vadd.f32 %v500_v55, %v715_v38  ;;  %v240_v59 = vpop.f32.mrb[5].mxu0 }
  0xe9   :  { %v326_v58 = vadd.f32 %v524_v56, %v715_v38  ;;  %v320_v60 = vpop.f32.mrb[5].mxu1  ;;  %v241_v61 = vadd.f32 %v715_v38, %v240_v59 }
  0xea   :  { %v321_v62 = vadd.f32 %v715_v38, %v320_v60  ;;  %384 = vst.msk [vmem:[%s880_s3 + $0x28] sm:$0xff] %vm57_vm0, %v246_v57 }
  0xeb   :  { %400 = vst.msk [vmem:[%s880_s3 + $0xa8] sm:$0xff] %vm57_vm0, %v326_v58  ;;  %383 = vst.msk [vmem:[%s880_s3 + $0x20] sm:$0xff] %vm57_vm0, %v241_v61  ;;  %v503_v63 = vpop.f32.mrb[6].mxu0 }
  0xec   :  { %399 = vst.msk [vmem:[%s880_s3 + $0xa0] sm:$0xff] %vm57_vm0, %v321_v62  ;;  %v527_v0 = vpop.f32.mrb[6].mxu1  ;;  %v256_v1 = vadd.f32 %v503_v63, %v715_v38  ;;  %v250_v3 = vpop.f32.mrb[7].mxu0 }
  0xed   :  { %v336_v2 = vadd.f32 %v527_v0, %v715_v38  ;;  %v330_v4 = vpop.f32.mrb[7].mxu1  ;;  %v251_v5 = vadd.f32 %v715_v38, %v250_v3 }
  0xee   :  { %v331_v6 = vadd.f32 %v715_v38, %v330_v4  ;;  %386 = vst.msk [vmem:[%s880_s3 + $0x38] sm:$0xff] %vm57_vm0, %v256_v1 }
  0xef   :  { %402 = vst.msk [vmem:[%s880_s3 + $0xb8] sm:$0xff] %vm57_vm0, %v336_v2  ;;  %385 = vst.msk [vmem:[%s880_s3 + $0x30] sm:$0xff] %vm57_vm0, %v251_v5  ;;  %v506_v7 = vpop.f32.mrb[8].mxu0 }
  0xf0   :  { %401 = vst.msk [vmem:[%s880_s3 + $0xb0] sm:$0xff] %vm57_vm0, %v331_v6  ;;  %v530_v8 = vpop.f32.mrb[8].mxu1  ;;  %v266_v9 = vadd.f32 %v506_v7, %v715_v38  ;;  %v260_v11 = vpop.f32.mrb[9].mxu0 }
  0xf1   :  { %v346_v10 = vadd.f32 %v530_v8, %v715_v38  ;;  %v340_v12 = vpop.f32.mrb[9].mxu1  ;;  %v261_v13 = vadd.f32 %v715_v38, %v260_v11 }
  0xf2   :  { %v341_v14 = vadd.f32 %v715_v38, %v340_v12  ;;  %388 = vst.msk [vmem:[%s880_s3 + $0x48] sm:$0xff] %vm57_vm0, %v266_v9 }
  0xf3   :  { %404 = vst.msk [vmem:[%s880_s3 + $0xc8] sm:$0xff] %vm57_vm0, %v346_v10  ;;  %387 = vst.msk [vmem:[%s880_s3 + $0x40] sm:$0xff] %vm57_vm0, %v261_v13  ;;  %v509_v15 = vpop.f32.mrb[10].mxu0 }
  0xf4   :  { %403 = vst.msk [vmem:[%s880_s3 + $0xc0] sm:$0xff] %vm57_vm0, %v341_v14  ;;  %v533_v16 = vpop.f32.mrb[10].mxu1  ;;  %v276_v17 = vadd.f32 %v509_v15, %v715_v38  ;;  %v270_v19 = vpop.f32.mrb[11].mxu0 }
  0xf5   :  { %v356_v18 = vadd.f32 %v533_v16, %v715_v38  ;;  %v350_v20 = vpop.f32.mrb[11].mxu1  ;;  %v271_v21 = vadd.f32 %v715_v38, %v270_v19 }
  0xf6   :  { %v351_v22 = vadd.f32 %v715_v38, %v350_v20  ;;  %390 = vst.msk [vmem:[%s880_s3 + $0x58] sm:$0xff] %vm57_vm0, %v276_v17 }
  0xf7   :  { %406 = vst.msk [vmem:[%s880_s3 + $0xd8] sm:$0xff] %vm57_vm0, %v356_v18  ;;  %389 = vst.msk [vmem:[%s880_s3 + $0x50] sm:$0xff] %vm57_vm0, %v271_v21  ;;  %v512_v23 = vpop.f32.mrb[12].mxu0 }
  0xf8   :  { %405 = vst.msk [vmem:[%s880_s3 + $0xd0] sm:$0xff] %vm57_vm0, %v351_v22  ;;  %v536_v24 = vpop.f32.mrb[12].mxu1  ;;  %v286_v25 = vadd.f32 %v512_v23, %v715_v38  ;;  %v280_v27 = vpop.f32.mrb[13].mxu0 }
  0xf9   :  { %v366_v26 = vadd.f32 %v536_v24, %v715_v38  ;;  %v360_v28 = vpop.f32.mrb[13].mxu1  ;;  %v281_v29 = vadd.f32 %v715_v38, %v280_v27 }
  0xfa   :  { %v361_v30 = vadd.f32 %v715_v38, %v360_v28  ;;  %392 = vst.msk [vmem:[%s880_s3 + $0x68] sm:$0xff] %vm57_vm0, %v286_v25 }
  0xfb   :  { %408 = vst.msk [vmem:[%s880_s3 + $0xe8] sm:$0xff] %vm57_vm0, %v366_v26  ;;  %391 = vst.msk [vmem:[%s880_s3 + $0x60] sm:$0xff] %vm57_vm0, %v281_v29  ;;  %v515_v31 = vpop.f32.mrb[14].mxu0 }
  0xfc   :  { %407 = vst.msk [vmem:[%s880_s3 + $0xe0] sm:$0xff] %vm57_vm0, %v361_v30  ;;  %v539_v32 = vpop.f32.mrb[14].mxu1  ;;  %v296_v33 = vadd.f32 %v515_v31, %v715_v38  ;;  %v290_v35 = vpop.f32.mrb[15].mxu0 }
  0xfd   :  { %v376_v34 = vadd.f32 %v539_v32, %v715_v38  ;;  %v370_v36 = vpop.f32.mrb[15].mxu1  ;;  %v291_v37 = vadd.f32 %v715_v38, %v290_v35 }
  0xfe   :  { %v371_v39 = vadd.f32 %v715_v38, %v370_v36  ;;  %394 = vst.msk [vmem:[%s880_s3 + $0x78] sm:$0xff] %vm57_vm0, %v296_v33 }
  0xff   :  { %410 = vst.msk [vmem:[%s880_s3 + $0xf8] sm:$0xff] %vm57_vm0, %v376_v34  ;;  %393 = vst.msk [vmem:[%s880_s3 + $0x70] sm:$0xff] %vm57_vm0, %v291_v37 }
 0x100   :  { %409 = vst.msk [vmem:[%s880_s3 + $0xf0] sm:$0xff] %vm57_vm0, %v371_v39 }

// kernel: neural_guide_forward.7
= control target key start
LH: loop header
LB: loop body
LE: loop exit
PB: predicated region body
PF: predicated region fallthrough
CT: control target
= control target key end

     0   :  { %v401_v3 = vmov 0.0|0.0   ;;  %vm402_vm0 = vmmov 0   ;;  %v403_v6 = vmov 0.0   ;;  %vm37_vm1 = vcmask 261120   ;;  %s600_s0 = inlined_call_operand.vmem [shape: f32[2,128,32], index: 0, kind: input, shape index: {}]   ;;  %s601_s1 = inlined_call_operand.vmem [shape: f32[32,16], index: 1, kind: input, shape index: {}]   ;;  %s602_s2 = inlined_call_operand.vmem [shape: f32[1,16], index: 2, kind: input, shape index: {}]   ;;  %s603_s3 = inlined_call_operand.vmem [shape: f32[16,6], index: 3, kind: input, shape index: {}]   ;;  %s604_s4 = inlined_call_operand.vmem [shape: f32[1,6], index: 4, kind: input, shape index: {}]   ;;  %s605_s5 = inlined_call_operand.hbm [shape: f32[2,6], index: 5, kind: output, shape index: {}]  }
   0x1   :  { %v134_v0 = vld [vmem:[%s601_s1] sm:$0xff]  ;;  %v135_v1 = vld [vmem:[%s601_s1 + $0x8] sm:$0xff]  ;;  %v136_v2 = vld [vmem:[%s601_s1 + $0x10] sm:$0xff]  ;;  %364 = vmatprep.subr.bf16.mxu0 %v401_v3  ;;  %354 = vmatprep.mubr.msk.f32.mxu0 %vm402_vm0, %v403_v6 }
   0x2   :  { %v365_v4 = vpack.c.bf16 %v135_v1, %v134_v0  ;;  %v137_v5 = vld [vmem:[%s601_s1 + $0x18] sm:$0xff]  ;;  %v21_v7 = vld [vmem:[%s600_s0] sm:$0xff]  ;;  %v22_v8 = vld [vmem:[%s600_s0 + $0x8] sm:$0xff]  ;;  %370 = vmatprep.subr.bf16.mxu1 %v401_v3  ;;  %361 = vmatprep.mubr.msk.f32.mxu1 %vm402_vm0, %v403_v6 }
   0x3   :  { %v23_v9 = vld [vmem:[%s600_s0 + $0x10] sm:$0xff]  ;;  %v24_v10 = vld [vmem:[%s600_s0 + $0x18] sm:$0xff]  ;;  %v38_v11 = vsel %vm37_vm1, %v21_v7, 0.0  ;;  %v39_v12 = vsel %vm37_vm1, %v22_v8, 0.0  ;;  %v368_v13 = vpack.c.bf16 %v137_v5, %v136_v2  ;;  %v25_v14 = vld [vmem:[%s600_s0 + $0x20] sm:$0xff] }
   0x4   :  { %366 = vmatpush3.bf16.msra.mxu0 %v365_v4  ;;  %v40_v15 = vadd.f32 %v39_v12, %v38_v11  ;;  %v41_v16 = vsel %vm37_vm1, %v23_v9, 0.0  ;;  %v43_v17 = vsel %vm37_vm1, %v24_v10, 0.0  ;;  %v26_v18 = vld [vmem:[%s600_s0 + $0x28] sm:$0xff]  ;;  %v27_v20 = vld [vmem:[%s600_s0 + $0x30] sm:$0xff]  ;;  %v45_v21 = vsel %vm37_vm1, %v25_v14, 0.0  ;;  %v318_v22 = vld [vmem:[%s600_s0 + $0x80] sm:$0xff] }
   0x5   :  { %367 = vmatprep.subr.bf16.mxu0 %v401_v3  ;;  %v319_v24 = vld [vmem:[%s600_s0 + $0x88] sm:$0xff]  ;;  %v320_v25 = vld [vmem:[%s600_s0 + $0x90] sm:$0xff]  ;;  %v321_v26 = vld [vmem:[%s600_s0 + $0x98] sm:$0xff]  ;;  %v94_v27 = vsel %vm37_vm1, %v318_v22, 0.0  ;;  %v47_v28 = vsel %vm37_vm1, %v26_v18, 0.0  ;;  %v49_v35 = vsel %vm37_vm1, %v27_v20, 0.0 }
   0x6   :  { %v42_v19 = vadd.f32 %v41_v16, %v40_v15  ;;  %v95_v29 = vsel %vm37_vm1, %v319_v24, 0.0  ;;  %v97_v30 = vsel %vm37_vm1, %v320_v25, 0.0  ;;  %v28_v31 = vld [vmem:[%s600_s0 + $0x38] sm:$0xff]  ;;  %v322_v33 = vld [vmem:[%s600_s0 + $0xa0] sm:$0xff]  ;;  %v99_v36 = vsel %vm37_vm1, %v321_v26, 0.0  ;;  %v323_v39 = vld [vmem:[%s600_s0 + $0xa8] sm:$0xff] }
   0x7   :  { %v96_v34 = vadd.f32 %v95_v29, %v94_v27  ;;  %v29_v37 = vld [vmem:[%s600_s0 + $0x40] sm:$0xff]  ;;  %v51_v41 = vsel %vm37_vm1, %v28_v31, 0.0  ;;  %v101_v42 = vsel %vm37_vm1, %v322_v33, 0.0  ;;  %v30_v43 = vld [vmem:[%s600_s0 + $0x48] sm:$0xff]  ;;  %v324_v45 = vld [vmem:[%s600_s0 + $0xb0] sm:$0xff] }
   0x8   :  { %369 = vmatpush3.bf16.msra.mxu0 %v368_v13  ;;  %v44_v23 = vadd.f32 %v43_v17, %v42_v19 }
   0x9   :  { %v98_v40 = vadd.f32 %v97_v30, %v96_v34 }
   0xa   :  { %v46_v32 = vadd.f32 %v45_v21, %v44_v23 }
   0xb   :  { %v100_v46 = vadd.f32 %v99_v36, %v98_v40 }
   0xc   :  { %v48_v38 = vadd.f32 %v47_v28, %v46_v32 }
   0xe   :  { %v50_v44 = vadd.f32 %v49_v35, %v48_v38 }
   0xf   :  { %10 = vsyncpa [#allocation3], 0  ;;  %v53_v47 = vsel %vm37_vm1, %v29_v37, 0.0  ;;  %v103_v48 = vsel %vm37_vm1, %v323_v39, 0.0  ;;  %v31_v49 = vld [vmem:[%s600_s0 + $0x50] sm:$0xff]  ;;  %v325_v51 = vld [vmem:[%s600_s0 + $0xb8] sm:$0xff]  ;;  %v102_v52 = vadd.f32 %v101_v42, %v100_v46 }
  0x10   :  { %v52_v50 = vadd.f32 %v51_v41, %v50_v44  ;;  %v55_v53 = vsel %vm37_vm1, %v30_v43, 0.0  ;;  %v105_v54 = vsel %vm37_vm1, %v324_v45, 0.0  ;;  %v32_v55 = vld [vmem:[%s600_s0 + $0x58] sm:$0xff]  ;;  %v326_v57 = vld [vmem:[%s600_s0 + $0xc0] sm:$0xff]  ;;  %v57_v59 = vsel %vm37_vm1, %v31_v49, 0.0  ;;  %v327_v63 = vld [vmem:[%s600_s0 + $0xc8] sm:$0xff] }
  0x11   :  { %v104_v58 = vadd.f32 %v103_v48, %v102_v52  ;;  %v107_v60 = vsel %vm37_vm1, %v325_v51, 0.0  ;;  %v33_v61 = vld [vmem:[%s600_s0 + $0x60] sm:$0xff]  ;;  %v59_v1 = vsel %vm37_vm1, %v32_v55, 0.0  ;;  %v109_v2 = vsel %vm37_vm1, %v326_v57, 0.0  ;;  %v34_v3 = vld [vmem:[%s600_s0 + $0x68] sm:$0xff]  ;;  %v328_v5 = vld [vmem:[%s600_s0 + $0xd0] sm:$0xff] }
  0x12   :  { %v54_v56 = vadd.f32 %v53_v47, %v52_v50  ;;  %v61_v7 = vsel %vm37_vm1, %v33_v61, 0.0  ;;  %v111_v8 = vsel %vm37_vm1, %v327_v63, 0.0  ;;  %v35_v9 = vld [vmem:[%s600_s0 + $0x70] sm:$0xff]  ;;  %v329_v11 = vld [vmem:[%s600_s0 + $0xd8] sm:$0xff]  ;;  %v63_v13 = vsel %vm37_vm1, %v34_v3, 0.0  ;;  %v330_v17 = vld [vmem:[%s600_s0 + $0xe0] sm:$0xff] }
  0x13   :  { %v106_v0 = vadd.f32 %v105_v54, %v104_v58  ;;  %v113_v14 = vsel %vm37_vm1, %v328_v5, 0.0  ;;  %v36_v15 = vld [vmem:[%s600_s0 + $0x78] sm:$0xff]  ;;  %v65_v19 = vsel %vm37_vm1, %v35_v9, 0.0  ;;  %v115_v20 = vsel %vm37_vm1, %v329_v11, 0.0  ;;  %v331_v22 = vld [vmem:[%s600_s0 + $0xe8] sm:$0xff]  ;;  %v332_v27 = vld [vmem:[%s600_s0 + $0xf0] sm:$0xff] }
  0x14   :  { %v56_v62 = vadd.f32 %v55_v53, %v54_v56  ;;  %v67_v24 = vsel %vm37_vm1, %v36_v15, 0.0  ;;  %v117_v25 = vsel %vm37_vm1, %v330_v17, 0.0  ;;  %v119_v29 = vsel %vm37_vm1, %v331_v22, 0.0  ;;  %v333_v31 = vld [vmem:[%s600_s0 + $0xf8] sm:$0xff]  ;;  %v219_v53 = vld [vmem:[%s603_s3] sm:$0xff]  ;;  %v220_v54 = vld [vmem:[%s603_s3 + $0x8] sm:$0xff] }
  0x15   :  { %v108_v6 = vadd.f32 %v107_v60, %v106_v0  ;;  %v121_v33 = vsel %vm37_vm1, %v332_v27, 0.0  ;;  %v123_v36 = vsel %vm37_vm1, %v333_v31, 0.0  ;;  %vm132_vm2 = vcmask 1040384   ;;  %v334_v56 = vld [vmem:[%s602_s2] ss:$0 sm:$0xff]  ;;  %s404_s19 = smov [#allocation2]  }
  0x16   :  { %v58_v4 = vadd.f32 %v57_v59, %v56_v62  ;;  %v371_v55 = vpack.c.bf16 %v220_v54, %v219_v53  ;;  %vm228_vm3 = vcmask 130048   ;;  %v336_v61 = vld [vmem:[%s604_s4] ss:$0 sm:$0xff]  ;;  %s310_s20 = sshll.u32 %s404_s19, 4  ;;  %vm302_vm4 = vcmask 41984   ;;  %s311_s20 = int_to_ptr.vmem [resolvable:$true] %s310_s20 }
  0x17   :  { %v110_v12 = vadd.f32 %v109_v2, %v108_v6  ;;  %s377_s3 = scalar_lea.vmem %s311_s20, 32  ;;  %p382_p1 = scmp.lt.s32.totalorder %s311_s20, %s311_s20 }
  0x18   :  { %v60_v10 = vadd.f32 %v59_v1, %v58_v4  ;;  %372 = vmatpush3.bf16.msra.mxu1 %v371_v55  ;;  %p378_p0 = scmp.ne.s32.totalorder %s311_s20, %s377_s3  ;;  %p383_p2 = scmp.lt.s32.totalorder %s377_s3, %s377_s3 }
  0x19   :  { %v112_v18 = vadd.f32 %v111_v8, %v110_v12 }
  0x1a   :  { %v62_v16 = vadd.f32 %v61_v7, %v60_v10  ;;  %p384_p3 = por %p383_p2, %p382_p1 }
  0x1b   :  { %v114_v23 = vadd.f32 %v113_v14, %v112_v18 }
  0x1c   :  { %v64_v21 = vadd.f32 %v63_v13, %v62_v16  ;;  %p385_p4 = pnand %p384_p3, %p378_p0 }
  0x1d   :  { %v116_v28 = vadd.f32 %v115_v20, %v114_v23 }
  0x1e   :  { %v66_v26 = vadd.f32 %v65_v19, %v64_v21 }
  0x1f   :  { %v118_v32 = vadd.f32 %v117_v25, %v116_v28 }
  0x20   :  { %v68_v30 = vadd.f32 %v67_v24, %v66_v26 }
  0x21   :  { %v120_v35 = vadd.f32 %v119_v29, %v118_v32 }
  0x22   :  { %v69_v34 = vrot.slane %v68_v30, 4 }
  0x23   :  { %v122_v38 = vadd.f32 %v121_v33, %v120_v35 }
  0x24   :  { %v70_v37 = vadd.f32 %v69_v34, %v68_v30 }
  0x25   :  { %v124_v40 = vadd.f32 %v123_v36, %v122_v38 }
  0x26   :  { %v71_v39 = vrot.slane %v70_v37, 2 }
  0x27   :  { %v125_v42 = vrot.slane %v124_v40, 4 }
  0x28   :  { %v72_v41 = vadd.f32 %v71_v39, %v70_v37 }
  0x29   :  { %v126_v44 = vadd.f32 %v125_v42, %v124_v40 }
  0x2a   :  { %v73_v43 = vrot.slane %v72_v41, 1 }
  0x2b   :  { %v127_v45 = vrot.slane %v126_v44, 2 }
  0x2c   :  { %v74_v46 = vadd.f32 %v73_v43, %v72_v41 }
  0x2d   :  { %v128_v47 = vadd.f32 %v127_v45, %v126_v44 }
  0x2e   :  { %v76_v49 = vmul.f32 0.0078125, %v74_v46 }
  0x2f   :  { %v129_v48 = vrot.slane %v128_v47, 1 }
  0x31   :  { %v130_v50 = vadd.f32 %v129_v48, %v128_v47 }
  0x33   :  { %v131_v51 = vmul.f32 0.0078125, %v130_v50 }
  0x35   :  { %v133_v52 = vsel %vm132_vm2, %v76_v49, %v131_v51 }
  0x36   :  { %355 = vmatmul.mubr.msk.f32.vlgmr.msra.gmra.mrb[0].mxu0 %vm37_vm1, %v133_v52 }
 0x109   :  { %v214_v57 = vpop.f32.mrb[0].mxu0 }
 0x10a   :  { %v215_v58 = vadd.f32 %v334_v56, %v214_v57  ;;  %v356_v59 = vpop.f32.mrb[1].mxu0 }
 0x10c   :  { %v218_v60 = vmax.f32 %v215_v58, 0.0 }
 0x10e   :  { %362 = vmatmul.mubr.msk.f32.vlgmr.msra.gmra.mrb[0].mxu1 %vm228_vm3, %v218_v60 }
 0x1e1   :  { %v298_v62 = vpop.f32.mrb[0].mxu1 }
 0x1e2   :  { %v299_v63 = vadd.f32 %v336_v61, %v298_v62  ;;  %v363_v0 = vpop.f32.mrb[1].mxu1 }
 0x1e4   :  { %303 = vst.msk [vmem:[#allocation2] sm:$0x3] %vm302_vm4, %v299_v63 }
 0x1e5   :  { %388 = shalt.err (!%p385_p4)
}
 0x1e6   :  { %s389_s22 = scalar_lea.hbm %s605_s5, 32 }
 0x1e7   :  { %p390_p5 = scmp.ne.s32.totalorder %s605_s5, %s389_s22  ;;  %p393_p6 = scmp.lt.u32.totalorder %s389_s22, %s605_s5 }
 0x1e9   :  { %p395_p7 = pnand %p393_p6, %p390_p5 }
 0x1eb   :  { %398 = shalt.err (!%p395_p7)
}
 0x1ec   :  { %313 = dma.vmem_to_hbm [thread:$0]  %s311_s20, 32, %s605_s5, [#allocation3]  }
 0x1ed   :  { %399 = dma.done.wait [#allocation3], 32  }
 0x1ee   :  { %400 = vsyncadd [#allocation3], 4294967264 }
 0x1ef   :  { %317 = vsyncpa [#allocation3], 1 }

// kernel: neural_guide_forward.5
= control target key start
LH: loop header
LB: loop body
LE: loop exit
PB: predicated region body
PF: predicated region fallthrough
CT: control target
= control target key end

     0   :  { %s9539_s25 = smov 0   ;;  %s11995_s0 = inlined_call_operand.vmem [shape: f32[2,128,32], index: 0, kind: input, shape index: {}]   ;;  %s11996_s1 = inlined_call_operand.vmem [shape: f32[3,4,32,8], index: 1, kind: input, shape index: {}]   ;;  %s11997_s2 = inlined_call_operand.vmem [shape: f32[3,4,1,8], index: 2, kind: input, shape index: {}]   ;;  %s11998_s3 = inlined_call_operand.vmem [shape: f32[4,8,32], index: 3, kind: input, shape index: {}]   ;;  %s11999_s4 = inlined_call_operand.vmem [shape: f32[1,32], index: 4, kind: input, shape index: {}]   ;;  %s12000_s5 = inlined_call_operand.vmem [shape: f32[1,32], index: 5, kind: input, shape index: {}]   ;;  %s12001_s6 = inlined_call_operand.vmem [shape: f32[1,32], index: 6, kind: input, shape index: {}]   ;;  %s12002_s7 = inlined_call_operand.vmem [shape: f32[32,128], index: 7, kind: input, shape index: {}]   ;;  %s12003_s8 = inlined_call_operand.vmem [shape: f32[1,128], index: 8, kind: input, shape index: {}]   ;;  %s12004_s9 = inlined_call_operand.vmem [shape: f32[128,32], index: 9, kind: input, shape index: {}]   ;;  %s12005_s10 = inlined_call_operand.vmem [shape: f32[1,32], index: 10, kind: input, shape index: {}]   ;;  %s12006_s11 = inlined_call_operand.vmem [shape: f32[1,32], index: 11, kind: input, shape index: {}]   ;;  %s12007_s12 = inlined_call_operand.vmem [shape: f32[1,32], index: 12, kind: input, shape index: {}]   ;;  %s12008_s13 = inlined_call_operand.vmem [shape: f32[2,128,32], index: 13, kind: output, shape index: {}]  }
   0x1 LB: > { %s6435_s26 = sadd.s32 4294967295, %s9467_s25   ;;  %p6439_p0 = scmp.ge.s32.totalorder %s9467_s25, 1  ;;  %s9467_s25 = sphi %s9539_s25, %s23_s25  }
   0x2   : > { %p387_p1 = scmp.lt.s32.totalorder %s9467_s25, 3 }
   0x4   : > { %p388_p2 = pnand %p6439_p0, %p387_p1 }
   0x5   : > { %v6444_v0 = vld [vmem:[%s11996_s1 + $0x80] sm:$0xff] (!%p388_p2)  ;;  %v6445_v1 = vld [vmem:[%s11996_s1 + $0x88] sm:$0xff] (!%p388_p2)  ;;  %v6446_v2 = vld [vmem:[%s11996_s1 + $0x90] sm:$0xff] (!%p388_p2)  ;;  %p431_p3 = scmp.lt.s32.totalorder (!%p388_p2), %s6435_s26, 1  ;;  %vm479_vm0 = vcmask (!%p388_p2), 261120   ;;  %vm979_vm1 = vcmask (!%p388_p2), 64512  }
   0x6   : > { %391 = sbr.rel (%p388_p2) target bundleno = 5335 (0x14d7), region = 72  ;;  %v8573_v3 = vpack.c.bf16 (!%p388_p2), %v6445_v1, %v6444_v0  ;;  %v6447_v4 = vld [vmem:[%s11996_s1 + $0x98] sm:$0xff] (!%p388_p2)  ;;  %v458_v5 = vld [vmem:[%s11996_s1] sm:$0xff] (!%p388_p2)  ;;  %v459_v6 = vld [vmem:[%s11996_s1 + $0x8] sm:$0xff] (!%p388_p2) }
   0x7   : > { %v8577_v7 = vpack.c.bf16 (!%p388_p2), %v6447_v4, %v6446_v2  ;;  %v8565_v8 = vpack.c.bf16 (!%p388_p2), %v459_v6, %v458_v5  ;;  %v460_v9 = vld [vmem:[%s11996_s1 + $0x10] sm:$0xff] (!%p388_p2)  ;;  %v461_v10 = vld [vmem:[%s11996_s1 + $0x18] sm:$0xff] (!%p388_p2)  ;;  %v9698_v28 = vld [vmem:[%s11997_s2 + $0x4] ss:$0 sm:$0xff] (!%p388_p2) }
   0x8   : > { %8574 = vmatprep.subr.bf16.mxu1 (!%p388_p2), %v8573_v3  ;;  %v8569_v11 = vpack.c.bf16 (!%p388_p2), %v461_v10, %v460_v9  ;;  %v9703_v29 = vld [vmem:[%s11997_s2] ss:$0 sm:$0xff] (!%p388_p2)  ;;  %vm9712_vm2 = vmpackc.low (!%p388_p2), %vm979_vm1, %vm979_vm1 }
   0x9   : > { %8576 = vmatpush3.bf16.msra.mxu1 (!%p388_p2), %v8573_v3  ;;  %8566 = vmatprep.subr.bf16.mxu0 (!%p388_p2), %v8565_v8  ;;  %v6792_v37 = vld [vmem:[%s11996_s1 + $0x160] sm:$0xff] (!%p388_p2) }
   0xa   : > { %8578 = vmatprep.subr.bf16.mxu1 (!%p388_p2), %v8577_v7  ;;  %8568 = vmatpush3.bf16.msra.mxu0 (!%p388_p2), %v8565_v8 }
   0xb   : > { %8570 = vmatprep.subr.bf16.mxu0 (!%p388_p2), %v8569_v11 }
   0xd   : > { %s12012_s26 = smov (!%p431_p3, %s6435_s26), 1  ;;  %8580 = vmatpush3.bf16.msra.mxu1 %v8577_v7 }
   0xe   : > { %s6923_s28 = sshll.u32 %s12012_s26, 7  ;;  %8572 = vmatpush3.bf16.msra.mxu0 %v8569_v11 }
   0xf   : > { %s9579_s14 = scalar_lea.vmem %s11995_s0, %s6923_s28  ;;  %s11913_s23 = scalar_lea.vmem %s12008_s13, %s6923_s28 }
  0x10   : > { %v9582_v12 = vld [vmem:[%s9579_s14] sm:$0xff]  ;;  %v9589_v13 = vld [vmem:[%s9579_s14 + $0x8] sm:$0xff]  ;;  %v9592_v14 = vld [vmem:[%s9579_s14 + $0x10] sm:$0xff] }
  0x11   : > { %7581 = vmatprep.mubr.msk.f32.mxu1 %vm479_vm0, %v9582_v12  ;;  %7549 = vmatprep.mubr.msk.f32.mxu0 %vm479_vm0, %v9582_v12  ;;  %v9599_v15 = vld [vmem:[%s9579_s14 + $0x18] sm:$0xff]  ;;  %v9604_v16 = vld [vmem:[%s9579_s14 + $0x20] sm:$0xff]  ;;  %v9613_v17 = vld [vmem:[%s9579_s14 + $0x28] sm:$0xff] }
  0x12   : > { %7582 = vmatmul.mubr.msk.f32.vlgmr.msra.gmra.mrb[0].mxu1 %vm479_vm0, %v9589_v13  ;;  %7550 = vmatmul.mubr.msk.f32.vlgmr.msra.gmra.mrb[0].mxu0 %vm479_vm0, %v9589_v13  ;;  %v9618_v18 = vld [vmem:[%s9579_s14 + $0x30] sm:$0xff]  ;;  %v9627_v19 = vld [vmem:[%s9579_s14 + $0x38] sm:$0xff]  ;;  %v9632_v20 = vld [vmem:[%s9579_s14 + $0x40] sm:$0xff] }
  0x13   : > { %7584 = vmatprep.mubr.msk.f32.mxu1 %vm479_vm0, %v9592_v14  ;;  %7552 = vmatprep.mubr.msk.f32.mxu0 %vm479_vm0, %v9592_v14  ;;  %v9641_v21 = vld [vmem:[%s9579_s14 + $0x48] sm:$0xff]  ;;  %v9646_v22 = vld [vmem:[%s9579_s14 + $0x50] sm:$0xff]  ;;  %v9655_v23 = vld [vmem:[%s9579_s14 + $0x58] sm:$0xff] }
  0x14   : > { %v9660_v24 = vld [vmem:[%s9579_s14 + $0x60] sm:$0xff]  ;;  %v9669_v25 = vld [vmem:[%s9579_s14 + $0x68] sm:$0xff]  ;;  %v9674_v26 = vld [vmem:[%s9579_s14 + $0x70] sm:$0xff] }
  0x15   : > { %v9683_v27 = vld [vmem:[%s9579_s14 + $0x78] sm:$0xff] }
  0x16   : > { %7585 = vmatmul.mubr.msk.f32.gmra.mrb[2].mxu1 %vm479_vm0, %v9599_v15  ;;  %7553 = vmatmul.mubr.msk.f32.gmra.mrb[2].mxu0 %vm479_vm0, %v9599_v15 }
  0x17   : > { %7587 = vmatprep.mubr.msk.f32.mxu1 %vm479_vm0, %v9604_v16  ;;  %7555 = vmatprep.mubr.msk.f32.mxu0 %vm479_vm0, %v9604_v16 }
  0x1a   : > { %7588 = vmatmul.mubr.msk.f32.gmra.mrb[4].mxu1 %vm479_vm0, %v9613_v17  ;;  %7556 = vmatmul.mubr.msk.f32.gmra.mrb[4].mxu0 %vm479_vm0, %v9613_v17 }
  0x1b   : > { %7590 = vmatprep.mubr.msk.f32.mxu1 %vm479_vm0, %v9618_v18  ;;  %7558 = vmatprep.mubr.msk.f32.mxu0 %vm479_vm0, %v9618_v18 }
  0x1e   : > { %7591 = vmatmul.mubr.msk.f32.gmra.mrb[6].mxu1 %vm479_vm0, %v9627_v19  ;;  %7559 = vmatmul.mubr.msk.f32.gmra.mrb[6].mxu0 %vm479_vm0, %v9627_v19 }
  0x1f   : > { %7593 = vmatprep.mubr.msk.f32.mxu1 %vm479_vm0, %v9632_v20  ;;  %7561 = vmatprep.mubr.msk.f32.mxu0 %vm479_vm0, %v9632_v20 }
  0x22   : > { %7594 = vmatmul.mubr.msk.f32.gmra.mrb[8].mxu1 %vm479_vm0, %v9641_v21  ;;  %7562 = vmatmul.mubr.msk.f32.gmra.mrb[8].mxu0 %vm479_vm0, %v9641_v21 }
  0x23   : > { %7596 = vmatprep.mubr.msk.f32.mxu1 %vm479_vm0, %v9646_v22  ;;  %7564 = vmatprep.mubr.msk.f32.mxu0 %vm479_vm0, %v9646_v22 }
  0x26   : > { %7597 = vmatmul.mubr.msk.f32.gmra.mrb[10].mxu1 %vm479_vm0, %v9655_v23  ;;  %7565 = vmatmul.mubr.msk.f32.gmra.mrb[10].mxu0 %vm479_vm0, %v9655_v23 }
  0x27   : > { %7599 = vmatprep.mubr.msk.f32.mxu1 %vm479_vm0, %v9660_v24  ;;  %7567 = vmatprep.mubr.msk.f32.mxu0 %vm479_vm0, %v9660_v24 }
  0x2a   : > { %7600 = vmatmul.mubr.msk.f32.gmra.mrb[12].mxu1 %vm479_vm0, %v9669_v25  ;;  %7568 = vmatmul.mubr.msk.f32.gmra.mrb[12].mxu0 %vm479_vm0, %v9669_v25 }
  0x2b   : > { %7602 = vmatprep.mubr.msk.f32.mxu1 %vm479_vm0, %v9674_v26  ;;  %7570 = vmatprep.mubr.msk.f32.mxu0 %vm479_vm0, %v9674_v26 }
  0x2e   : > { %7603 = vmatmul.mubr.msk.f32.gmra.mrb[14].mxu1 %vm479_vm0, %v9683_v27  ;;  %7571 = vmatmul.mubr.msk.f32.gmra.mrb[14].mxu0 %vm479_vm0, %v9683_v27 }
  0x2f   : > { %7613 = vmatprep.mubr.msk.f32.mxu0 %vm479_vm0, %v9582_v12 }
  0xe5   : > { %v7583_v30 = vpop.f32.mrb[0].mxu1  ;;  %v7551_v33 = vpop.f32.mrb[0].mxu0 }
  0xe6   : > { %v753_v31 = vadd.f32 %v7583_v30, %v9698_v28  ;;  %v747_v32 = vpop.f32.mrb[1].mxu1  ;;  %v9708_v35 = vadd.f32 %v7551_v33, %v9703_v29  ;;  %v594_v36 = vpop.f32.mrb[1].mxu0 }
  0xe7   : > { %v748_v34 = vadd.f32 %v9698_v28, %v747_v32  ;;  %v595_v38 = vadd.f32 %v9703_v29, %v594_v36 }
  0xe9   : > { %v8589_v39 = vpack.c.bf16 %v753_v31, %v748_v34  ;;  %v7586_v40 = vpop.f32.mrb[2].mxu1  ;;  %v7554_v43 = vpop.f32.mrb[2].mxu0  ;;  %7669 = vmatprep.mubr.msk.f32.mxu1 %vm979_vm1, %v595_v38 }
  0xea   : > { %v763_v41 = vadd.f32 %v7586_v40, %v9698_v28  ;;  %v757_v42 = vpop.f32.mrb[3].mxu1  ;;  %v9723_v45 = vadd.f32 %v7554_v43, %v9703_v29  ;;  %v604_v46 = vpop.f32.mrb[3].mxu0 }
  0xeb   : > { %8591 = vmatprep.subr.msk.bf16.mxu1 %vm9712_vm2, %v8589_v39  ;;  %v758_v44 = vadd.f32 %v9698_v28, %v757_v42  ;;  %v9728_v47 = vadd.f32 %v9703_v29, %v604_v46 }
  0xec   : > { %8594 = vmatpush3.bf16.xpose.msk.msra.mxu1 %vm9712_vm2, %v8589_v39 }
  0xed   : > { %v8595_v48 = vpack.c.bf16 %v763_v41, %v758_v44  ;;  %v7589_v49 = vpop.f32.mrb[4].mxu1  ;;  %v7557_v52 = vpop.f32.mrb[4].mxu0 }
  0xee   : > { %v773_v50 = vadd.f32 %v7589_v49, %v9698_v28  ;;  %v767_v51 = vpop.f32.mrb[5].mxu1  ;;  %v9735_v54 = vadd.f32 %v7557_v52, %v9703_v29  ;;  %v614_v55 = vpop.f32.mrb[5].mxu0 }
  0xef   : > { %8597 = vmatprep.subr.msk.bf16.mxu1 %vm9712_vm2, %v8595_v48  ;;  %v768_v53 = vadd.f32 %v9698_v28, %v767_v51  ;;  %v9738_v56 = vadd.f32 %v9703_v29, %v614_v55 }
  0xf1   : > { %v8601_v57 = vpack.c.bf16 %v773_v50, %v768_v53  ;;  %v7592_v58 = vpop.f32.mrb[6].mxu1  ;;  %v7560_v61 = vpop.f32.mrb[6].mxu0 }
  0xf2   : > { %v783_v59 = vadd.f32 %v7592_v58, %v9698_v28  ;;  %v777_v60 = vpop.f32.mrb[7].mxu1  ;;  %v630_v63 = vadd.f32 %v7560_v61, %v9703_v29  ;;  %v624_v0 = vpop.f32.mrb[7].mxu0 }
  0xf3   : > { %v778_v62 = vadd.f32 %v9698_v28, %v777_v60  ;;  %v625_v1 = vadd.f32 %v9703_v29, %v624_v0 }
  0xf4   : > { %8600 = vmatpush3.bf16.xpose.msk.msra.mxu1 %vm9712_vm2, %v8595_v48 }
  0xf5   : > { %8603 = vmatprep.subr.msk.bf16.mxu1 %vm9712_vm2, %v8601_v57  ;;  %v8607_v2 = vpack.c.bf16 %v783_v59, %v778_v62  ;;  %v7595_v3 = vpop.f32.mrb[8].mxu1  ;;  %v7563_v6 = vpop.f32.mrb[8].mxu0 }
  0xf6   : > { %v793_v4 = vadd.f32 %v7595_v3, %v9698_v28  ;;  %v787_v5 = vpop.f32.mrb[9].mxu1  ;;  %v640_v8 = vadd.f32 %v7563_v6, %v9703_v29  ;;  %v634_v9 = vpop.f32.mrb[9].mxu0 }
  0xf7   : > { %v788_v7 = vadd.f32 %v9698_v28, %v787_v5  ;;  %v635_v10 = vadd.f32 %v9703_v29, %v634_v9 }
  0xf9   : > { %v8613_v11 = vpack.c.bf16 %v793_v4, %v788_v7  ;;  %v7598_v30 = vpop.f32.mrb[10].mxu1  ;;  %v7566_v33 = vpop.f32.mrb[10].mxu0 }
  0xfa   : > { %v803_v31 = vadd.f32 %v7598_v30, %v9698_v28  ;;  %v797_v32 = vpop.f32.mrb[11].mxu1  ;;  %v650_v36 = vadd.f32 %v7566_v33, %v9703_v29  ;;  %v644_v38 = vpop.f32.mrb[11].mxu0 }
  0xfb   : > { %v798_v34 = vadd.f32 %v9698_v28, %v797_v32  ;;  %v645_v39 = vadd.f32 %v9703_v29, %v644_v38 }
  0xfc   : > { %8606 = vmatpush3.bf16.xpose.msk.msra.mxu1 %vm9712_vm2, %v8601_v57 }
  0xfd   : > { %8609 = vmatprep.subr.msk.bf16.mxu1 %vm9712_vm2, %v8607_v2  ;;  %v8619_v40 = vpack.c.bf16 %v803_v31, %v798_v34  ;;  %v7601_v41 = vpop.f32.mrb[12].mxu1  ;;  %v7569_v44 = vpop.f32.mrb[12].mxu0 }
  0xfe   : > { %v813_v42 = vadd.f32 %v7601_v41, %v9698_v28  ;;  %v807_v43 = vpop.f32.mrb[13].mxu1  ;;  %v660_v48 = vadd.f32 %v7569_v44, %v9703_v29  ;;  %v654_v49 = vpop.f32.mrb[13].mxu0 }
  0xff   : > { %v808_v46 = vadd.f32 %v9698_v28, %v807_v43  ;;  %v655_v50 = vadd.f32 %v9703_v29, %v654_v49 }
 0x101   : > { %v8625_v51 = vpack.c.bf16 %v813_v42, %v808_v46  ;;  %v7604_v52 = vpop.f32.mrb[14].mxu1  ;;  %v7572_v57 = vpop.f32.mrb[14].mxu0 }
 0x102   : > { %v823_v53 = vadd.f32 %v7604_v52, %v9698_v28  ;;  %v817_v55 = vpop.f32.mrb[15].mxu1  ;;  %v670_v59 = vadd.f32 %v7572_v57, %v9703_v29  ;;  %v664_v60 = vpop.f32.mrb[15].mxu0  ;;  %v9901_v52 = vld [vmem:[%s11997_s2 + $0x8] ss:$0 sm:$0xff] }
 0x103   : > { %v818_v58 = vadd.f32 %v9698_v28, %v817_v55  ;;  %v665_v61 = vadd.f32 %v9703_v29, %v664_v60  ;;  %v6448_v28 = vld [vmem:[%s11996_s1 + $0x100] sm:$0xff]  ;;  %v6449_v29 = vld [vmem:[%s11996_s1 + $0x108] sm:$0xff] }
 0x104   : > { %8612 = vmatpush3.bf16.xpose.msk.msra.mxu1 %vm9712_vm2, %v8607_v2 }
 0x105   : > { %8615 = vmatprep.subr.msk.bf16.mxu1 %vm9712_vm2, %v8613_v11  ;;  %v8631_v62 = vpack.c.bf16 %v823_v53, %v818_v58 }
 0x10c   : > { %8618 = vmatpush3.bf16.xpose.msk.msra.mxu1 %vm9712_vm2, %v8613_v11 }
 0x10d   : > { %8621 = vmatprep.subr.msk.bf16.mxu1 %vm9712_vm2, %v8619_v40 }
 0x114   : > { %8624 = vmatpush3.bf16.xpose.msk.msra.mxu1 %vm9712_vm2, %v8619_v40 }
 0x115   : > { %8627 = vmatprep.subr.msk.bf16.mxu1 %vm9712_vm2, %v8625_v51 }
 0x11c   : > { %8630 = vmatpush3.bf16.xpose.msk.msra.mxu1 %vm9712_vm2, %v8625_v51 }
 0x11d   : > { %8633 = vmatprep.subr.msk.bf16.mxu1 %vm9712_vm2, %v8631_v62 }
 0x124   : > { %8636 = vmatpush3.bf16.xpose.msk.msra.mxu1 %vm9712_vm2, %v8631_v62 }
 0x12b   : > { %7670 = vmatmul.mubr.msk.f32.vlgmr.msra.gmra.mrb[16].mxu1 %vm979_vm1, %v9708_v35  ;;  %v6450_v35 = vld [vmem:[%s11996_s1 + $0x110] sm:$0xff] }
 0x12c   : > { %7672 = vmatprep.mubr.msk.f32.mxu1 %vm979_vm1, %v9728_v47  ;;  %v6451_v47 = vld [vmem:[%s11996_s1 + $0x118] sm:$0xff] }
 0x12f   : > { %7673 = vmatmul.mubr.msk.f32.gmra.mrb[18].mxu1 %vm979_vm1, %v9723_v45  ;;  %v8581_v45 = vpack.c.bf16 %v6449_v29, %v6448_v28 }
 0x130   : > { %7675 = vmatprep.mubr.msk.f32.mxu1 %vm979_vm1, %v9738_v56 }
 0x131   : > { %8582 = vmatprep.subr.bf16.mxu0 %v8581_v45 }
 0x132   : > { %8584 = vmatpush3.bf16.msra.mxu0 %v8581_v45 }
 0x133   : > { %7676 = vmatmul.mubr.msk.f32.gmra.mrb[20].mxu1 %vm979_vm1, %v9735_v54  ;;  %v8585_v54 = vpack.c.bf16 %v6451_v47, %v6450_v35 }
 0x134   : > { %7678 = vmatprep.mubr.msk.f32.mxu1 %vm979_vm1, %v625_v1 }
 0x135   : > { %8586 = vmatprep.subr.bf16.mxu0 %v8585_v54 }
 0x136   : > { %8588 = vmatpush3.bf16.msra.mxu0 %v8585_v54 }
 0x137   : > { %7679 = vmatmul.mubr.msk.f32.gmra.mrb[22].mxu1 %vm979_vm1, %v630_v63 }
 0x138   : > { %7681 = vmatprep.mubr.msk.f32.mxu1 %vm979_vm1, %v635_v10 }
 0x139   : > { %7614 = vmatmul.mubr.msk.f32.vlgmr.msra.gmra.mrb[16].mxu0 %vm479_vm0, %v9589_v13 }
 0x13a   : > { %7616 = vmatprep.mubr.msk.f32.mxu0 %vm479_vm0, %v9592_v14 }
 0x13b   : > { %7682 = vmatmul.mubr.msk.f32.gmra.mrb[24].mxu1 %vm979_vm1, %v640_v8 }
 0x13c   : > { %7684 = vmatprep.mubr.msk.f32.mxu1 %vm979_vm1, %v645_v39 }
 0x13d   : > { %7617 = vmatmul.mubr.msk.f32.gmra.mrb[18].mxu0 %vm479_vm0, %v9599_v15 }
 0x13e   : > { %7619 = vmatprep.mubr.msk.f32.mxu0 %vm479_vm0, %v9604_v16 }
 0x13f   : > { %7685 = vmatmul.mubr.msk.f32.gmra.mrb[26].mxu1 %vm979_vm1, %v650_v36 }
 0x140   : > { %7687 = vmatprep.mubr.msk.f32.mxu1 %vm979_vm1, %v655_v50 }
 0x141   : > { %7620 = vmatmul.mubr.msk.f32.gmra.mrb[20].mxu0 %vm479_vm0, %v9613_v17 }
 0x142   : > { %7622 = vmatprep.mubr.msk.f32.mxu0 %vm479_vm0, %v9618_v18 }
 0x143   : > { %7688 = vmatmul.mubr.msk.f32.gmra.mrb[28].mxu1 %vm979_vm1, %v660_v48 }
 0x144   : > { %7690 = vmatprep.mubr.msk.f32.mxu1 %vm979_vm1, %v665_v61 }
 0x145   : > { %7623 = vmatmul.mubr.msk.f32.gmra.mrb[22].mxu0 %vm479_vm0, %v9627_v19 }
 0x146   : > { %7625 = vmatprep.mubr.msk.f32.mxu0 %vm479_vm0, %v9632_v20 }
 0x147   : > { %7691 = vmatmul.mubr.msk.f32.gmra.mrb[30].mxu1 %vm979_vm1, %v670_v59 }
 0x148   : > { %7783 = vmatprep.mubr.msk.f32.mxu1 %vm479_vm0, %v9582_v12 }
 0x149   : > { %7626 = vmatmul.mubr.msk.f32.gmra.mrb[24].mxu0 %vm479_vm0, %v9641_v21 }
 0x14a   : > { %7628 = vmatprep.mubr.msk.f32.mxu0 %vm479_vm0, %v9646_v22 }
 0x14d   : > { %7629 = vmatmul.mubr.msk.f32.gmra.mrb[26].mxu0 %vm479_vm0, %v9655_v23 }
 0x14e   : > { %7631 = vmatprep.mubr.msk.f32.mxu0 %vm479_vm0, %v9660_v24 }
 0x151   : > { %7632 = vmatmul.mubr.msk.f32.gmra.mrb[28].mxu0 %vm479_vm0, %v9669_v25 }
 0x152   : > { %7634 = vmatprep.mubr.msk.f32.mxu0 %vm479_vm0, %v9674_v26 }
 0x155   : > { %7635 = vmatmul.mubr.msk.f32.gmra.mrb[30].mxu0 %vm479_vm0, %v9683_v27 }
 0x1fe   : > { %v7671_v56 = vpop.f32.mrb[16].mxu1 }
 0x1ff   : > { %v1142_v63 = vpop.f32.mrb[17].mxu1  ;;  %v9853_v3 = vmul.f32 0.35355338, %v7671_v56 }
 0x200   : > { %v9850_v0 = vmul.f32 0.35355338, %v1142_v63 }
 0x202   : > { %1237 = vmax.xlane.f32.xlu0 %v9850_v0  ;;  %v7674_v1 = vpop.f32.mrb[18].mxu1 }
 0x203   : > { %v1152_v2 = vpop.f32.mrb[19].mxu1  ;;  %v9859_v7 = vmul.f32 0.35355338, %v7674_v1 }
 0x204   : > { %v9855_v4 = vmul.f32 0.35355338, %v1152_v2 }
 0x206   : > { %1239 = vmax.xlane.f32.xlu0 %v9853_v3  ;;  %1241 = vmax.xlane.f32.xlu1 %v9855_v4  ;;  %v7677_v5 = vpop.f32.mrb[20].mxu1 }
 0x207   : > { %v1162_v6 = vpop.f32.mrb[21].mxu1  ;;  %v9865_v11 = vmul.f32 0.35355338, %v7677_v5 }
 0x208   : > { %v9861_v8 = vmul.f32 0.35355338, %v1162_v6 }
 0x20a   : > { %1243 = vmax.xlane.f32.xlu1 %v9859_v7  ;;  %1245 = vmax.xlane.f32.xlu0 %v9861_v8  ;;  %v7680_v9 = vpop.f32.mrb[22].mxu1 }
 0x20b   : > { %v1172_v10 = vpop.f32.mrb[23].mxu1  ;;  %v9871_v33 = vmul.f32 0.35355338, %v7680_v9 }
 0x20c   : > { %v9867_v30 = vmul.f32 0.35355338, %v1172_v10  ;;  %v7615_v53 = vpop.f32.mrb[16].mxu0 }
 0x20d   : > { %v906_v55 = vadd.f32 %v7615_v53, %v9901_v52  ;;  %v900_v57 = vpop.f32.mrb[17].mxu0 }
 0x20e   : > { %1247 = vmax.xlane.f32.xlu1 %v9865_v11  ;;  %1249 = vmax.xlane.f32.xlu0 %v9867_v30  ;;  %v7683_v31 = vpop.f32.mrb[24].mxu1  ;;  %v901_v58 = vadd.f32 %v9901_v52, %v900_v57 }
 0x20f   : > { %v1182_v32 = vpop.f32.mrb[25].mxu1  ;;  %v9877_v39 = vmul.f32 0.35355338, %v7683_v31 }
 0x210   : > { %v9873_v34 = vmul.f32 0.35355338, %v1182_v32  ;;  %v8637_v59 = vpack.c.bf16 %v906_v55, %v901_v58  ;;  %v7618_v60 = vpop.f32.mrb[18].mxu0 }
 0x211   : > { %v916_v61 = vadd.f32 %v7618_v60, %v9901_v52  ;;  %v910_v62 = vpop.f32.mrb[19].mxu0 }
 0x212   : > { %1251 = vmax.xlane.f32.xlu1 %v9871_v33  ;;  %1253 = vmax.xlane.f32.xlu0 %v9873_v34  ;;  %v7686_v36 = vpop.f32.mrb[26].mxu1  ;;  %v911_v28 = vadd.f32 %v9901_v52, %v910_v62 }
 0x213   : > { %v1192_v38 = vpop.f32.mrb[27].mxu1  ;;  %v9883_v43 = vmul.f32 0.35355338, %v7686_v36  ;;  %8638 = vmatprep.subr.bf16.mxu0 %v8637_v59 }
 0x214   : > { %v9879_v40 = vmul.f32 0.35355338, %v1192_v38  ;;  %8640 = vmatpush3.bf16.msra.mxu0 %v8637_v59  ;;  %v8641_v29 = vpack.c.bf16 %v916_v61, %v911_v28  ;;  %v7621_v35 = vpop.f32.mrb[20].mxu0 }
 0x215   : > { %v926_v45 = vadd.f32 %v7621_v35, %v9901_v52  ;;  %v920_v47 = vpop.f32.mrb[21].mxu0 }
 0x216   : > { %1255 = vmax.xlane.f32.xlu1 %v9877_v39  ;;  %1257 = vmax.xlane.f32.xlu0 %v9879_v40  ;;  %v7689_v41 = vpop.f32.mrb[28].mxu1  ;;  %v921_v54 = vadd.f32 %v9901_v52, %v920_v47 }
 0x217   : > { %v1202_v42 = vpop.f32.mrb[29].mxu1  ;;  %v9889_v49 = vmul.f32 0.35355338, %v7689_v41  ;;  %8642 = vmatprep.subr.bf16.mxu0 %v8641_v29 }
 0x218   : > { %v9885_v44 = vmul.f32 0.35355338, %v1202_v42  ;;  %8644 = vmatpush3.bf16.msra.mxu0 %v8641_v29  ;;  %v8645_v56 = vpack.c.bf16 %v926_v45, %v921_v54  ;;  %v7624_v63 = vpop.f32.mrb[22].mxu0 }
 0x219   : > { %v936_v1 = vadd.f32 %v7624_v63, %v9901_v52  ;;  %v930_v2 = vpop.f32.mrb[23].mxu0 }
 0x21a   : > { %1259 = vmax.xlane.f32.xlu1 %v9883_v43  ;;  %1261 = vmax.xlane.f32.xlu0 %v9885_v44  ;;  %v7692_v46 = vpop.f32.mrb[30].mxu1  ;;  %v931_v5 = vadd.f32 %v9901_v52, %v930_v2 }
 0x21b   : > { %v1212_v48 = vpop.f32.mrb[31].mxu1  ;;  %v9895_v51 = vmul.f32 0.35355338, %v7692_v46  ;;  %8646 = vmatprep.subr.bf16.mxu0 %v8645_v56 }
 0x21c   : > { %v9891_v50 = vmul.f32 0.35355338, %v1212_v48  ;;  %8648 = vmatpush3.bf16.msra.mxu0 %v8645_v56  ;;  %v8649_v10 = vpack.c.bf16 %v936_v1, %v931_v5  ;;  %v7627_v31 = vpop.f32.mrb[24].mxu0 }
 0x21d   : > { %v946_v32 = vadd.f32 %v7627_v31, %v9901_v52  ;;  %v940_v36 = vpop.f32.mrb[25].mxu0 }
 0x21e   : > { %1263 = vmax.xlane.f32.xlu1 %v9889_v49  ;;  %1265 = vmax.xlane.f32.xlu0 %v9891_v50  ;;  %v941_v41 = vadd.f32 %v9901_v52, %v940_v36 }
 0x21f   : > { %8650 = vmatprep.subr.bf16.mxu0 %v8649_v10 }
 0x220   : > { %8652 = vmatpush3.bf16.msra.mxu0 %v8649_v10  ;;  %v8653_v55 = vpack.c.bf16 %v946_v32, %v941_v41  ;;  %v7630_v57 = vpop.f32.mrb[26].mxu0 }
 0x221   : > { %v950_v58 = vpop.f32.mrb[27].mxu0 }
 0x222   : > { %1267 = vmax.xlane.f32.xlu1 %v9895_v51  ;;  %v951_v61 = vadd.f32 %v9901_v52, %v950_v58  ;;  %8654 = vmatprep.subr.bf16.mxu0 %v8653_v55 }
 0x224   : > { %8656 = vmatpush3.bf16.msra.mxu0 %v8653_v55 }
 0x28f   : > { %v1238_v6 = vpop.xlane.xlu0 %1237 }
 0x290   : > { %v1269_v9 = vsub.f32 %v9850_v0, %v1238_v6  ;;  %v956_v0 = vadd.f32 %v7630_v57, %v9901_v52 }
 0x292   : > { %v1285_v38 = vmul.f32 1.442695, %v1269_v9  ;;  %v8657_v35 = vpack.c.bf16 %v956_v0, %v951_v61 }
 0x293   : > { %v1240_v42 = vpop.xlane.xlu0 %1239  ;;  %v1242_v46 = vpop.xlane.xlu1 %1241 }
 0x294   : > { %9093 = vpow2.f32 %v1285_v38  ;;  %v1270_v48 = vsub.f32 %v9853_v3, %v1240_v42  ;;  %v1271_v53 = vsub.f32 %v9855_v4, %v1242_v46  ;;  %8658 = vmatprep.subr.bf16.mxu0 %v8657_v35 }
 0x295   : > { %8660 = vmatpush3.bf16.msra.mxu0 %v8657_v35 }
 0x296   : > { %v1287_v59 = vmul.f32 1.442695, %v1270_v48  ;;  %v1289_v60 = vmul.f32 1.442695, %v1271_v53 }
 0x297   : > { %v1244_v62 = vpop.xlane.xlu1 %1243  ;;  %v1246_v28 = vpop.xlane.xlu0 %1245 }
 0x298   : > { %9095 = vpow2.f32 %v1287_v59  ;;  %v1272_v29 = vsub.f32 %v9859_v7, %v1244_v62  ;;  %v1273_v3 = vsub.f32 %v9861_v8, %v1246_v28 }
 0x299   : > { %9097 = vpow2.f32 %v1289_v60 }
 0x29a   : > { %v1291_v4 = vmul.f32 1.442695, %v1272_v29  ;;  %v1293_v45 = vmul.f32 1.442695, %v1273_v3 }
 0x29b   : > { %v1248_v47 = vpop.xlane.xlu1 %1247  ;;  %v1250_v54 = vpop.xlane.xlu0 %1249 }
 0x29c   : > { %9099 = vpow2.f32 %v1291_v4  ;;  %v1274_v56 = vsub.f32 %v9865_v11, %v1248_v47  ;;  %v1275_v63 = vsub.f32 %v9867_v30, %v1250_v54 }
 0x29d   : > { %9101 = vpow2.f32 %v1293_v45 }
 0x29e   : > { %v9922_v1 = vpop.eup %9093  ;;  %v1295_v2 = vmul.f32 1.442695, %v1274_v56  ;;  %v1297_v7 = vmul.f32 1.442695, %v1275_v63 }
 0x29f   : > { %v1252_v5 = vpop.xlane.xlu1 %1251  ;;  %v1254_v8 = vpop.xlane.xlu0 %1253  ;;  %1317 = vadd.xlane.f32.xlu0 %v9922_v1 }
 0x2a0   : > { %9103 = vpow2.f32 %v1295_v2  ;;  %v1276_v6 = vsub.f32 %v9871_v33, %v1252_v5  ;;  %v1277_v9 = vsub.f32 %v9873_v34, %v1254_v8 }
 0x2a1   : > { %9105 = vpow2.f32 %v1297_v7 }
 0x2a2   : > { %v9927_v10 = vpop.eup %9095  ;;  %v1299_v11 = vmul.f32 1.442695, %v1276_v6  ;;  %v1301_v31 = vmul.f32 1.442695, %v1277_v9 }
 0x2a3   : > { %v9929_v30 = vpop.eup %9097  ;;  %v1256_v32 = vpop.xlane.xlu1 %1255  ;;  %1319 = vadd.xlane.f32.xlu1 %v9927_v10 }
 0x2a4   : > { %v1258_v36 = vpop.xlane.xlu0 %1257  ;;  %9107 = vpow2.f32 %v1299_v11  ;;  %v1278_v38 = vsub.f32 %v9877_v39, %v1256_v32  ;;  %1321 = vadd.xlane.f32.xlu0 %v9929_v30  ;;  %v1526_v32 = vld [vmem:[%s11998_s3] sm:$0xff] }
 0x2a5   : > { %v1279_v41 = vsub.f32 %v9879_v40, %v1258_v36  ;;  %9109 = vpow2.f32 %v1301_v31 }
 0x2a6   : > { %v9935_v33 = vpop.eup %9099  ;;  %v1303_v34 = vmul.f32 1.442695, %v1278_v38 }
 0x2a7   : > { %v1305_v42 = vmul.f32 1.442695, %v1279_v41  ;;  %v9937_v46 = vpop.eup %9101  ;;  %v1260_v48 = vpop.xlane.xlu1 %1259  ;;  %1323 = vadd.xlane.f32.xlu1 %v9935_v33 }
 0x2a8   : > { %v1262_v53 = vpop.xlane.xlu0 %1261  ;;  %9111 = vpow2.f32 %v1303_v34  ;;  %v1280_v55 = vsub.f32 %v9883_v43, %v1260_v48  ;;  %1325 = vadd.xlane.f32.xlu0 %v9937_v46 }
 0x2a9   : > { %v1281_v39 = vsub.f32 %v9885_v44, %v1262_v53  ;;  %9113 = vpow2.f32 %v1305_v42  ;;  %v7633_v44 = vpop.f32.mrb[28].mxu0 }
 0x2aa   : > { %v9943_v40 = vpop.eup %9103  ;;  %v1307_v57 = vmul.f32 1.442695, %v1280_v55  ;;  %v966_v3 = vadd.f32 %v7633_v44, %v9901_v52  ;;  %v960_v35 = vpop.f32.mrb[29].mxu0 }
 0x2ab   : > { %v1309_v0 = vmul.f32 1.442695, %v1281_v39  ;;  %v9945_v58 = vpop.eup %9105  ;;  %v1264_v59 = vpop.xlane.xlu1 %1263  ;;  %1327 = vadd.xlane.f32.xlu1 %v9943_v40 }
 0x2ac   : > { %v1266_v60 = vpop.xlane.xlu0 %1265  ;;  %9115 = vpow2.f32 %v1307_v57  ;;  %v1282_v61 = vsub.f32 %v9889_v49, %v1264_v59  ;;  %1329 = vadd.xlane.f32.xlu0 %v9945_v58  ;;  %v961_v49 = vadd.f32 %v9901_v52, %v960_v35  ;;  %v7636_v63 = vpop.f32.mrb[30].mxu0 }
 0x2ad   : > { %v1283_v43 = vsub.f32 %v9891_v50, %v1266_v60  ;;  %9117 = vpow2.f32 %v1309_v0  ;;  %v976_v7 = vadd.f32 %v7636_v63, %v9901_v52  ;;  %v970_v5 = vpop.f32.mrb[31].mxu0 }
 0x2ae   : > { %v9951_v62 = vpop.eup %9107  ;;  %v1311_v28 = vmul.f32 1.442695, %v1282_v61  ;;  %v8661_v50 = vpack.c.bf16 %v966_v3, %v961_v49 }
 0x2af   : > { %v1313_v29 = vmul.f32 1.442695, %v1283_v43  ;;  %v9954_v4 = vpop.eup %9109  ;;  %1331 = vadd.xlane.f32.xlu1 %v9951_v62  ;;  %v1268_v45 = vpop.xlane.xlu1 %1267 }
 0x2b0   : > { %9119 = vpow2.f32 %v1311_v28  ;;  %v1284_v47 = vsub.f32 %v9895_v51, %v1268_v45  ;;  %1333 = vadd.xlane.f32.xlu0 %v9954_v4  ;;  %8662 = vmatprep.subr.bf16.mxu0 %v8661_v50  ;;  %v971_v51 = vadd.f32 %v9901_v52, %v970_v5 }
 0x2b1   : > { %9121 = vpow2.f32 %v1313_v29  ;;  %8664 = vmatpush3.bf16.msra.mxu0 %v8661_v50 }
 0x2b2   : > { %v9960_v54 = vpop.eup %9111  ;;  %v1315_v56 = vmul.f32 1.442695, %v1284_v47  ;;  %v8665_v6 = vpack.c.bf16 %v976_v7, %v971_v51 }
 0x2b3   : > { %v9962_v2 = vpop.eup %9113  ;;  %1335 = vadd.xlane.f32.xlu1 %v9960_v54 }
 0x2b4   : > { %9123 = vpow2.f32 %v1315_v56  ;;  %1337 = vadd.xlane.f32.xlu0 %v9962_v2  ;;  %8666 = vmatprep.subr.bf16.mxu0 %v8665_v6 }
 0x2b5   : > { %8668 = vmatpush3.bf16.msra.mxu0 %v8665_v6 }
 0x2b6   : > { %v9968_v8 = vpop.eup %9115  ;;  %7749 = vmatprep.subr.mxu0 %v1526_v32 }
 0x2b7   : > { %v9970_v9 = vpop.eup %9117  ;;  %1339 = vadd.xlane.f32.xlu1 %v9968_v8 }
 0x2b8   : > { %1341 = vadd.xlane.f32.xlu0 %v9970_v9 }
 0x2ba   : > { %v9974_v11 = vpop.eup %9119 }
 0x2bb   : > { %v9976_v31 = vpop.eup %9121  ;;  %1343 = vadd.xlane.f32.xlu1 %v9974_v11 }
 0x2bc   : > { %1345 = vadd.xlane.f32.xlu0 %v9976_v31 }
 0x2be   : > { %v9980_v52 = vpop.eup %9123 }
 0x2bf   : > { %1347 = vadd.xlane.f32.xlu1 %v9980_v52 }
 0x32c   : > { %v1318_v36 = vpop.xlane.xlu0 %1317 }
 0x32d   : > { %9125 = vrcp.f32 %v1318_v36 }
 0x330   : > { %v1320_v38 = vpop.xlane.xlu1 %1319 }
 0x331   : > { %9127 = vrcp.f32 %v1320_v38  ;;  %v1322_v41 = vpop.xlane.xlu0 %1321 }
 0x332   : > { %9129 = vrcp.f32 %v1322_v41 }
 0x334   : > { %v1324_v34 = vpop.xlane.xlu1 %1323 }
 0x335   : > { %9131 = vrcp.f32 %v1324_v34  ;;  %v1326_v42 = vpop.xlane.xlu0 %1325 }
 0x336   : > { %9133 = vrcp.f32 %v1326_v42 }
 0x337   : > { %v9126_v48 = vpop.eup %9125 }
 0x338   : > { %v1328_v53 = vpop.xlane.xlu1 %1327  ;;  %v1350_v55 = vmul.f32 %v9126_v48, %v9922_v1 }
 0x339   : > { %9135 = vrcp.f32 %v1328_v53  ;;  %v1330_v39 = vpop.xlane.xlu0 %1329 }
 0x33a   : > { %9137 = vrcp.f32 %v1330_v39  ;;  %7725 = vmatprep.mubr.f32.mxu0 %v1350_v55  ;;  %v6556_v55 = vld [vmem:[%s11996_s1 + $0x30] sm:$0xff]  ;;  %v6557_v39 = vld [vmem:[%s11996_s1 + $0x38] sm:$0xff] }
 0x33b   : > { %v9128_v57 = vpop.eup %9127 }
 0x33c   : > { %v9130_v0 = vpop.eup %9129  ;;  %v1332_v59 = vpop.xlane.xlu1 %1331  ;;  %v1352_v60 = vmul.f32 %v9128_v57, %v9927_v10  ;;  %v8673_v57 = vpack.c.bf16 %v6557_v39, %v6556_v55 }
 0x33d   : > { %9139 = vrcp.f32 %v1332_v59  ;;  %v1334_v61 = vpop.xlane.xlu0 %1333  ;;  %v1354_v43 = vmul.f32 %v9130_v0, %v9929_v30 }
 0x33e   : > { %9141 = vrcp.f32 %v1334_v61  ;;  %7726 = vmatmul.mubr.f32.vlgmr.msra.gmra.mrb[32].mxu0 %v1352_v60 }
 0x33f   : > { %v9132_v44 = vpop.eup %9131  ;;  %7728 = vmatprep.mubr.f32.mxu0 %v1354_v43  ;;  %7750 = vmatpush3.msra.mxu0 %v1526_v32 }
 0x340   : > { %v9134_v28 = vpop.eup %9133  ;;  %v1336_v1 = vpop.xlane.xlu1 %1335  ;;  %v1356_v29 = vmul.f32 %v9132_v44, %v9935_v33 }
 0x341   : > { %9143 = vrcp.f32 %v1336_v1  ;;  %v1338_v3 = vpop.xlane.xlu0 %1337  ;;  %v1358_v35 = vmul.f32 %v9134_v28, %v9937_v46  ;;  %v10075_v28 = vld [vmem:[%s9579_s14] sm:$0xff]  ;;  %v10080_v1 = vld [vmem:[%s9579_s14 + $0x8] sm:$0xff] }
 0x342   : > { %9145 = vrcp.f32 %v1338_v3  ;;  %7729 = vmatmul.mubr.f32.gmra.mrb[34].mxu0 %v1356_v29  ;;  %v10085_v29 = vld [vmem:[%s9579_s14 + $0x10] sm:$0xff]  ;;  %v10090_v3 = vld [vmem:[%s9579_s14 + $0x18] sm:$0xff] }
 0x343   : > { %v9136_v10 = vpop.eup %9135  ;;  %7731 = vmatprep.mubr.f32.mxu0 %v1358_v35  ;;  %v10095_v35 = vld [vmem:[%s9579_s14 + $0x20] sm:$0xff] }
 0x344   : > { %v9138_v45 = vpop.eup %9137  ;;  %v1340_v49 = vpop.xlane.xlu1 %1339  ;;  %v1360_v30 = vmul.f32 %v9136_v10, %v9943_v40  ;;  %v10100_v10 = vld [vmem:[%s9579_s14 + $0x28] sm:$0xff] }
 0x345   : > { %9147 = vrcp.f32 %v1340_v49  ;;  %v1342_v47 = vpop.xlane.xlu0 %1341  ;;  %v1362_v50 = vmul.f32 %v9138_v45, %v9945_v58  ;;  %v10105_v45 = vld [vmem:[%s9579_s14 + $0x30] sm:$0xff]  ;;  %v10110_v49 = vld [vmem:[%s9579_s14 + $0x38] sm:$0xff] }
 0x346   : > { %9149 = vrcp.f32 %v1342_v47  ;;  %7732 = vmatmul.mubr.f32.gmra.mrb[36].mxu0 %v1360_v30  ;;  %v10115_v30 = vld [vmem:[%s9579_s14 + $0x40] sm:$0xff]  ;;  %v10120_v47 = vld [vmem:[%s9579_s14 + $0x48] sm:$0xff] }
 0x347   : > { %v9140_v56 = vpop.eup %9139  ;;  %7734 = vmatprep.mubr.f32.mxu0 %v1362_v50  ;;  %v10125_v50 = vld [vmem:[%s9579_s14 + $0x50] sm:$0xff] }
 0x348   : > { %v9142_v33 = vpop.eup %9141  ;;  %v1344_v63 = vpop.xlane.xlu1 %1343  ;;  %v1364_v46 = vmul.f32 %v9140_v56, %v9951_v62  ;;  %v10130_v56 = vld [vmem:[%s9579_s14 + $0x58] sm:$0xff] }
 0x349   : > { %9151 = vrcp.f32 %v1344_v63  ;;  %v1346_v7 = vpop.xlane.xlu0 %1345  ;;  %v1366_v5 = vmul.f32 %v9142_v33, %v9954_v4  ;;  %v10135_v33 = vld [vmem:[%s9579_s14 + $0x60] sm:$0xff] }
 0x34a   : > { %9153 = vrcp.f32 %v1346_v7  ;;  %7735 = vmatmul.mubr.f32.gmra.mrb[38].mxu0 %v1364_v46  ;;  %v6567_v46 = vld [vmem:[%s11997_s2 + $0x1] ss:$0 sm:$0xff] }
 0x34b   : > { %v9144_v51 = vpop.eup %9143  ;;  %7737 = vmatprep.mubr.f32.mxu0 %v1366_v5 }
 0x34c   : > { %v9146_v40 = vpop.eup %9145  ;;  %v1348_v6 = vpop.xlane.xlu1 %1347  ;;  %v1368_v58 = vmul.f32 %v9144_v51, %v9960_v54 }
 0x34d   : > { %9155 = vrcp.f32 %v1348_v6  ;;  %v1370_v32 = vmul.f32 %v9146_v40, %v9962_v2 }
 0x34e   : > { %7738 = vmatmul.mubr.f32.gmra.mrb[40].mxu0 %v1368_v58 }
 0x34f   : > { %v9148_v36 = vpop.eup %9147  ;;  %7740 = vmatprep.mubr.f32.mxu0 %v1370_v32 }
 0x350   : > { %v9150_v38 = vpop.eup %9149  ;;  %v1372_v62 = vmul.f32 %v9148_v36, %v9968_v8  ;;  %v6558_v8 = vld [vmem:[%s11996_s1 + $0xa0] sm:$0xff] }
 0x351   : > { %v1374_v41 = vmul.f32 %v9150_v38, %v9970_v9  ;;  %v6559_v9 = vld [vmem:[%s11996_s1 + $0xa8] sm:$0xff] }
 0x352   : > { %7741 = vmatmul.mubr.f32.gmra.mrb[42].mxu0 %v1372_v62  ;;  %v8677_v53 = vpack.c.bf16 %v6559_v9, %v6558_v8 }
 0x353   : > { %v9152_v4 = vpop.eup %9151  ;;  %7743 = vmatprep.mubr.f32.mxu0 %v1374_v41 }
 0x354   : > { %v9154_v34 = vpop.eup %9153  ;;  %v1376_v42 = vmul.f32 %v9152_v4, %v9974_v11  ;;  %8678 = vmatprep.subr.bf16.mxu0 %v8677_v53  ;;  %v6554_v11 = vld [vmem:[%s11996_s1 + $0x20] sm:$0xff] }
 0x355   : > { %v1378_v48 = vmul.f32 %v9154_v34, %v9976_v31  ;;  %v6555_v31 = vld [vmem:[%s11996_s1 + $0x28] sm:$0xff] }
 0x356   : > { %7744 = vmatmul.mubr.f32.gmra.mrb[44].mxu0 %v1376_v42 }
 0x357   : > { %v9156_v54 = vpop.eup %9155  ;;  %7746 = vmatprep.mubr.f32.mxu0 %v1378_v48 }
 0x358   : > { %v1380_v2 = vmul.f32 %v9156_v54, %v9980_v52  ;;  %v8669_v52 = vpack.c.bf16 %v6555_v31, %v6554_v11 }
 0x35a   : > { %7747 = vmatmul.mubr.f32.gmra.mrb[46].mxu0 %v1380_v2  ;;  %8670 = vmatprep.subr.bf16.mxu1 %v8669_v52 }
 0x35b   : > { %8672 = vmatpush3.bf16.msra.mxu1 %v8669_v52 }
 0x35c   : > { %8674 = vmatprep.subr.bf16.mxu1 %v8673_v57 }
 0x35f   : > { %8676 = vmatpush3.bf16.msra.mxu1 %v8673_v57 }
 0x362   : > { %7784 = vmatmul.mubr.msk.f32.vlgmr.msra.gmra.mrb[32].mxu1 %vm479_vm0, %v9589_v13  ;;  %v6560_v13 = vld [vmem:[%s11996_s1 + $0xb0] sm:$0xff] }
 0x363   : > { %7786 = vmatprep.mubr.msk.f32.mxu1 %vm479_vm0, %v9592_v14  ;;  %v6561_v14 = vld [vmem:[%s11996_s1 + $0xb8] sm:$0xff] }
 0x366   : > { %7787 = vmatmul.mubr.msk.f32.gmra.mrb[34].mxu1 %vm479_vm0, %v9599_v15 }
 0x367   : > { %7789 = vmatprep.mubr.msk.f32.mxu1 %vm479_vm0, %v9604_v16 }
 0x36a   : > { %7790 = vmatmul.mubr.msk.f32.gmra.mrb[36].mxu1 %vm479_vm0, %v9613_v17  ;;  %v8681_v17 = vpack.c.bf16 %v6561_v14, %v6560_v13 }
 0x36b   : > { %7792 = vmatprep.mubr.msk.f32.mxu1 %vm479_vm0, %v9618_v18 }
 0x36e   : > { %7793 = vmatmul.mubr.msk.f32.gmra.mrb[38].mxu1 %vm479_vm0, %v9627_v19 }
 0x36f   : > { %7795 = vmatprep.mubr.msk.f32.mxu1 %vm479_vm0, %v9632_v20 }
 0x372   : > { %7796 = vmatmul.mubr.msk.f32.gmra.mrb[40].mxu1 %vm479_vm0, %v9641_v21 }
 0x373   : > { %7798 = vmatprep.mubr.msk.f32.mxu1 %vm479_vm0, %v9646_v22 }
 0x376   : > { %7799 = vmatmul.mubr.msk.f32.gmra.mrb[42].mxu1 %vm479_vm0, %v9655_v23 }
 0x377   : > { %7801 = vmatprep.mubr.msk.f32.mxu1 %vm479_vm0, %v9660_v24 }
 0x37a   : > { %7802 = vmatmul.mubr.msk.f32.gmra.mrb[44].mxu1 %vm479_vm0, %v9669_v25 }
 0x37b   : > { %7804 = vmatprep.mubr.msk.f32.mxu1 %vm479_vm0, %v9674_v26 }
 0x37e   : > { %7805 = vmatmul.mubr.msk.f32.gmra.mrb[46].mxu1 %vm479_vm0, %v9683_v27 }
 0x37f   : > { %7847 = vmatprep.mubr.msk.f32.mxu1 %vm479_vm0, %v9582_v12 }
 0x411   : > { %v7727_v15 = vpop.f32.mrb[32].mxu0 }
 0x412   : > { %v1447_v16 = vpop.f32.mrb[33].mxu0 }
 0x413   : > { %7751 = vmatprep.mubr.msk.f32.mxu0 %vm979_vm1, %v1447_v16 }
 0x414   : > { %7752 = vmatmul.mubr.msk.f32.vlgmr.msra.gmra.mrb[48].mxu0 %vm979_vm1, %v7727_v15  ;;  %v6585_v15 = vld [vmem:[%s11997_s2 + $0x5] ss:$0 sm:$0xff] }
 0x415   : > { %8680 = vmatpush3.bf16.msra.mxu0 %v8677_v53  ;;  %v7730_v18 = vpop.f32.mrb[34].mxu0 }
 0x416   : > { %v1457_v19 = vpop.f32.mrb[35].mxu0  ;;  %8682 = vmatprep.subr.bf16.mxu0 %v8681_v17 }
 0x417   : > { %7754 = vmatprep.mubr.msk.f32.mxu0 %vm979_vm1, %v1457_v19 }
 0x418   : > { %7755 = vmatmul.mubr.msk.f32.gmra.mrb[50].mxu0 %vm979_vm1, %v7730_v18 }
 0x419   : > { %v7733_v12 = vpop.f32.mrb[36].mxu0  ;;  %8684 = vmatpush3.bf16.msra.mxu0 %v8681_v17 }
 0x41a   : > { %v1467_v20 = vpop.f32.mrb[37].mxu0 }
 0x41b   : > { %7757 = vmatprep.mubr.msk.f32.mxu0 %vm979_vm1, %v1467_v20 }
 0x41c   : > { %7758 = vmatmul.mubr.msk.f32.gmra.mrb[52].mxu0 %vm979_vm1, %v7733_v12 }
 0x41d   : > { %v7736_v21 = vpop.f32.mrb[38].mxu0 }
 0x41e   : > { %v1477_v22 = vpop.f32.mrb[39].mxu0 }
 0x41f   : > { %7760 = vmatprep.mubr.msk.f32.mxu0 %vm979_vm1, %v1477_v22 }
 0x420   : > { %7761 = vmatmul.mubr.msk.f32.gmra.mrb[54].mxu0 %vm979_vm1, %v7736_v21 }
 0x421   : > { %v7739_v23 = vpop.f32.mrb[40].mxu0 }
 0x422   : > { %v1487_v24 = vpop.f32.mrb[41].mxu0 }
 0x423   : > { %7763 = vmatprep.mubr.msk.f32.mxu0 %vm979_vm1, %v1487_v24 }
 0x424   : > { %7764 = vmatmul.mubr.msk.f32.gmra.mrb[56].mxu0 %vm979_vm1, %v7739_v23 }
 0x425   : > { %v7742_v0 = vpop.f32.mrb[42].mxu0 }
 0x426   : > { %v1497_v59 = vpop.f32.mrb[43].mxu0 }
 0x427   : > { %7766 = vmatprep.mubr.msk.f32.mxu0 %vm979_vm1, %v1497_v59 }
 0x428   : > { %7767 = vmatmul.mubr.msk.f32.gmra.mrb[58].mxu0 %vm979_vm1, %v7742_v0 }
 0x429   : > { %v7745_v60 = vpop.f32.mrb[44].mxu0 }
 0x42a   : > { %v1507_v61 = vpop.f32.mrb[45].mxu0 }
 0x42b   : > { %7769 = vmatprep.mubr.msk.f32.mxu0 %vm979_vm1, %v1507_v61 }
 0x42c   : > { %7770 = vmatmul.mubr.msk.f32.gmra.mrb[60].mxu0 %vm979_vm1, %v7745_v60 }
 0x42d   : > { %v7748_v43 = vpop.f32.mrb[46].mxu0 }
 0x42e   : > { %v1517_v44 = vpop.f32.mrb[47].mxu0 }
 0x42f   : > { %7772 = vmatprep.mubr.msk.f32.mxu0 %vm979_vm1, %v1517_v44 }
 0x430   : > { %7773 = vmatmul.mubr.msk.f32.gmra.mrb[62].mxu0 %vm979_vm1, %v7748_v43 }
 0x431   : > { %7815 = vmatprep.mubr.msk.f32.mxu0 %vm479_vm0, %v10075_v28 }
 0x434   : > { %7816 = vmatmul.mubr.msk.f32.vlgmr.msra.gmra.mrb[64].mxu0 %vm479_vm0, %v10080_v1 }
 0x435   : > { %7818 = vmatprep.mubr.msk.f32.mxu0 %vm479_vm0, %v10085_v29  ;;  %v7785_v63 = vpop.f32.mrb[32].mxu1 }
 0x436   : > { %v10148_v7 = vadd.f32 %v7785_v63, %v6567_v46  ;;  %v1831_v5 = vpop.f32.mrb[33].mxu1 }
 0x437   : > { %v1832_v51 = vadd.f32 %v6567_v46, %v1831_v5 }
 0x438   : > { %7819 = vmatmul.mubr.msk.f32.gmra.mrb[66].mxu0 %vm479_vm0, %v10090_v3 }
 0x439   : > { %7821 = vmatprep.mubr.msk.f32.mxu0 %vm479_vm0, %v10095_v35  ;;  %v7788_v40 = vpop.f32.mrb[34].mxu1 }
 0x43a   : > { %v10150_v6 = vadd.f32 %v7788_v40, %v6567_v46  ;;  %v1841_v58 = vpop.f32.mrb[35].mxu1 }
 0x43c   : > { %7822 = vmatmul.mubr.msk.f32.gmra.mrb[68].mxu0 %vm479_vm0, %v10100_v10 }
 0x43d   : > { %7824 = vmatprep.mubr.msk.f32.mxu0 %vm479_vm0, %v10105_v45 }
 0x440   : > { %7825 = vmatmul.mubr.msk.f32.gmra.mrb[70].mxu0 %vm479_vm0, %v10110_v49 }
 0x441   : > { %7827 = vmatprep.mubr.msk.f32.mxu0 %vm479_vm0, %v10115_v30 }
 0x444   : > { %7828 = vmatmul.mubr.msk.f32.gmra.mrb[72].mxu0 %vm479_vm0, %v10120_v47 }
 0x445   : > { %7830 = vmatprep.mubr.msk.f32.mxu0 %vm479_vm0, %v10125_v50 }
 0x448   : > { %7831 = vmatmul.mubr.msk.f32.gmra.mrb[74].mxu0 %vm479_vm0, %v10130_v56 }
 0x449   : > { %7833 = vmatprep.mubr.msk.f32.mxu0 %vm479_vm0, %v10135_v33 }
 0x44c   : > { %7834 = vmatmul.mubr.msk.f32.gmra.mrb[76].mxu0 %vm479_vm0, %v9669_v25  ;;  %v10153_v25 = vadd.f32 %v6567_v46, %v1841_v58 }
 0x44d   : > { %7836 = vmatprep.mubr.msk.f32.mxu0 %vm479_vm0, %v9674_v26  ;;  %v7791_v26 = vpop.f32.mrb[36].mxu1 }
 0x44e   : > { %v10155_v32 = vadd.f32 %v7791_v26, %v6567_v46 }
 0x450   : > { %7837 = vmatmul.mubr.msk.f32.gmra.mrb[78].mxu0 %vm479_vm0, %v9683_v27  ;;  %v1851_v27 = vpop.f32.mrb[37].mxu1 }
 0x451   : > { %7903 = vmatprep.mubr.msk.f32.mxu0 %vm979_vm1, %v1832_v51  ;;  %v10157_v36 = vadd.f32 %v6567_v46, %v1851_v27  ;;  %v7794_v38 = vpop.f32.mrb[38].mxu1 }
 0x452   : > { %v10159_v62 = vadd.f32 %v7794_v38, %v6567_v46  ;;  %v1861_v41 = vpop.f32.mrb[39].mxu1 }
 0x453   : > { %v10161_v4 = vadd.f32 %v6567_v46, %v1861_v41  ;;  %v7797_v34 = vpop.f32.mrb[40].mxu1 }
 0x454   : > { %v10163_v42 = vadd.f32 %v7797_v34, %v6567_v46  ;;  %v1871_v48 = vpop.f32.mrb[41].mxu1 }
 0x455   : > { %v10165_v54 = vadd.f32 %v6567_v46, %v1871_v48  ;;  %v7800_v2 = vpop.f32.mrb[42].mxu1 }
 0x456   : > { %v10167_v8 = vadd.f32 %v7800_v2, %v6567_v46  ;;  %v1881_v9 = vpop.f32.mrb[43].mxu1 }
 0x457   : > { %v10169_v53 = vadd.f32 %v6567_v46, %v1881_v9  ;;  %v7803_v11 = vpop.f32.mrb[44].mxu1 }
 0x458   : > { %v10171_v31 = vadd.f32 %v7803_v11, %v6567_v46  ;;  %v1891_v52 = vpop.f32.mrb[45].mxu1 }
 0x459   : > { %v10173_v55 = vadd.f32 %v6567_v46, %v1891_v52  ;;  %v7806_v39 = vpop.f32.mrb[46].mxu1 }
 0x45a   : > { %v10175_v57 = vadd.f32 %v7806_v39, %v6567_v46  ;;  %v1901_v13 = vpop.f32.mrb[47].mxu1 }
 0x45b   : > { %v10177_v14 = vadd.f32 %v6567_v46, %v1901_v13 }
 0x507   : > { %v7817_v16 = vpop.f32.mrb[64].mxu0 }
 0x508   : > { %v1990_v17 = vadd.f32 %v7817_v16, %v6585_v15  ;;  %v1984_v18 = vpop.f32.mrb[65].mxu0 }
 0x509   : > { %v1985_v19 = vadd.f32 %v6585_v15, %v1984_v18 }
 0x50b   : > { %v8693_v12 = vpack.c.bf16 %v1990_v17, %v1985_v19  ;;  %v7820_v20 = vpop.f32.mrb[66].mxu0 }
 0x50c   : > { %v2000_v21 = vadd.f32 %v7820_v20, %v6585_v15  ;;  %v1994_v22 = vpop.f32.mrb[67].mxu0 }
 0x50d   : > { %8695 = vmatprep.subr.msk.bf16.mxu0 %vm9712_vm2, %v8693_v12  ;;  %v1995_v23 = vadd.f32 %v6585_v15, %v1994_v22 }
 0x50e   : > { %8698 = vmatpush3.bf16.xpose.msk.msra.mxu0 %vm9712_vm2, %v8693_v12 }
 0x50f   : > { %v8699_v24 = vpack.c.bf16 %v2000_v21, %v1995_v23  ;;  %v7823_v0 = vpop.f32.mrb[68].mxu0 }
 0x510   : > { %v2010_v59 = vadd.f32 %v7823_v0, %v6585_v15  ;;  %v2004_v60 = vpop.f32.mrb[69].mxu0 }
 0x511   : > { %8701 = vmatprep.subr.msk.bf16.mxu0 %vm9712_vm2, %v8699_v24  ;;  %v2005_v61 = vadd.f32 %v6585_v15, %v2004_v60 }
 0x513   : > { %v8705_v43 = vpack.c.bf16 %v2010_v59, %v2005_v61  ;;  %v7826_v44 = vpop.f32.mrb[70].mxu0 }
 0x514   : > { %v2020_v63 = vadd.f32 %v7826_v44, %v6585_v15  ;;  %v2014_v46 = vpop.f32.mrb[71].mxu0 }
 0x515   : > { %v2015_v5 = vadd.f32 %v6585_v15, %v2014_v46 }
 0x516   : > { %8704 = vmatpush3.bf16.xpose.msk.msra.mxu0 %vm9712_vm2, %v8699_v24 }
 0x517   : > { %8707 = vmatprep.subr.msk.bf16.mxu0 %vm9712_vm2, %v8705_v43  ;;  %v8711_v51 = vpack.c.bf16 %v2020_v63, %v2015_v5  ;;  %v7829_v40 = vpop.f32.mrb[72].mxu0 }
 0x518   : > { %v2030_v58 = vadd.f32 %v7829_v40, %v6585_v15  ;;  %v2024_v26 = vpop.f32.mrb[73].mxu0 }
 0x519   : > { %v2025_v27 = vadd.f32 %v6585_v15, %v2024_v26 }
 0x51b   : > { %v8717_v38 = vpack.c.bf16 %v2030_v58, %v2025_v27  ;;  %v7832_v41 = vpop.f32.mrb[74].mxu0 }
 0x51c   : > { %v2040_v34 = vadd.f32 %v7832_v41, %v6585_v15  ;;  %v2034_v48 = vpop.f32.mrb[75].mxu0 }
 0x51d   : > { %v2035_v2 = vadd.f32 %v6585_v15, %v2034_v48 }
 0x51e   : > { %8710 = vmatpush3.bf16.xpose.msk.msra.mxu0 %vm9712_vm2, %v8705_v43 }
 0x51f   : > { %8713 = vmatprep.subr.msk.bf16.mxu0 %vm9712_vm2, %v8711_v51  ;;  %v8723_v9 = vpack.c.bf16 %v2040_v34, %v2035_v2  ;;  %v7835_v11 = vpop.f32.mrb[76].mxu0 }
 0x520   : > { %v2050_v52 = vadd.f32 %v7835_v11, %v6585_v15  ;;  %v2044_v39 = vpop.f32.mrb[77].mxu0 }
 0x521   : > { %v2045_v13 = vadd.f32 %v6585_v15, %v2044_v39 }
 0x523   : > { %v8729_v16 = vpack.c.bf16 %v2050_v52, %v2045_v13  ;;  %v7838_v17 = vpop.f32.mrb[78].mxu0  ;;  %v10346_v52 = vld [vmem:[%s11997_s2 + $0x9] ss:$0 sm:$0xff] }
 0x524   : > { %v2060_v18 = vadd.f32 %v7838_v17, %v6585_v15  ;;  %v2054_v19 = vpop.f32.mrb[79].mxu0 }
 0x525   : > { %v2055_v12 = vadd.f32 %v6585_v15, %v2054_v19 }
 0x526   : > { %8716 = vmatpush3.bf16.xpose.msk.msra.mxu0 %vm9712_vm2, %v8711_v51 }
 0x527   : > { %8719 = vmatprep.subr.msk.bf16.mxu0 %vm9712_vm2, %v8717_v38  ;;  %v8735_v20 = vpack.c.bf16 %v2060_v18, %v2055_v12 }
 0x52e   : > { %8722 = vmatpush3.bf16.xpose.msk.msra.mxu0 %vm9712_vm2, %v8717_v38 }
 0x52f   : > { %8725 = vmatprep.subr.msk.bf16.mxu0 %vm9712_vm2, %v8723_v9 }
 0x536   : > { %8728 = vmatpush3.bf16.xpose.msk.msra.mxu0 %vm9712_vm2, %v8723_v9 }
 0x537   : > { %8731 = vmatprep.subr.msk.bf16.mxu0 %vm9712_vm2, %v8729_v16 }
 0x53e   : > { %8734 = vmatpush3.bf16.xpose.msk.msra.mxu0 %vm9712_vm2, %v8729_v16 }
 0x53f   : > { %8737 = vmatprep.subr.msk.bf16.mxu0 %vm9712_vm2, %v8735_v20 }
 0x546   : > { %8740 = vmatpush3.bf16.xpose.msk.msra.mxu0 %vm9712_vm2, %v8735_v20 }
 0x54d   : > { %7904 = vmatmul.mubr.msk.f32.vlgmr.msra.gmra.mrb[80].mxu0 %vm979_vm1, %v10148_v7  ;;  %v6562_v7 = vld [vmem:[%s11996_s1 + $0x120] sm:$0xff] }
 0x54e   : > { %7906 = vmatprep.mubr.msk.f32.mxu0 %vm979_vm1, %v10153_v25  ;;  %v6564_v25 = vld [vmem:[%s11996_s1 + $0x130] sm:$0xff] }
 0x551   : > { %7907 = vmatmul.mubr.msk.f32.gmra.mrb[82].mxu0 %vm979_vm1, %v10150_v6  ;;  %v6563_v6 = vld [vmem:[%s11996_s1 + $0x128] sm:$0xff] }
 0x552   : > { %7909 = vmatprep.mubr.msk.f32.mxu0 %vm979_vm1, %v10157_v36  ;;  %v6565_v36 = vld [vmem:[%s11996_s1 + $0x138] sm:$0xff] }
 0x555   : > { %7910 = vmatmul.mubr.msk.f32.gmra.mrb[84].mxu0 %vm979_vm1, %v10155_v32  ;;  %v8685_v32 = vpack.c.bf16 %v6563_v6, %v6562_v7 }
 0x556   : > { %7912 = vmatprep.mubr.msk.f32.mxu0 %vm979_vm1, %v10161_v4  ;;  %v10281_v4 = vld [vmem:[%s9579_s14 + $0x68] sm:$0xff] }
 0x557   : > { %8686 = vmatprep.subr.bf16.mxu1 %v8685_v32 }
 0x558   : > { %8688 = vmatpush3.bf16.msra.mxu1 %v8685_v32 }
 0x559   : > { %7913 = vmatmul.mubr.msk.f32.gmra.mrb[86].mxu0 %vm979_vm1, %v10159_v62  ;;  %v8689_v62 = vpack.c.bf16 %v6565_v36, %v6564_v25 }
 0x55a   : > { %7915 = vmatprep.mubr.msk.f32.mxu0 %vm979_vm1, %v10165_v54  ;;  %v10291_v54 = vld [vmem:[%s9579_s14 + $0x78] sm:$0xff] }
 0x55b   : > { %8690 = vmatprep.subr.bf16.mxu1 %v8689_v62 }
 0x55c   : > { %8692 = vmatpush3.bf16.msra.mxu1 %v8689_v62 }
 0x55d   : > { %7916 = vmatmul.mubr.msk.f32.gmra.mrb[88].mxu0 %vm979_vm1, %v10163_v42  ;;  %v10286_v42 = vld [vmem:[%s9579_s14 + $0x70] sm:$0xff] }
 0x55e   : > { %7918 = vmatprep.mubr.msk.f32.mxu0 %vm979_vm1, %v10169_v53 }
 0x55f   : > { %7848 = vmatmul.mubr.msk.f32.vlgmr.msra.gmra.mrb[48].mxu1 %vm479_vm0, %v10080_v1 }
 0x560   : > { %7850 = vmatprep.mubr.msk.f32.mxu1 %vm479_vm0, %v10085_v29 }
 0x561   : > { %7919 = vmatmul.mubr.msk.f32.gmra.mrb[90].mxu0 %vm979_vm1, %v10167_v8 }
 0x562   : > { %7921 = vmatprep.mubr.msk.f32.mxu0 %vm979_vm1, %v10173_v55 }
 0x563   : > { %7851 = vmatmul.mubr.msk.f32.gmra.mrb[50].mxu1 %vm479_vm0, %v10090_v3 }
 0x564   : > { %7853 = vmatprep.mubr.msk.f32.mxu1 %vm479_vm0, %v10095_v35 }
 0x565   : > { %7922 = vmatmul.mubr.msk.f32.gmra.mrb[92].mxu0 %vm979_vm1, %v10171_v31 }
 0x566   : > { %7924 = vmatprep.mubr.msk.f32.mxu0 %vm979_vm1, %v10177_v14 }
 0x567   : > { %7854 = vmatmul.mubr.msk.f32.gmra.mrb[52].mxu1 %vm479_vm0, %v10100_v10 }
 0x568   : > { %7856 = vmatprep.mubr.msk.f32.mxu1 %vm479_vm0, %v10105_v45 }
 0x569   : > { %7925 = vmatmul.mubr.msk.f32.gmra.mrb[94].mxu0 %vm979_vm1, %v10175_v57 }
 0x56b   : > { %7857 = vmatmul.mubr.msk.f32.gmra.mrb[54].mxu1 %vm479_vm0, %v10110_v49 }
 0x56c   : > { %7859 = vmatprep.mubr.msk.f32.mxu1 %vm479_vm0, %v10115_v30 }
 0x56f   : > { %7860 = vmatmul.mubr.msk.f32.gmra.mrb[56].mxu1 %vm479_vm0, %v10120_v47 }
 0x570   : > { %7862 = vmatprep.mubr.msk.f32.mxu1 %vm479_vm0, %v10125_v50 }
 0x573   : > { %7863 = vmatmul.mubr.msk.f32.gmra.mrb[58].mxu1 %vm479_vm0, %v10130_v56 }
 0x574   : > { %7865 = vmatprep.mubr.msk.f32.mxu1 %vm479_vm0, %v10135_v33 }
 0x577   : > { %7866 = vmatmul.mubr.msk.f32.gmra.mrb[60].mxu1 %vm479_vm0, %v10281_v4 }
 0x578   : > { %7868 = vmatprep.mubr.msk.f32.mxu1 %vm479_vm0, %v10286_v42 }
 0x57b   : > { %7869 = vmatmul.mubr.msk.f32.gmra.mrb[62].mxu1 %vm479_vm0, %v10291_v54 }
 0x620   : > { %v7905_v8 = vpop.f32.mrb[80].mxu0 }
 0x621   : > { %v10295_v53 = vmul.f32 0.35355338, %v7905_v8  ;;  %v2378_v31 = vpop.f32.mrb[81].mxu0 }
 0x622   : > { %v10297_v55 = vmul.f32 0.35355338, %v2378_v31 }
 0x623   : > { %2475 = vmax.xlane.f32.xlu1 %v10295_v53 }
 0x624   : > { %2473 = vmax.xlane.f32.xlu0 %v10297_v55  ;;  %v7908_v57 = vpop.f32.mrb[82].mxu0 }
 0x625   : > { %v10301_v14 = vmul.f32 0.35355338, %v7908_v57  ;;  %v2388_v15 = vpop.f32.mrb[83].mxu0 }
 0x626   : > { %v10303_v21 = vmul.f32 0.35355338, %v2388_v15 }
 0x627   : > { %2479 = vmax.xlane.f32.xlu1 %v10301_v14 }
 0x628   : > { %2477 = vmax.xlane.f32.xlu0 %v10303_v21  ;;  %v7911_v22 = vpop.f32.mrb[84].mxu0 }
 0x629   : > { %v10307_v23 = vmul.f32 0.35355338, %v7911_v22  ;;  %v2398_v24 = vpop.f32.mrb[85].mxu0 }
 0x62a   : > { %v10309_v0 = vmul.f32 0.35355338, %v2398_v24 }
 0x62b   : > { %2483 = vmax.xlane.f32.xlu1 %v10307_v23 }
 0x62c   : > { %2481 = vmax.xlane.f32.xlu0 %v10309_v0  ;;  %v7914_v59 = vpop.f32.mrb[86].mxu0 }
 0x62d   : > { %v10313_v60 = vmul.f32 0.35355338, %v7914_v59  ;;  %v2408_v61 = vpop.f32.mrb[87].mxu0 }
 0x62e   : > { %v10315_v43 = vmul.f32 0.35355338, %v2408_v61 }
 0x62f   : > { %2487 = vmax.xlane.f32.xlu1 %v10313_v60 }
 0x630   : > { %2485 = vmax.xlane.f32.xlu0 %v10315_v43  ;;  %v7917_v44 = vpop.f32.mrb[88].mxu0 }
 0x631   : > { %v10319_v63 = vmul.f32 0.35355338, %v7917_v44  ;;  %v2418_v46 = vpop.f32.mrb[89].mxu0 }
 0x632   : > { %v10321_v5 = vmul.f32 0.35355338, %v2418_v46  ;;  %v7849_v39 = vpop.f32.mrb[48].mxu1 }
 0x633   : > { %2491 = vmax.xlane.f32.xlu1 %v10319_v63  ;;  %v2143_v13 = vadd.f32 %v7849_v39, %v10346_v52  ;;  %v2137_v16 = vpop.f32.mrb[49].mxu1 }
 0x634   : > { %2489 = vmax.xlane.f32.xlu0 %v10321_v5  ;;  %v7920_v51 = vpop.f32.mrb[90].mxu0  ;;  %v2138_v17 = vadd.f32 %v10346_v52, %v2137_v16 }
 0x635   : > { %v10325_v40 = vmul.f32 0.35355338, %v7920_v51  ;;  %v2428_v58 = vpop.f32.mrb[91].mxu0 }
 0x636   : > { %v10327_v26 = vmul.f32 0.35355338, %v2428_v58  ;;  %v8741_v18 = vpack.c.bf16 %v2143_v13, %v2138_v17  ;;  %v7852_v19 = vpop.f32.mrb[50].mxu1 }
 0x637   : > { %2495 = vmax.xlane.f32.xlu1 %v10325_v40  ;;  %v2153_v12 = vadd.f32 %v7852_v19, %v10346_v52  ;;  %v2147_v20 = vpop.f32.mrb[51].mxu1 }
 0x638   : > { %2493 = vmax.xlane.f32.xlu0 %v10327_v26  ;;  %v7923_v27 = vpop.f32.mrb[92].mxu0  ;;  %v2148_v7 = vadd.f32 %v10346_v52, %v2147_v20  ;;  %8742 = vmatprep.subr.bf16.mxu1 %v8741_v18 }
 0x639   : > { %v10331_v38 = vmul.f32 0.35355338, %v7923_v27  ;;  %v2438_v41 = vpop.f32.mrb[93].mxu0  ;;  %8744 = vmatpush3.bf16.msra.mxu1 %v8741_v18 }
 0x63a   : > { %v10333_v34 = vmul.f32 0.35355338, %v2438_v41  ;;  %v8745_v6 = vpack.c.bf16 %v2153_v12, %v2148_v7  ;;  %v7855_v25 = vpop.f32.mrb[52].mxu1 }
 0x63b   : > { %2499 = vmax.xlane.f32.xlu1 %v10331_v38  ;;  %v2163_v32 = vadd.f32 %v7855_v25, %v10346_v52  ;;  %v2157_v36 = vpop.f32.mrb[53].mxu1 }
 0x63c   : > { %2497 = vmax.xlane.f32.xlu0 %v10333_v34  ;;  %v7926_v48 = vpop.f32.mrb[94].mxu0  ;;  %v2158_v62 = vadd.f32 %v10346_v52, %v2157_v36  ;;  %8746 = vmatprep.subr.bf16.mxu1 %v8745_v6 }
 0x63d   : > { %v10337_v2 = vmul.f32 0.35355338, %v7926_v48  ;;  %v2448_v9 = vpop.f32.mrb[95].mxu0  ;;  %8748 = vmatpush3.bf16.msra.mxu1 %v8745_v6 }
 0x63e   : > { %v10339_v11 = vmul.f32 0.35355338, %v2448_v9  ;;  %v8749_v8 = vpack.c.bf16 %v2163_v32, %v2158_v62  ;;  %v7858_v31 = vpop.f32.mrb[54].mxu1 }
 0x63f   : > { %2503 = vmax.xlane.f32.xlu1 %v10337_v2  ;;  %v2173_v57 = vadd.f32 %v7858_v31, %v10346_v52  ;;  %v2167_v15 = vpop.f32.mrb[55].mxu1 }
 0x640   : > { %2501 = vmax.xlane.f32.xlu0 %v10339_v11  ;;  %v2168_v22 = vadd.f32 %v10346_v52, %v2167_v15  ;;  %8750 = vmatprep.subr.bf16.mxu1 %v8749_v8 }
 0x641   : > { %8752 = vmatpush3.bf16.msra.mxu1 %v8749_v8 }
 0x642   : > { %v8753_v24 = vpack.c.bf16 %v2173_v57, %v2168_v22  ;;  %v7861_v59 = vpop.f32.mrb[56].mxu1 }
 0x643   : > { %v2183_v61 = vadd.f32 %v7861_v59, %v10346_v52  ;;  %v2177_v44 = vpop.f32.mrb[57].mxu1 }
 0x644   : > { %v2178_v51 = vadd.f32 %v10346_v52, %v2177_v44  ;;  %8754 = vmatprep.subr.bf16.mxu1 %v8753_v24 }
 0x645   : > { %8756 = vmatpush3.bf16.msra.mxu1 %v8753_v24 }
 0x646   : > { %v8757_v48 = vpack.c.bf16 %v2183_v61, %v2178_v51  ;;  %v7864_v9 = vpop.f32.mrb[58].mxu1 }
 0x647   : > { %v2193_v13 = vadd.f32 %v7864_v9, %v10346_v52  ;;  %v2187_v16 = vpop.f32.mrb[59].mxu1 }
 0x648   : > { %v2188_v19 = vadd.f32 %v10346_v52, %v2187_v16  ;;  %8758 = vmatprep.subr.bf16.mxu1 %v8757_v48 }
 0x649   : > { %8760 = vmatpush3.bf16.msra.mxu1 %v8757_v48 }
 0x64a   : > { %v7867_v7 = vpop.f32.mrb[60].mxu1 }
 0x64b   : > { %v2203_v25 = vadd.f32 %v7867_v7, %v10346_v52  ;;  %v2197_v32 = vpop.f32.mrb[61].mxu1 }
 0x64c   : > { %v2198_v8 = vadd.f32 %v10346_v52, %v2197_v32 }
 0x6b0   : > { %v2476_v46 = vpop.xlane.xlu1 %2475 }
 0x6b1   : > { %v2506_v58 = vsub.f32 %v10295_v53, %v2476_v46  ;;  %v2474_v27 = vpop.xlane.xlu0 %2473 }
 0x6b2   : > { %v2505_v41 = vsub.f32 %v10297_v55, %v2474_v27  ;;  %v8761_v55 = vpack.c.bf16 %v2193_v13, %v2188_v19 }
 0x6b3   : > { %v2523_v39 = vmul.f32 1.442695, %v2506_v58 }
 0x6b4   : > { %v2521_v17 = vmul.f32 1.442695, %v2505_v41  ;;  %v2480_v18 = vpop.xlane.xlu1 %2479  ;;  %8762 = vmatprep.subr.bf16.mxu1 %v8761_v55 }
 0x6b5   : > { %9157 = vpow2.f32 %v2523_v39  ;;  %v2508_v12 = vsub.f32 %v10301_v14, %v2480_v18  ;;  %v2478_v20 = vpop.xlane.xlu0 %2477  ;;  %8764 = vmatpush3.bf16.msra.mxu1 %v8761_v55 }
 0x6b6   : > { %9159 = vpow2.f32 %v2521_v17  ;;  %v2507_v53 = vsub.f32 %v10303_v21, %v2478_v20  ;;  %v8765_v21 = vpack.c.bf16 %v2203_v25, %v2198_v8 }
 0x6b7   : > { %v2527_v6 = vmul.f32 1.442695, %v2508_v12 }
 0x6b8   : > { %v2525_v36 = vmul.f32 1.442695, %v2507_v53  ;;  %v2484_v62 = vpop.xlane.xlu1 %2483  ;;  %8766 = vmatprep.subr.bf16.mxu1 %v8765_v21 }
 0x6b9   : > { %9161 = vpow2.f32 %v2527_v6  ;;  %v2510_v31 = vsub.f32 %v10307_v23, %v2484_v62  ;;  %v2482_v14 = vpop.xlane.xlu0 %2481  ;;  %8768 = vmatpush3.bf16.msra.mxu1 %v8765_v21 }
 0x6ba   : > { %9163 = vpow2.f32 %v2525_v36  ;;  %v2509_v57 = vsub.f32 %v10309_v0, %v2482_v14 }
 0x6bb   : > { %v2531_v15 = vmul.f32 1.442695, %v2510_v31  ;;  %v7870_v31 = vpop.f32.mrb[62].mxu1 }
 0x6bc   : > { %v2529_v22 = vmul.f32 1.442695, %v2509_v57  ;;  %v2488_v24 = vpop.xlane.xlu1 %2487  ;;  %v2213_v21 = vadd.f32 %v7870_v31, %v10346_v52 }
 0x6bd   : > { %9165 = vpow2.f32 %v2531_v15  ;;  %v2512_v59 = vsub.f32 %v10313_v60, %v2488_v24  ;;  %v2486_v61 = vpop.xlane.xlu0 %2485  ;;  %v2207_v15 = vpop.f32.mrb[63].mxu1 }
 0x6be   : > { %9167 = vpow2.f32 %v2529_v22  ;;  %v2511_v44 = vsub.f32 %v10315_v43, %v2486_v61 }
 0x6bf   : > { %v10370_v46 = vpop.eup %9157  ;;  %v2535_v23 = vmul.f32 1.442695, %v2512_v59 }
 0x6c0   : > { %v10372_v51 = vpop.eup %9159  ;;  %v2533_v58 = vmul.f32 1.442695, %v2511_v44  ;;  %v2492_v0 = vpop.xlane.xlu1 %2491  ;;  %2555 = vadd.xlane.f32.xlu1 %v10370_v46 }
 0x6c1   : > { %9169 = vpow2.f32 %v2535_v23  ;;  %v2514_v27 = vsub.f32 %v10319_v63, %v2492_v0  ;;  %v2490_v41 = vpop.xlane.xlu0 %2489  ;;  %2553 = vadd.xlane.f32.xlu0 %v10372_v51  ;;  %v6669_v23 = vld [vmem:[%s11996_s1 + $0x40] sm:$0xff] }
 0x6c2   : > { %9171 = vpow2.f32 %v2533_v58  ;;  %v2513_v60 = vsub.f32 %v10321_v5, %v2490_v41  ;;  %v6670_v58 = vld [vmem:[%s11996_s1 + $0x48] sm:$0xff] }
 0x6c3   : > { %v10378_v48 = vpop.eup %9161  ;;  %v2539_v43 = vmul.f32 1.442695, %v2514_v27  ;;  %v8773_v0 = vpack.c.bf16 %v6670_v58, %v6669_v23 }
 0x6c4   : > { %v10380_v9 = vpop.eup %9163  ;;  %v2537_v39 = vmul.f32 1.442695, %v2513_v60  ;;  %v2496_v13 = vpop.xlane.xlu1 %2495  ;;  %2559 = vadd.xlane.f32.xlu1 %v10378_v48 }
 0x6c5   : > { %9173 = vpow2.f32 %v2539_v43  ;;  %v2516_v16 = vsub.f32 %v10325_v40, %v2496_v13  ;;  %v2494_v17 = vpop.xlane.xlu0 %2493  ;;  %2557 = vadd.xlane.f32.xlu0 %v10380_v9 }
 0x6c6   : > { %9175 = vpow2.f32 %v2537_v39  ;;  %v2515_v63 = vsub.f32 %v10327_v26, %v2494_v17  ;;  %v6671_v17 = vld [vmem:[%s11996_s1 + $0x50] sm:$0xff] }
 0x6c7   : > { %v10386_v18 = vpop.eup %9165  ;;  %v2543_v5 = vmul.f32 1.442695, %v2516_v16 }
 0x6c8   : > { %v10388_v19 = vpop.eup %9167  ;;  %v2541_v12 = vmul.f32 1.442695, %v2515_v63  ;;  %v2500_v20 = vpop.xlane.xlu1 %2499  ;;  %2563 = vadd.xlane.f32.xlu1 %v10386_v18  ;;  %v6672_v63 = vld [vmem:[%s11996_s1 + $0x58] sm:$0xff] }
 0x6c9   : > { %9177 = vpow2.f32 %v2543_v5  ;;  %v2518_v53 = vsub.f32 %v10331_v38, %v2500_v20  ;;  %v2498_v55 = vpop.xlane.xlu0 %2497  ;;  %2561 = vadd.xlane.f32.xlu0 %v10388_v19 }
 0x6ca   : > { %9179 = vpow2.f32 %v2541_v12  ;;  %v2517_v40 = vsub.f32 %v10333_v34, %v2498_v55 }
 0x6cb   : > { %v10394_v7 = vpop.eup %9169  ;;  %v2547_v26 = vmul.f32 1.442695, %v2518_v53 }
 0x6cc   : > { %v10396_v6 = vpop.eup %9171  ;;  %v2545_v25 = vmul.f32 1.442695, %v2517_v40  ;;  %2567 = vadd.xlane.f32.xlu1 %v10394_v7  ;;  %v2504_v32 = vpop.xlane.xlu1 %2503  ;;  %v8777_v40 = vpack.c.bf16 %v6672_v63, %v6671_v17 }
 0x6cd   : > { %9181 = vpow2.f32 %v2547_v26  ;;  %v2520_v36 = vsub.f32 %v10337_v2, %v2504_v32  ;;  %2565 = vadd.xlane.f32.xlu0 %v10396_v6  ;;  %v2502_v38 = vpop.xlane.xlu0 %2501  ;;  %v2208_v2 = vadd.f32 %v10346_v52, %v2207_v15  ;;  %v6674_v32 = vld [vmem:[%s11996_s1 + $0xc8] sm:$0xff] }
 0x6ce   : > { %9183 = vpow2.f32 %v2545_v25  ;;  %v2519_v62 = vsub.f32 %v10339_v11, %v2502_v38  ;;  %v6673_v25 = vld [vmem:[%s11996_s1 + $0xc0] sm:$0xff] }
 0x6cf   : > { %v10402_v8 = vpop.eup %9173  ;;  %v2551_v34 = vmul.f32 1.442695, %v2520_v36  ;;  %v8769_v11 = vpack.c.bf16 %v2213_v21, %v2208_v2 }
 0x6d0   : > { %v10404_v14 = vpop.eup %9175  ;;  %v2549_v57 = vmul.f32 1.442695, %v2519_v62  ;;  %2571 = vadd.xlane.f32.xlu1 %v10402_v8 }
 0x6d1   : > { %9185 = vpow2.f32 %v2551_v34  ;;  %2569 = vadd.xlane.f32.xlu0 %v10404_v14  ;;  %8770 = vmatprep.subr.bf16.mxu1 %v8769_v11  ;;  %v8781_v34 = vpack.c.bf16 %v6674_v32, %v6673_v25  ;;  %v10555_v25 = vld [vmem:[%s9579_s14] sm:$0xff] }
 0x6d2   : > { %9187 = vpow2.f32 %v2549_v57  ;;  %8772 = vmatpush3.bf16.msra.mxu1 %v8769_v11 }
 0x6d3   : > { %v10410_v22 = vpop.eup %9177  ;;  %8774 = vmatprep.subr.bf16.mxu1 %v8773_v0 }
 0x6d4   : > { %v10412_v24 = vpop.eup %9179  ;;  %2575 = vadd.xlane.f32.xlu1 %v10410_v22 }
 0x6d5   : > { %2573 = vadd.xlane.f32.xlu0 %v10412_v24 }
 0x6d7   : > { %v10416_v59 = vpop.eup %9181 }
 0x6d8   : > { %v10418_v61 = vpop.eup %9183  ;;  %2579 = vadd.xlane.f32.xlu1 %v10416_v59 }
 0x6d9   : > { %2577 = vadd.xlane.f32.xlu0 %v10418_v61 }
 0x6db   : > { %v10422_v52 = vpop.eup %9185 }
 0x6dc   : > { %v10424_v44 = vpop.eup %9187  ;;  %2583 = vadd.xlane.f32.xlu1 %v10422_v52 }
 0x6dd   : > { %2581 = vadd.xlane.f32.xlu0 %v10424_v44 }
 0x74d   : > { %v2556_v27 = vpop.xlane.xlu1 %2555 }
 0x74e   : > { %9189 = vrcp.f32 %v2556_v27  ;;  %v2554_v41 = vpop.xlane.xlu0 %2553 }
 0x74f   : > { %9191 = vrcp.f32 %v2554_v41 }
 0x751   : > { %v2560_v60 = vpop.xlane.xlu1 %2559 }
 0x752   : > { %9193 = vrcp.f32 %v2560_v60  ;;  %v2558_v43 = vpop.xlane.xlu0 %2557 }
 0x753   : > { %9195 = vrcp.f32 %v2558_v43 }
 0x755   : > { %v2564_v39 = vpop.xlane.xlu1 %2563 }
 0x756   : > { %9197 = vrcp.f32 %v2564_v39  ;;  %v2562_v13 = vpop.xlane.xlu0 %2561 }
 0x757   : > { %9199 = vrcp.f32 %v2562_v13 }
 0x758   : > { %v9190_v16 = vpop.eup %9189 }
 0x759   : > { %v9192_v5 = vpop.eup %9191  ;;  %v2568_v12 = vpop.xlane.xlu1 %2567  ;;  %v2588_v55 = vmul.f32 %v9190_v16, %v10370_v46 }
 0x75a   : > { %9201 = vrcp.f32 %v2568_v12  ;;  %v2566_v20 = vpop.xlane.xlu0 %2565  ;;  %v2586_v53 = vmul.f32 %v9192_v5, %v10372_v51 }
 0x75b   : > { %9203 = vrcp.f32 %v2566_v20 }
 0x75c   : > { %v9194_v26 = vpop.eup %9193  ;;  %7959 = vmatprep.mubr.f32.mxu1 %v2586_v53 }
 0x75d   : > { %v9196_v36 = vpop.eup %9195  ;;  %v2572_v38 = vpop.xlane.xlu1 %2571  ;;  %7960 = vmatmul.mubr.f32.vlgmr.msra.gmra.mrb[64].mxu1 %v2588_v55  ;;  %v2592_v46 = vmul.f32 %v9194_v26, %v10378_v48 }
 0x75e   : > { %9205 = vrcp.f32 %v2572_v38  ;;  %8776 = vmatpush3.bf16.msra.mxu1 %v8773_v0  ;;  %v2570_v51 = vpop.xlane.xlu0 %2569  ;;  %v2590_v62 = vmul.f32 %v9196_v36, %v10380_v9 }
 0x75f   : > { %9207 = vrcp.f32 %v2570_v51  ;;  %8778 = vmatprep.subr.bf16.mxu1 %v8777_v40 }
 0x760   : > { %v9198_v31 = vpop.eup %9197  ;;  %7962 = vmatprep.mubr.f32.mxu1 %v2590_v62 }
 0x761   : > { %v9200_v57 = vpop.eup %9199  ;;  %v2576_v21 = vpop.xlane.xlu1 %2575  ;;  %7963 = vmatmul.mubr.f32.gmra.mrb[66].mxu1 %v2592_v46  ;;  %v2596_v11 = vmul.f32 %v9198_v31, %v10386_v18 }
 0x762   : > { %9209 = vrcp.f32 %v2576_v21  ;;  %v2574_v15 = vpop.xlane.xlu0 %2573  ;;  %v2594_v2 = vmul.f32 %v9200_v57, %v10388_v19  ;;  %8780 = vmatpush3.bf16.msra.mxu1 %v8777_v40  ;;  %v6682_v40 = vld [vmem:[%s11997_s2 + $0x2] ss:$0 sm:$0xff] }
 0x763   : > { %9211 = vrcp.f32 %v2574_v15  ;;  %8782 = vmatprep.subr.bf16.mxu1 %v8781_v34 }
 0x764   : > { %v9202_v9 = vpop.eup %9201  ;;  %7965 = vmatprep.mubr.f32.mxu1 %v2594_v2 }
 0x765   : > { %v9204_v23 = vpop.eup %9203  ;;  %v2580_v48 = vpop.xlane.xlu1 %2579  ;;  %7966 = vmatmul.mubr.f32.gmra.mrb[68].mxu1 %v2596_v11  ;;  %v2600_v27 = vmul.f32 %v9202_v9, %v10394_v7 }
 0x766   : > { %9213 = vrcp.f32 %v2580_v48  ;;  %v2578_v58 = vpop.xlane.xlu0 %2577  ;;  %v2598_v0 = vmul.f32 %v9204_v23, %v10396_v6 }
 0x767   : > { %9215 = vrcp.f32 %v2578_v58 }
 0x768   : > { %v9206_v41 = vpop.eup %9205  ;;  %7968 = vmatprep.mubr.f32.mxu1 %v2598_v0 }
 0x769   : > { %v9208_v19 = vpop.eup %9207  ;;  %v2584_v60 = vpop.xlane.xlu1 %2583  ;;  %7969 = vmatmul.mubr.f32.gmra.mrb[70].mxu1 %v2600_v27  ;;  %v2604_v39 = vmul.f32 %v9206_v41, %v10402_v8 }
 0x76a   : > { %9217 = vrcp.f32 %v2584_v60  ;;  %v2582_v18 = vpop.xlane.xlu0 %2581  ;;  %v2602_v43 = vmul.f32 %v9208_v19, %v10404_v14 }
 0x76b   : > { %9219 = vrcp.f32 %v2582_v18 }
 0x76c   : > { %v9210_v13 = vpop.eup %9209  ;;  %7971 = vmatprep.mubr.f32.mxu1 %v2602_v43 }
 0x76d   : > { %v9212_v16 = vpop.eup %9211  ;;  %7972 = vmatmul.mubr.f32.gmra.mrb[72].mxu1 %v2604_v39  ;;  %v2608_v7 = vmul.f32 %v9210_v13, %v10410_v22  ;;  %v6675_v22 = vld [vmem:[%s11996_s1 + $0xd0] sm:$0xff] }
 0x76e   : > { %v2606_v6 = vmul.f32 %v9212_v16, %v10412_v24  ;;  %v6676_v24 = vld [vmem:[%s11996_s1 + $0xd8] sm:$0xff] }
 0x770   : > { %v9214_v17 = vpop.eup %9213  ;;  %7974 = vmatprep.mubr.f32.mxu1 %v2606_v6 }
 0x771   : > { %v9216_v63 = vpop.eup %9215  ;;  %7975 = vmatmul.mubr.f32.gmra.mrb[74].mxu1 %v2608_v7  ;;  %v2612_v12 = vmul.f32 %v9214_v17, %v10416_v59  ;;  %v8785_v59 = vpack.c.bf16 %v6676_v24, %v6675_v22 }
 0x772   : > { %v2610_v5 = vmul.f32 %v9216_v63, %v10418_v61 }
 0x774   : > { %v9218_v14 = vpop.eup %9217  ;;  %7977 = vmatprep.mubr.f32.mxu1 %v2610_v5  ;;  %v6700_v5 = vld [vmem:[%s11997_s2 + $0x6] ss:$0 sm:$0xff] }
 0x775   : > { %v9220_v20 = vpop.eup %9219  ;;  %7978 = vmatmul.mubr.f32.gmra.mrb[76].mxu1 %v2612_v12  ;;  %v2616_v53 = vmul.f32 %v9218_v14, %v10422_v52 }
 0x776   : > { %v2614_v8 = vmul.f32 %v9220_v20, %v10424_v44 }
 0x778   : > { %7980 = vmatprep.mubr.f32.mxu1 %v2614_v8 }
 0x779   : > { %7981 = vmatmul.mubr.f32.gmra.mrb[78].mxu1 %v2616_v53 }
 0x77a   : > { %8017 = vmatprep.mubr.msk.f32.mxu1 %vm479_vm0, %v10075_v28 }
 0x77d   : > { %8018 = vmatmul.mubr.msk.f32.vlgmr.msra.gmra.mrb[80].mxu1 %vm479_vm0, %v10080_v1 }
 0x77e   : > { %8784 = vmatpush3.bf16.msra.mxu1 %v8781_v34  ;;  %8020 = vmatprep.mubr.msk.f32.mxu1 %vm479_vm0, %v10085_v29 }
 0x77f   : > { %8786 = vmatprep.subr.bf16.mxu1 %v8785_v59 }
 0x781   : > { %8021 = vmatmul.mubr.msk.f32.gmra.mrb[82].mxu1 %vm479_vm0, %v10090_v3 }
 0x782   : > { %8023 = vmatprep.mubr.msk.f32.mxu1 %vm479_vm0, %v10095_v35  ;;  %8788 = vmatpush3.bf16.msra.mxu1 %v8785_v59 }
 0x785   : > { %8024 = vmatmul.mubr.msk.f32.gmra.mrb[84].mxu1 %vm479_vm0, %v10100_v10 }
 0x786   : > { %8026 = vmatprep.mubr.msk.f32.mxu1 %vm479_vm0, %v10105_v45 }
 0x789   : > { %8027 = vmatmul.mubr.msk.f32.gmra.mrb[86].mxu1 %vm479_vm0, %v10110_v49 }
 0x78a   : > { %8029 = vmatprep.mubr.msk.f32.mxu1 %vm479_vm0, %v10115_v30 }
 0x78d   : > { %8030 = vmatmul.mubr.msk.f32.gmra.mrb[88].mxu1 %vm479_vm0, %v10120_v47 }
 0x78e   : > { %8032 = vmatprep.mubr.msk.f32.mxu1 %vm479_vm0, %v10125_v50 }
 0x791   : > { %8033 = vmatmul.mubr.msk.f32.gmra.mrb[90].mxu1 %vm479_vm0, %v10130_v56 }
 0x792   : > { %8035 = vmatprep.mubr.msk.f32.mxu1 %vm479_vm0, %v10135_v33 }
 0x795   : > { %8036 = vmatmul.mubr.msk.f32.gmra.mrb[92].mxu1 %vm479_vm0, %v10281_v4 }
 0x796   : > { %8038 = vmatprep.mubr.msk.f32.mxu1 %vm479_vm0, %v10286_v42 }
 0x799   : > { %8039 = vmatmul.mubr.msk.f32.gmra.mrb[94].mxu1 %vm479_vm0, %v10291_v54 }
 0x79a   : > { %8049 = vmatprep.mubr.msk.f32.mxu1 %vm479_vm0, %v10075_v28  ;;  %v6652_v28 = vld [vmem:[%s11998_s3 + $0x8] sm:$0xff] }
 0x79b   : > { %7983 = vmatprep.subr.mxu0 %v6652_v28 }
 0x79c   : > { %7984 = vmatpush3.msra.mxu0 %v6652_v28 }
 0x79d   : > { %8050 = vmatmul.mubr.msk.f32.vlgmr.msra.gmra.mrb[96].mxu1 %vm479_vm0, %v10080_v1 }
 0x79e   : > { %8052 = vmatprep.mubr.msk.f32.mxu1 %vm479_vm0, %v10085_v29 }
 0x7a1   : > { %8053 = vmatmul.mubr.msk.f32.gmra.mrb[98].mxu1 %vm479_vm0, %v10090_v3 }
 0x7a2   : > { %8055 = vmatprep.mubr.msk.f32.mxu1 %vm479_vm0, %v10095_v35 }
 0x7a5   : > { %8056 = vmatmul.mubr.msk.f32.gmra.mrb[100].mxu1 %vm479_vm0, %v10100_v10 }
 0x7a6   : > { %8058 = vmatprep.mubr.msk.f32.mxu1 %vm479_vm0, %v10105_v45 }
 0x7a9   : > { %8059 = vmatmul.mubr.msk.f32.gmra.mrb[102].mxu1 %vm479_vm0, %v10110_v49 }
 0x7aa   : > { %8061 = vmatprep.mubr.msk.f32.mxu1 %vm479_vm0, %v10115_v30 }
 0x7ad   : > { %8062 = vmatmul.mubr.msk.f32.gmra.mrb[104].mxu1 %vm479_vm0, %v10120_v47 }
 0x7ae   : > { %8064 = vmatprep.mubr.msk.f32.mxu1 %vm479_vm0, %v10125_v50 }
 0x7b1   : > { %8065 = vmatmul.mubr.msk.f32.gmra.mrb[106].mxu1 %vm479_vm0, %v10130_v56 }
 0x7b2   : > { %8067 = vmatprep.mubr.msk.f32.mxu1 %vm479_vm0, %v10135_v33 }
 0x7b5   : > { %8068 = vmatmul.mubr.msk.f32.gmra.mrb[108].mxu1 %vm479_vm0, %v10281_v4 }
 0x7b6   : > { %8070 = vmatprep.mubr.msk.f32.mxu1 %vm479_vm0, %v10286_v42 }
 0x7b9   : > { %8071 = vmatmul.mubr.msk.f32.gmra.mrb[110].mxu1 %vm479_vm0, %v10291_v54 }
 0x830   : > { %v7961_v1 = vpop.f32.mrb[64].mxu1 }
 0x831   : > { %v2683_v29 = vpop.f32.mrb[65].mxu1 }
 0x832   : > { %7985 = vmatprep.mubr.msk.f32.mxu0 %vm979_vm1, %v2683_v29 }
 0x833   : > { %7986 = vmatmul.mubr.msk.f32.vlgmr.msra.gmra.mrb[48].mxu0 %vm979_vm1, %v7961_v1 }
 0x834   : > { %v7964_v3 = vpop.f32.mrb[66].mxu1 }
 0x835   : > { %v2693_v35 = vpop.f32.mrb[67].mxu1 }
 0x836   : > { %7988 = vmatprep.mubr.msk.f32.mxu0 %vm979_vm1, %v2693_v35 }
 0x837   : > { %7989 = vmatmul.mubr.msk.f32.gmra.mrb[50].mxu0 %vm979_vm1, %v7964_v3 }
 0x838   : > { %v7967_v10 = vpop.f32.mrb[68].mxu1 }
 0x839   : > { %v2703_v45 = vpop.f32.mrb[69].mxu1 }
 0x83a   : > { %7991 = vmatprep.mubr.msk.f32.mxu0 %vm979_vm1, %v2703_v45 }
 0x83b   : > { %7992 = vmatmul.mubr.msk.f32.gmra.mrb[52].mxu0 %vm979_vm1, %v7967_v10 }
 0x83c   : > { %v7970_v49 = vpop.f32.mrb[70].mxu1 }
 0x83d   : > { %v2713_v30 = vpop.f32.mrb[71].mxu1 }
 0x83e   : > { %7994 = vmatprep.mubr.msk.f32.mxu0 %vm979_vm1, %v2713_v30 }
 0x83f   : > { %7995 = vmatmul.mubr.msk.f32.gmra.mrb[54].mxu0 %vm979_vm1, %v7970_v49 }
 0x840   : > { %v7973_v47 = vpop.f32.mrb[72].mxu1 }
 0x841   : > { %v2723_v50 = vpop.f32.mrb[73].mxu1 }
 0x842   : > { %7997 = vmatprep.mubr.msk.f32.mxu0 %vm979_vm1, %v2723_v50 }
 0x843   : > { %7998 = vmatmul.mubr.msk.f32.gmra.mrb[56].mxu0 %vm979_vm1, %v7973_v47 }
 0x844   : > { %v7976_v56 = vpop.f32.mrb[74].mxu1 }
 0x845   : > { %v2733_v33 = vpop.f32.mrb[75].mxu1 }
 0x846   : > { %8000 = vmatprep.mubr.msk.f32.mxu0 %vm979_vm1, %v2733_v33 }
 0x847   : > { %8001 = vmatmul.mubr.msk.f32.gmra.mrb[58].mxu0 %vm979_vm1, %v7976_v56 }
 0x848   : > { %v7979_v61 = vpop.f32.mrb[76].mxu1 }
 0x849   : > { %v2743_v52 = vpop.f32.mrb[77].mxu1 }
 0x84a   : > { %8003 = vmatprep.mubr.msk.f32.mxu0 %vm979_vm1, %v2743_v52 }
 0x84b   : > { %8004 = vmatmul.mubr.msk.f32.gmra.mrb[60].mxu0 %vm979_vm1, %v7979_v61 }
 0x84c   : > { %v7982_v44 = vpop.f32.mrb[78].mxu1 }
 0x84d   : > { %v2753_v55 = vpop.f32.mrb[79].mxu1 }
 0x84e   : > { %8006 = vmatprep.mubr.msk.f32.mxu0 %vm979_vm1, %v2753_v55 }
 0x84f   : > { %8007 = vmatmul.mubr.msk.f32.gmra.mrb[62].mxu0 %vm979_vm1, %v7982_v44 }
 0x850   : > { %v8019_v26 = vpop.f32.mrb[80].mxu1  ;;  %8081 = vmatprep.mubr.msk.f32.mxu0 %vm479_vm0, %v10555_v25 }
 0x851   : > { %v10559_v32 = vadd.f32 %v8019_v26, %v6682_v40  ;;  %v3062_v36 = vpop.f32.mrb[81].mxu1 }
 0x852   : > { %v3063_v38 = vadd.f32 %v6682_v40, %v3062_v36 }
 0x854   : > { %v8022_v51 = vpop.f32.mrb[82].mxu1  ;;  %8137 = vmatprep.mubr.msk.f32.mxu1 %vm979_vm1, %v3063_v38 }
 0x855   : > { %v10562_v62 = vadd.f32 %v8022_v51, %v6682_v40  ;;  %v3072_v46 = vpop.f32.mrb[83].mxu1 }
 0x856   : > { %v10564_v34 = vadd.f32 %v6682_v40, %v3072_v46 }
 0x858   : > { %v8025_v31 = vpop.f32.mrb[84].mxu1 }
 0x859   : > { %v10566_v57 = vadd.f32 %v8025_v31, %v6682_v40  ;;  %v3082_v21 = vpop.f32.mrb[85].mxu1 }
 0x85a   : > { %v10568_v15 = vadd.f32 %v6682_v40, %v3082_v21 }
 0x85c   : > { %v8028_v2 = vpop.f32.mrb[86].mxu1 }
 0x85d   : > { %v10570_v11 = vadd.f32 %v8028_v2, %v6682_v40  ;;  %v3092_v9 = vpop.f32.mrb[87].mxu1 }
 0x85e   : > { %v10572_v23 = vadd.f32 %v6682_v40, %v3092_v9 }
 0x860   : > { %v8031_v48 = vpop.f32.mrb[88].mxu1 }
 0x861   : > { %v10574_v58 = vadd.f32 %v8031_v48, %v6682_v40  ;;  %v3102_v0 = vpop.f32.mrb[89].mxu1 }
 0x862   : > { %v10576_v27 = vadd.f32 %v6682_v40, %v3102_v0 }
 0x864   : > { %v8034_v41 = vpop.f32.mrb[90].mxu1 }
 0x865   : > { %v10578_v19 = vadd.f32 %v8034_v41, %v6682_v40  ;;  %v3112_v60 = vpop.f32.mrb[91].mxu1 }
 0x866   : > { %v10580_v18 = vadd.f32 %v6682_v40, %v3112_v60 }
 0x868   : > { %v8037_v43 = vpop.f32.mrb[92].mxu1 }
 0x869   : > { %v10582_v39 = vadd.f32 %v8037_v43, %v6682_v40  ;;  %v3122_v13 = vpop.f32.mrb[93].mxu1 }
 0x86a   : > { %v10584_v16 = vadd.f32 %v6682_v40, %v3122_v13  ;;  %v10700_v13 = vld [vmem:[%s9579_s14 + $0x38] sm:$0xff] }
 0x86c   : > { %v8040_v6 = vpop.f32.mrb[94].mxu1 }
 0x86d   : > { %v10586_v7 = vadd.f32 %v8040_v6, %v6682_v40  ;;  %v3132_v17 = vpop.f32.mrb[95].mxu1  ;;  %v10710_v6 = vld [vmem:[%s9579_s14 + $0x48] sm:$0xff] }
 0x86e   : > { %v10588_v63 = vadd.f32 %v6682_v40, %v3132_v17  ;;  %v10720_v17 = vld [vmem:[%s9579_s14 + $0x58] sm:$0xff] }
 0x870   : > { %v8051_v12 = vpop.f32.mrb[96].mxu1 }
 0x871   : > { %v3221_v14 = vadd.f32 %v8051_v12, %v6700_v5  ;;  %v3215_v20 = vpop.f32.mrb[97].mxu1 }
 0x872   : > { %v3216_v8 = vadd.f32 %v6700_v5, %v3215_v20 }
 0x874   : > { %v8797_v53 = vpack.c.bf16 %v3221_v14, %v3216_v8  ;;  %v8054_v22 = vpop.f32.mrb[98].mxu1 }
 0x875   : > { %v3231_v24 = vadd.f32 %v8054_v22, %v6700_v5  ;;  %v3225_v59 = vpop.f32.mrb[99].mxu1 }
 0x876   : > { %8799 = vmatprep.subr.msk.bf16.mxu1 %vm9712_vm2, %v8797_v53  ;;  %v3226_v28 = vadd.f32 %v6700_v5, %v3225_v59 }
 0x877   : > { %8802 = vmatpush3.bf16.xpose.msk.msra.mxu1 %vm9712_vm2, %v8797_v53 }
 0x878   : > { %v8803_v1 = vpack.c.bf16 %v3231_v24, %v3226_v28  ;;  %v8057_v29 = vpop.f32.mrb[100].mxu1 }
 0x879   : > { %v3241_v3 = vadd.f32 %v8057_v29, %v6700_v5  ;;  %v3235_v35 = vpop.f32.mrb[101].mxu1 }
 0x87a   : > { %8805 = vmatprep.subr.msk.bf16.mxu1 %vm9712_vm2, %v8803_v1  ;;  %v3236_v10 = vadd.f32 %v6700_v5, %v3235_v35 }
 0x87c   : > { %v8809_v45 = vpack.c.bf16 %v3241_v3, %v3236_v10  ;;  %v8060_v49 = vpop.f32.mrb[102].mxu1 }
 0x87d   : > { %v3251_v30 = vadd.f32 %v8060_v49, %v6700_v5  ;;  %v3245_v47 = vpop.f32.mrb[103].mxu1 }
 0x87e   : > { %v3246_v50 = vadd.f32 %v6700_v5, %v3245_v47 }
 0x87f   : > { %8808 = vmatpush3.bf16.xpose.msk.msra.mxu1 %vm9712_vm2, %v8803_v1 }
 0x880   : > { %8811 = vmatprep.subr.msk.bf16.mxu1 %vm9712_vm2, %v8809_v45  ;;  %v8815_v56 = vpack.c.bf16 %v3251_v30, %v3246_v50  ;;  %v8063_v33 = vpop.f32.mrb[104].mxu1 }
 0x881   : > { %v3261_v61 = vadd.f32 %v8063_v33, %v6700_v5  ;;  %v3255_v52 = vpop.f32.mrb[105].mxu1 }
 0x882   : > { %v3256_v44 = vadd.f32 %v6700_v5, %v3255_v52 }
 0x884   : > { %v8821_v55 = vpack.c.bf16 %v3261_v61, %v3256_v44  ;;  %v8066_v40 = vpop.f32.mrb[106].mxu1 }
 0x885   : > { %v3271_v26 = vadd.f32 %v8066_v40, %v6700_v5  ;;  %v3265_v36 = vpop.f32.mrb[107].mxu1 }
 0x886   : > { %v3266_v38 = vadd.f32 %v6700_v5, %v3265_v36 }
 0x887   : > { %8814 = vmatpush3.bf16.xpose.msk.msra.mxu1 %vm9712_vm2, %v8809_v45 }
 0x888   : > { %8817 = vmatprep.subr.msk.bf16.mxu1 %vm9712_vm2, %v8815_v56  ;;  %v8827_v51 = vpack.c.bf16 %v3271_v26, %v3266_v38  ;;  %v8069_v46 = vpop.f32.mrb[108].mxu1  ;;  %v10786_v38 = vld [vmem:[%s11997_s2 + $0xa] ss:$0 sm:$0xff] }
 0x889   : > { %v3281_v31 = vadd.f32 %v8069_v46, %v6700_v5  ;;  %v3275_v21 = vpop.f32.mrb[109].mxu1 }
 0x88a   : > { %v3276_v2 = vadd.f32 %v6700_v5, %v3275_v21 }
 0x88c   : > { %v8833_v9 = vpack.c.bf16 %v3281_v31, %v3276_v2  ;;  %v8072_v48 = vpop.f32.mrb[110].mxu1 }
 0x88d   : > { %v3291_v0 = vadd.f32 %v8072_v48, %v6700_v5  ;;  %v3285_v41 = vpop.f32.mrb[111].mxu1 }
 0x88e   : > { %v3286_v60 = vadd.f32 %v6700_v5, %v3285_v41 }
 0x88f   : > { %8820 = vmatpush3.bf16.xpose.msk.msra.mxu1 %vm9712_vm2, %v8815_v56 }
 0x890   : > { %8823 = vmatprep.subr.msk.bf16.mxu1 %vm9712_vm2, %v8821_v55  ;;  %v8839_v43 = vpack.c.bf16 %v3291_v0, %v3286_v60 }
 0x897   : > { %8826 = vmatpush3.bf16.xpose.msk.msra.mxu1 %vm9712_vm2, %v8821_v55 }
 0x898   : > { %8829 = vmatprep.subr.msk.bf16.mxu1 %vm9712_vm2, %v8827_v51 }
 0x89f   : > { %8832 = vmatpush3.bf16.xpose.msk.msra.mxu1 %vm9712_vm2, %v8827_v51 }
 0x8a0   : > { %8835 = vmatprep.subr.msk.bf16.mxu1 %vm9712_vm2, %v8833_v9 }
 0x8a7   : > { %8838 = vmatpush3.bf16.xpose.msk.msra.mxu1 %vm9712_vm2, %v8833_v9 }
 0x8a8   : > { %8841 = vmatprep.subr.msk.bf16.mxu1 %vm9712_vm2, %v8839_v43 }
 0x8af   : > { %8844 = vmatpush3.bf16.xpose.msk.msra.mxu1 %vm9712_vm2, %v8839_v43 }
 0x8b6   : > { %8138 = vmatmul.mubr.msk.f32.vlgmr.msra.gmra.mrb[112].mxu1 %vm979_vm1, %v10559_v32  ;;  %v6677_v32 = vld [vmem:[%s11996_s1 + $0x140] sm:$0xff] }
 0x8b7   : > { %8140 = vmatprep.mubr.msk.f32.mxu1 %vm979_vm1, %v10564_v34  ;;  %v6679_v34 = vld [vmem:[%s11996_s1 + $0x150] sm:$0xff] }
 0x8ba   : > { %8141 = vmatmul.mubr.msk.f32.gmra.mrb[114].mxu1 %vm979_vm1, %v10562_v62  ;;  %v6678_v62 = vld [vmem:[%s11996_s1 + $0x148] sm:$0xff] }
 0x8bb   : > { %8143 = vmatprep.mubr.msk.f32.mxu1 %vm979_vm1, %v10568_v15  ;;  %v6680_v15 = vld [vmem:[%s11996_s1 + $0x158] sm:$0xff] }
 0x8be   : > { %8144 = vmatmul.mubr.msk.f32.gmra.mrb[116].mxu1 %vm979_vm1, %v10566_v57  ;;  %v8789_v57 = vpack.c.bf16 %v6678_v62, %v6677_v32 }
 0x8bf   : > { %8146 = vmatprep.mubr.msk.f32.mxu1 %vm979_vm1, %v10572_v23  ;;  %v10670_v23 = vld [vmem:[%s9579_s14 + $0x8] sm:$0xff] }
 0x8c0   : > { %8790 = vmatprep.subr.bf16.mxu0 %v8789_v57 }
 0x8c1   : > { %8792 = vmatpush3.bf16.msra.mxu0 %v8789_v57 }
 0x8c2   : > { %8147 = vmatmul.mubr.msk.f32.gmra.mrb[118].mxu1 %vm979_vm1, %v10570_v11  ;;  %v8793_v11 = vpack.c.bf16 %v6680_v15, %v6679_v34 }
 0x8c3   : > { %8149 = vmatprep.mubr.msk.f32.mxu1 %vm979_vm1, %v10576_v27  ;;  %v10680_v27 = vld [vmem:[%s9579_s14 + $0x18] sm:$0xff] }
 0x8c4   : > { %8794 = vmatprep.subr.bf16.mxu0 %v8793_v11 }
 0x8c5   : > { %8796 = vmatpush3.bf16.msra.mxu0 %v8793_v11 }
 0x8c6   : > { %8150 = vmatmul.mubr.msk.f32.gmra.mrb[120].mxu1 %vm979_vm1, %v10574_v58  ;;  %v10675_v58 = vld [vmem:[%s9579_s14 + $0x10] sm:$0xff] }
 0x8c7   : > { %8152 = vmatprep.mubr.msk.f32.mxu1 %vm979_vm1, %v10580_v18  ;;  %v10690_v18 = vld [vmem:[%s9579_s14 + $0x28] sm:$0xff] }
 0x8c8   : > { %8082 = vmatmul.mubr.msk.f32.vlgmr.msra.gmra.mrb[96].mxu0 %vm479_vm0, %v10670_v23 }
 0x8c9   : > { %8084 = vmatprep.mubr.msk.f32.mxu0 %vm479_vm0, %v10675_v58 }
 0x8ca   : > { %8153 = vmatmul.mubr.msk.f32.gmra.mrb[122].mxu1 %vm979_vm1, %v10578_v19  ;;  %v10685_v19 = vld [vmem:[%s9579_s14 + $0x20] sm:$0xff] }
 0x8cb   : > { %8155 = vmatprep.mubr.msk.f32.mxu1 %vm979_vm1, %v10584_v16  ;;  %v10705_v16 = vld [vmem:[%s9579_s14 + $0x40] sm:$0xff] }
 0x8cc   : > { %8085 = vmatmul.mubr.msk.f32.gmra.mrb[98].mxu0 %vm479_vm0, %v10680_v27 }
 0x8cd   : > { %8087 = vmatprep.mubr.msk.f32.mxu0 %vm479_vm0, %v10685_v19 }
 0x8ce   : > { %8156 = vmatmul.mubr.msk.f32.gmra.mrb[124].mxu1 %vm979_vm1, %v10582_v39  ;;  %v10695_v39 = vld [vmem:[%s9579_s14 + $0x30] sm:$0xff] }
 0x8cf   : > { %8158 = vmatprep.mubr.msk.f32.mxu1 %vm979_vm1, %v10588_v63  ;;  %v10725_v63 = vld [vmem:[%s9579_s14 + $0x60] sm:$0xff] }
 0x8d0   : > { %8088 = vmatmul.mubr.msk.f32.gmra.mrb[100].mxu0 %vm479_vm0, %v10690_v18 }
 0x8d1   : > { %8090 = vmatprep.mubr.msk.f32.mxu0 %vm479_vm0, %v10695_v39 }
 0x8d2   : > { %8159 = vmatmul.mubr.msk.f32.gmra.mrb[126].mxu1 %vm979_vm1, %v10586_v7  ;;  %v10715_v7 = vld [vmem:[%s9579_s14 + $0x50] sm:$0xff] }
 0x8d3   : > { %8251 = vmatprep.mubr.msk.f32.mxu1 %vm479_vm0, %v10555_v25 }
 0x8d4   : > { %8091 = vmatmul.mubr.msk.f32.gmra.mrb[102].mxu0 %vm479_vm0, %v10700_v13 }
 0x8d5   : > { %8093 = vmatprep.mubr.msk.f32.mxu0 %vm479_vm0, %v10705_v16 }
 0x8d8   : > { %8094 = vmatmul.mubr.msk.f32.gmra.mrb[104].mxu0 %vm479_vm0, %v10710_v6 }
 0x8d9   : > { %8096 = vmatprep.mubr.msk.f32.mxu0 %vm479_vm0, %v10715_v7 }
 0x8dc   : > { %8097 = vmatmul.mubr.msk.f32.gmra.mrb[106].mxu0 %vm479_vm0, %v10720_v17 }
 0x8dd   : > { %8099 = vmatprep.mubr.msk.f32.mxu0 %vm479_vm0, %v10725_v63 }
 0x8e0   : > { %8100 = vmatmul.mubr.msk.f32.gmra.mrb[108].mxu0 %vm479_vm0, %v10281_v4 }
 0x8e1   : > { %8102 = vmatprep.mubr.msk.f32.mxu0 %vm479_vm0, %v10286_v42 }
 0x8e4   : > { %8103 = vmatmul.mubr.msk.f32.gmra.mrb[110].mxu0 %vm479_vm0, %v10291_v54 }
 0x989   : > { %v8139_v5 = vpop.f32.mrb[112].mxu1 }
 0x98a   : > { %v10735_v12 = vmul.f32 0.35355338, %v8139_v5  ;;  %v3609_v14 = vpop.f32.mrb[113].mxu1 }
 0x98b   : > { %v10737_v20 = vmul.f32 0.35355338, %v3609_v14 }
 0x98c   : > { %3706 = vmax.xlane.f32.xlu1 %v10735_v12 }
 0x98d   : > { %3704 = vmax.xlane.f32.xlu0 %v10737_v20  ;;  %v8142_v8 = vpop.f32.mrb[114].mxu1 }
 0x98e   : > { %v10741_v53 = vmul.f32 0.35355338, %v8142_v8  ;;  %v3619_v4 = vpop.f32.mrb[115].mxu1 }
 0x98f   : > { %v10743_v22 = vmul.f32 0.35355338, %v3619_v4 }
 0x990   : > { %3710 = vmax.xlane.f32.xlu1 %v10741_v53 }
 0x991   : > { %3708 = vmax.xlane.f32.xlu0 %v10743_v22  ;;  %v8145_v42 = vpop.f32.mrb[116].mxu1 }
 0x992   : > { %v10747_v54 = vmul.f32 0.35355338, %v8145_v42  ;;  %v3629_v24 = vpop.f32.mrb[117].mxu1 }
 0x993   : > { %v10749_v59 = vmul.f32 0.35355338, %v3629_v24 }
 0x994   : > { %3714 = vmax.xlane.f32.xlu1 %v10747_v54 }
 0x995   : > { %3712 = vmax.xlane.f32.xlu0 %v10749_v59  ;;  %v8148_v28 = vpop.f32.mrb[118].mxu1 }
 0x996   : > { %v10753_v1 = vmul.f32 0.35355338, %v8148_v28  ;;  %v3639_v29 = vpop.f32.mrb[119].mxu1 }
 0x997   : > { %v10755_v3 = vmul.f32 0.35355338, %v3639_v29 }
 0x998   : > { %3718 = vmax.xlane.f32.xlu1 %v10753_v1 }
 0x999   : > { %3716 = vmax.xlane.f32.xlu0 %v10755_v3  ;;  %v8151_v35 = vpop.f32.mrb[120].mxu1 }
 0x99a   : > { %v10759_v10 = vmul.f32 0.35355338, %v8151_v35  ;;  %v3649_v45 = vpop.f32.mrb[121].mxu1 }
 0x99b   : > { %v10761_v49 = vmul.f32 0.35355338, %v3649_v45  ;;  %v8083_v51 = vpop.f32.mrb[96].mxu0 }
 0x99c   : > { %3722 = vmax.xlane.f32.xlu1 %v10759_v10  ;;  %v3374_v46 = vadd.f32 %v8083_v51, %v10786_v38  ;;  %v3368_v31 = vpop.f32.mrb[97].mxu0 }
 0x99d   : > { %3720 = vmax.xlane.f32.xlu0 %v10761_v49  ;;  %v8154_v30 = vpop.f32.mrb[122].mxu1  ;;  %v3369_v21 = vadd.f32 %v10786_v38, %v3368_v31 }
 0x99e   : > { %v10765_v47 = vmul.f32 0.35355338, %v8154_v30  ;;  %v3659_v50 = vpop.f32.mrb[123].mxu1 }
 0x99f   : > { %v10767_v56 = vmul.f32 0.35355338, %v3659_v50  ;;  %v8845_v2 = vpack.c.bf16 %v3374_v46, %v3369_v21  ;;  %v8086_v9 = vpop.f32.mrb[98].mxu0 }
 0x9a0   : > { %3726 = vmax.xlane.f32.xlu1 %v10765_v47  ;;  %v3384_v48 = vadd.f32 %v8086_v9, %v10786_v38  ;;  %v3378_v0 = vpop.f32.mrb[99].mxu0 }
 0x9a1   : > { %3724 = vmax.xlane.f32.xlu0 %v10767_v56  ;;  %v8157_v33 = vpop.f32.mrb[124].mxu1  ;;  %v3379_v41 = vadd.f32 %v10786_v38, %v3378_v0  ;;  %8846 = vmatprep.subr.bf16.mxu0 %v8845_v2 }
 0x9a2   : > { %v10771_v61 = vmul.f32 0.35355338, %v8157_v33  ;;  %v3669_v52 = vpop.f32.mrb[125].mxu1  ;;  %8848 = vmatpush3.bf16.msra.mxu0 %v8845_v2 }
 0x9a3   : > { %v10773_v44 = vmul.f32 0.35355338, %v3669_v52  ;;  %v8849_v60 = vpack.c.bf16 %v3384_v48, %v3379_v41  ;;  %v8089_v43 = vpop.f32.mrb[100].mxu0 }
 0x9a4   : > { %3730 = vmax.xlane.f32.xlu1 %v10771_v61  ;;  %v3394_v32 = vadd.f32 %v8089_v43, %v10786_v38  ;;  %v3388_v62 = vpop.f32.mrb[101].mxu0 }
 0x9a5   : > { %3728 = vmax.xlane.f32.xlu0 %v10773_v44  ;;  %v8160_v55 = vpop.f32.mrb[126].mxu1  ;;  %v3389_v34 = vadd.f32 %v10786_v38, %v3388_v62  ;;  %8850 = vmatprep.subr.bf16.mxu0 %v8849_v60 }
 0x9a6   : > { %v10777_v40 = vmul.f32 0.35355338, %v8160_v55  ;;  %v3679_v26 = vpop.f32.mrb[127].mxu1  ;;  %8852 = vmatpush3.bf16.msra.mxu0 %v8849_v60 }
 0x9a7   : > { %v10779_v36 = vmul.f32 0.35355338, %v3679_v26  ;;  %v8853_v57 = vpack.c.bf16 %v3394_v32, %v3389_v34  ;;  %v8092_v15 = vpop.f32.mrb[102].mxu0 }
 0x9a8   : > { %3734 = vmax.xlane.f32.xlu1 %v10777_v40  ;;  %v3404_v11 = vadd.f32 %v8092_v15, %v10786_v38  ;;  %v3398_v5 = vpop.f32.mrb[103].mxu0 }
 0x9a9   : > { %3732 = vmax.xlane.f32.xlu0 %v10779_v36  ;;  %v3399_v14 = vadd.f32 %v10786_v38, %v3398_v5  ;;  %8854 = vmatprep.subr.bf16.mxu0 %v8853_v57 }
 0x9aa   : > { %8856 = vmatpush3.bf16.msra.mxu0 %v8853_v57 }
 0x9ab   : > { %v8857_v8 = vpack.c.bf16 %v3404_v11, %v3399_v14  ;;  %v8095_v4 = vpop.f32.mrb[104].mxu0 }
 0x9ac   : > { %v3414_v42 = vadd.f32 %v8095_v4, %v10786_v38  ;;  %v3408_v24 = vpop.f32.mrb[105].mxu0 }
 0x9ad   : > { %v3409_v29 = vadd.f32 %v10786_v38, %v3408_v24  ;;  %8858 = vmatprep.subr.bf16.mxu0 %v8857_v8 }
 0x9ae   : > { %8860 = vmatpush3.bf16.msra.mxu0 %v8857_v8 }
 0x9af   : > { %v8861_v50 = vpack.c.bf16 %v3414_v42, %v3409_v29  ;;  %v8098_v33 = vpop.f32.mrb[106].mxu0 }
 0x9b0   : > { %v3424_v55 = vadd.f32 %v8098_v33, %v10786_v38  ;;  %v3418_v26 = vpop.f32.mrb[107].mxu0 }
 0x9b1   : > { %v3419_v31 = vadd.f32 %v10786_v38, %v3418_v26  ;;  %8862 = vmatprep.subr.bf16.mxu0 %v8861_v50 }
 0x9b2   : > { %8864 = vmatpush3.bf16.msra.mxu0 %v8861_v50 }
 0x9b3   : > { %v10804_v9 = vpop.f32.mrb[108].mxu0 }
 0xa19   : > { %v3707_v28 = vpop.xlane.xlu1 %3706 }
 0xa1a   : > { %v3737_v35 = vsub.f32 %v10735_v12, %v3707_v28  ;;  %v3705_v45 = vpop.xlane.xlu0 %3704 }
 0xa1b   : > { %v3736_v30 = vsub.f32 %v10737_v20, %v3705_v45  ;;  %v8865_v20 = vpack.c.bf16 %v3424_v55, %v3419_v31 }
 0xa1c   : > { %v3754_v52 = vmul.f32 1.442695, %v3737_v35 }
 0xa1d   : > { %v3752_v51 = vmul.f32 1.442695, %v3736_v30  ;;  %v3711_v46 = vpop.xlane.xlu1 %3710  ;;  %8866 = vmatprep.subr.bf16.mxu0 %v8865_v20 }
 0xa1e   : > { %9221 = vpow2.f32 %v3754_v52  ;;  %v3739_v21 = vsub.f32 %v10741_v53, %v3711_v46  ;;  %v3709_v2 = vpop.xlane.xlu0 %3708  ;;  %8868 = vmatpush3.bf16.msra.mxu0 %v8865_v20  ;;  %v3428_v20 = vpop.f32.mrb[109].mxu0 }
 0xa1f   : > { %9223 = vpow2.f32 %v3752_v51  ;;  %v3738_v12 = vsub.f32 %v10743_v22, %v3709_v2 }
 0xa20   : > { %v3758_v48 = vmul.f32 1.442695, %v3739_v21 }
 0xa21   : > { %v3756_v0 = vmul.f32 1.442695, %v3738_v12  ;;  %v3715_v41 = vpop.xlane.xlu1 %3714  ;;  %v3434_v12 = vadd.f32 %v10804_v9, %v10786_v38 }
 0xa22   : > { %9225 = vpow2.f32 %v3758_v48  ;;  %v3741_v60 = vsub.f32 %v10747_v54, %v3715_v41  ;;  %v3713_v43 = vpop.xlane.xlu0 %3712  ;;  %v3429_v41 = vadd.f32 %v10786_v38, %v3428_v20 }
 0xa23   : > { %9227 = vpow2.f32 %v3756_v0  ;;  %v3740_v53 = vsub.f32 %v10749_v59, %v3713_v43 }
 0xa24   : > { %v3762_v32 = vmul.f32 1.442695, %v3741_v60  ;;  %v8104_v60 = vpop.f32.mrb[110].mxu0 }
 0xa25   : > { %v3760_v62 = vmul.f32 1.442695, %v3740_v53  ;;  %v3719_v34 = vpop.xlane.xlu1 %3718  ;;  %v3444_v9 = vadd.f32 %v8104_v60, %v10786_v38 }
 0xa26   : > { %9229 = vpow2.f32 %v3762_v32  ;;  %v3743_v22 = vsub.f32 %v10753_v1, %v3719_v34  ;;  %v3717_v57 = vpop.xlane.xlu0 %3716 }
 0xa27   : > { %9231 = vpow2.f32 %v3760_v62  ;;  %v3742_v15 = vsub.f32 %v10755_v3, %v3717_v57 }
 0xa28   : > { %v10810_v11 = vpop.eup %9221  ;;  %v3766_v5 = vmul.f32 1.442695, %v3743_v22 }
 0xa29   : > { %v10812_v14 = vpop.eup %9223  ;;  %v3764_v54 = vmul.f32 1.442695, %v3742_v15  ;;  %v3723_v8 = vpop.xlane.xlu1 %3722  ;;  %3786 = vadd.xlane.f32.xlu1 %v10810_v11 }
 0xa2a   : > { %9233 = vpow2.f32 %v3766_v5  ;;  %v3745_v59 = vsub.f32 %v10759_v10, %v3723_v8  ;;  %v3721_v4 = vpop.xlane.xlu0 %3720  ;;  %3784 = vadd.xlane.f32.xlu0 %v10812_v14 }
 0xa2b   : > { %9235 = vpow2.f32 %v3764_v54  ;;  %v3744_v1 = vsub.f32 %v10761_v49, %v3721_v4  ;;  %v6767_v54 = vld [vmem:[%s11998_s3 + $0x10] sm:$0xff] }
 0xa2c   : > { %v10818_v42 = vpop.eup %9225  ;;  %v3770_v3 = vmul.f32 1.442695, %v3745_v59 }
 0xa2d   : > { %v10820_v24 = vpop.eup %9227  ;;  %v3768_v28 = vmul.f32 1.442695, %v3744_v1  ;;  %v3727_v29 = vpop.xlane.xlu1 %3726  ;;  %3790 = vadd.xlane.f32.xlu1 %v10818_v42 }
 0xa2e   : > { %9237 = vpow2.f32 %v3770_v3  ;;  %v3747_v35 = vsub.f32 %v10765_v47, %v3727_v29  ;;  %v3725_v45 = vpop.xlane.xlu0 %3724  ;;  %3788 = vadd.xlane.f32.xlu0 %v10820_v24 }
 0xa2f   : > { %9239 = vpow2.f32 %v3768_v28  ;;  %v3746_v10 = vsub.f32 %v10767_v56, %v3725_v45 }
 0xa30   : > { %v10826_v30 = vpop.eup %9229  ;;  %v3774_v49 = vmul.f32 1.442695, %v3747_v35 }
 0xa31   : > { %v10828_v50 = vpop.eup %9231  ;;  %v3772_v33 = vmul.f32 1.442695, %v3746_v10  ;;  %v3731_v52 = vpop.xlane.xlu1 %3730  ;;  %3794 = vadd.xlane.f32.xlu1 %v10826_v30 }
 0xa32   : > { %9241 = vpow2.f32 %v3774_v49  ;;  %v3749_v55 = vsub.f32 %v10771_v61, %v3731_v52  ;;  %v3729_v26 = vpop.xlane.xlu0 %3728  ;;  %3792 = vadd.xlane.f32.xlu0 %v10828_v50 }
 0xa33   : > { %9243 = vpow2.f32 %v3772_v33  ;;  %v3748_v47 = vsub.f32 %v10773_v44, %v3729_v26 }
 0xa34   : > { %v10834_v51 = vpop.eup %9233  ;;  %v3778_v56 = vmul.f32 1.442695, %v3749_v55 }
 0xa35   : > { %v10836_v46 = vpop.eup %9235  ;;  %v3776_v31 = vmul.f32 1.442695, %v3748_v47  ;;  %3798 = vadd.xlane.f32.xlu1 %v10834_v51  ;;  %v3735_v21 = vpop.xlane.xlu1 %3734 }
 0xa36   : > { %9245 = vpow2.f32 %v3778_v56  ;;  %v3751_v2 = vsub.f32 %v10777_v40, %v3735_v21  ;;  %3796 = vadd.xlane.f32.xlu0 %v10836_v46  ;;  %v3733_v61 = vpop.xlane.xlu0 %3732  ;;  %v8869_v40 = vpack.c.bf16 %v3434_v12, %v3429_v41 }
 0xa37   : > { %9247 = vpow2.f32 %v3776_v31  ;;  %v3750_v44 = vsub.f32 %v10779_v36, %v3733_v61  ;;  %v3438_v36 = vpop.f32.mrb[111].mxu0 }
 0xa38   : > { %v10844_v48 = vpop.eup %9237  ;;  %v3782_v0 = vmul.f32 1.442695, %v3751_v2  ;;  %v3439_v62 = vadd.f32 %v10786_v38, %v3438_v36  ;;  %8870 = vmatprep.subr.bf16.mxu0 %v8869_v40 }
 0xa39   : > { %v10847_v43 = vpop.eup %9239  ;;  %v3780_v53 = vmul.f32 1.442695, %v3750_v44  ;;  %3802 = vadd.xlane.f32.xlu1 %v10844_v48  ;;  %8872 = vmatpush3.bf16.msra.mxu0 %v8869_v40 }
 0xa3a   : > { %9249 = vpow2.f32 %v3782_v0  ;;  %3800 = vadd.xlane.f32.xlu0 %v10847_v43  ;;  %v8873_v22 = vpack.c.bf16 %v3444_v9, %v3439_v62 }
 0xa3b   : > { %9251 = vpow2.f32 %v3780_v53 }
 0xa3c   : > { %v10852_v32 = vpop.eup %9241  ;;  %8874 = vmatprep.subr.bf16.mxu0 %v8873_v22 }
 0xa3d   : > { %v10855_v34 = vpop.eup %9243  ;;  %3806 = vadd.xlane.f32.xlu1 %v10852_v32  ;;  %8876 = vmatpush3.bf16.msra.mxu0 %v8873_v22 }
 0xa3e   : > { %3804 = vadd.xlane.f32.xlu0 %v10855_v34  ;;  %8217 = vmatprep.subr.mxu0 %v6767_v54 }
 0xa40   : > { %v10859_v57 = vpop.eup %9245 }
 0xa41   : > { %v10861_v15 = vpop.eup %9247  ;;  %3810 = vadd.xlane.f32.xlu1 %v10859_v57 }
 0xa42   : > { %3808 = vadd.xlane.f32.xlu0 %v10861_v15 }
 0xa44   : > { %v10865_v38 = vpop.eup %9249 }
 0xa45   : > { %v10867_v5 = vpop.eup %9251  ;;  %3814 = vadd.xlane.f32.xlu1 %v10865_v38 }
 0xa46   : > { %3812 = vadd.xlane.f32.xlu0 %v10867_v5 }
 0xab6   : > { %v3787_v8 = vpop.xlane.xlu1 %3786 }
 0xab7   : > { %9253 = vrcp.f32 %v3787_v8  ;;  %v3785_v59 = vpop.xlane.xlu0 %3784 }
 0xab8   : > { %9255 = vrcp.f32 %v3785_v59 }
 0xaba   : > { %v3791_v4 = vpop.xlane.xlu1 %3790 }
 0xabb   : > { %9257 = vrcp.f32 %v3791_v4  ;;  %v3789_v1 = vpop.xlane.xlu0 %3788 }
 0xabc   : > { %9259 = vrcp.f32 %v3789_v1 }
 0xabe   : > { %v3795_v3 = vpop.xlane.xlu1 %3794 }
 0xabf   : > { %9261 = vrcp.f32 %v3795_v3  ;;  %v3793_v28 = vpop.xlane.xlu0 %3792  ;;  %v6786_v3 = vld [vmem:[%s11996_s1 + $0x70] sm:$0xff] }
 0xac0   : > { %9263 = vrcp.f32 %v3793_v28  ;;  %v6787_v28 = vld [vmem:[%s11996_s1 + $0x78] sm:$0xff] }
 0xac1   : > { %v9254_v29 = vpop.eup %9253 }
 0xac2   : > { %v9256_v35 = vpop.eup %9255  ;;  %v3799_v45 = vpop.xlane.xlu1 %3798  ;;  %v3819_v33 = vmul.f32 %v9254_v29, %v10810_v11  ;;  %v8881_v29 = vpack.c.bf16 %v6787_v28, %v6786_v3 }
 0xac3   : > { %9265 = vrcp.f32 %v3799_v45  ;;  %v3797_v10 = vpop.xlane.xlu0 %3796  ;;  %v3817_v49 = vmul.f32 %v9256_v35, %v10812_v14  ;;  %v10933_v35 = vld [vmem:[%s9579_s14 + $0x68] sm:$0xff]  ;;  %v10938_v45 = vld [vmem:[%s9579_s14 + $0x70] sm:$0xff] }
 0xac4   : > { %9267 = vrcp.f32 %v3797_v10  ;;  %v10943_v10 = vld [vmem:[%s9579_s14 + $0x78] sm:$0xff] }
 0xac5   : > { %v9258_v52 = vpop.eup %9257  ;;  %8193 = vmatprep.mubr.f32.mxu0 %v3817_v49  ;;  %v6790_v49 = vld [vmem:[%s11996_s1 + $0xf0] sm:$0xff] }
 0xac6   : > { %v9260_v55 = vpop.eup %9259  ;;  %v3803_v26 = vpop.xlane.xlu1 %3802  ;;  %8194 = vmatmul.mubr.f32.vlgmr.msra.gmra.mrb[112].mxu0 %v3819_v33  ;;  %v3823_v31 = vmul.f32 %v9258_v52, %v10818_v42  ;;  %v6791_v33 = vld [vmem:[%s11996_s1 + $0xf8] sm:$0xff] }
 0xac7   : > { %9269 = vrcp.f32 %v3803_v26  ;;  %v3801_v47 = vpop.xlane.xlu0 %3800  ;;  %v3821_v56 = vmul.f32 %v9260_v55, %v10820_v24  ;;  %8218 = vmatpush3.msra.mxu0 %v6767_v54  ;;  %v8889_v26 = vpack.c.bf16 %v6791_v33, %v6790_v49 }
 0xac8   : > { %9271 = vrcp.f32 %v3801_v47 }
 0xac9   : > { %v9262_v21 = vpop.eup %9261  ;;  %8196 = vmatprep.mubr.f32.mxu0 %v3821_v56 }
 0xaca   : > { %v9264_v2 = vpop.eup %9263  ;;  %v3807_v14 = vpop.xlane.xlu1 %3806  ;;  %8197 = vmatmul.mubr.f32.gmra.mrb[114].mxu0 %v3823_v31  ;;  %v3827_v12 = vmul.f32 %v9262_v21, %v10826_v30 }
 0xacb   : > { %9273 = vrcp.f32 %v3807_v14  ;;  %v3805_v11 = vpop.xlane.xlu0 %3804  ;;  %v3825_v61 = vmul.f32 %v9264_v2, %v10828_v50 }
 0xacc   : > { %9275 = vrcp.f32 %v3805_v11 }
 0xacd   : > { %v9266_v44 = vpop.eup %9265  ;;  %8199 = vmatprep.mubr.f32.mxu0 %v3825_v61 }
 0xace   : > { %v9268_v20 = vpop.eup %9267  ;;  %v3811_v24 = vpop.xlane.xlu1 %3810  ;;  %8200 = vmatmul.mubr.f32.gmra.mrb[116].mxu0 %v3827_v12  ;;  %v3831_v41 = vmul.f32 %v9266_v44, %v10834_v51 }
 0xacf   : > { %9277 = vrcp.f32 %v3811_v24  ;;  %v3809_v0 = vpop.xlane.xlu0 %3808  ;;  %v3829_v42 = vmul.f32 %v9268_v20, %v10836_v46 }
 0xad0   : > { %9279 = vrcp.f32 %v3809_v0 }
 0xad1   : > { %v9270_v60 = vpop.eup %9269  ;;  %8202 = vmatprep.mubr.f32.mxu0 %v3829_v42 }
 0xad2   : > { %v9272_v53 = vpop.eup %9271  ;;  %v3815_v40 = vpop.xlane.xlu1 %3814  ;;  %8203 = vmatmul.mubr.f32.gmra.mrb[118].mxu0 %v3831_v41  ;;  %v3835_v9 = vmul.f32 %v9270_v60, %v10844_v48  ;;  %v6797_v41 = vld [vmem:[%s11997_s2 + $0x3] ss:$0 sm:$0xff] }
 0xad3   : > { %9281 = vrcp.f32 %v3815_v40  ;;  %v3813_v50 = vpop.xlane.xlu0 %3812  ;;  %v3833_v30 = vmul.f32 %v9272_v53, %v10847_v43 }
 0xad4   : > { %9283 = vrcp.f32 %v3813_v50 }
 0xad5   : > { %v9274_v36 = vpop.eup %9273  ;;  %8205 = vmatprep.mubr.f32.mxu0 %v3833_v30 }
 0xad6   : > { %v9276_v62 = vpop.eup %9275  ;;  %8206 = vmatmul.mubr.f32.gmra.mrb[120].mxu0 %v3835_v9  ;;  %v3839_v51 = vmul.f32 %v9274_v36, %v10852_v32  ;;  %v6788_v32 = vld [vmem:[%s11996_s1 + $0xe0] sm:$0xff] }
 0xad7   : > { %v3837_v46 = vmul.f32 %v9276_v62, %v10855_v34  ;;  %v6789_v34 = vld [vmem:[%s11996_s1 + $0xe8] sm:$0xff] }
 0xad9   : > { %v9278_v22 = vpop.eup %9277  ;;  %8208 = vmatprep.mubr.f32.mxu0 %v3837_v46 }
 0xada   : > { %v9280_v54 = vpop.eup %9279  ;;  %8209 = vmatmul.mubr.f32.gmra.mrb[122].mxu0 %v3839_v51  ;;  %v3843_v59 = vmul.f32 %v9278_v22, %v10859_v57  ;;  %v6784_v57 = vld [vmem:[%s11996_s1 + $0x60] sm:$0xff] }
 0xadb   : > { %v3841_v8 = vmul.f32 %v9280_v54, %v10861_v15  ;;  %v8885_v15 = vpack.c.bf16 %v6789_v34, %v6788_v32 }
 0xadd   : > { %v9282_v43 = vpop.eup %9281  ;;  %8211 = vmatprep.mubr.f32.mxu0 %v3841_v8  ;;  %8886 = vmatprep.subr.bf16.mxu0 %v8885_v15 }
 0xade   : > { %v9284_v4 = vpop.eup %9283  ;;  %8212 = vmatmul.mubr.f32.gmra.mrb[124].mxu0 %v3843_v59  ;;  %v3847_v1 = vmul.f32 %v9282_v43, %v10865_v38  ;;  %v6785_v38 = vld [vmem:[%s11996_s1 + $0x68] sm:$0xff] }
 0xadf   : > { %v3845_v48 = vmul.f32 %v9284_v4, %v10867_v5  ;;  %v8877_v5 = vpack.c.bf16 %v6785_v38, %v6784_v57 }
 0xae1   : > { %8214 = vmatprep.mubr.f32.mxu0 %v3845_v48  ;;  %8878 = vmatprep.subr.bf16.mxu1 %v8877_v5 }
 0xae2   : > { %8215 = vmatmul.mubr.f32.gmra.mrb[126].mxu0 %v3847_v1  ;;  %8880 = vmatpush3.bf16.msra.mxu1 %v8877_v5 }
 0xae3   : > { %8882 = vmatprep.subr.bf16.mxu1 %v8881_v29 }
 0xae6   : > { %8884 = vmatpush3.bf16.msra.mxu1 %v8881_v29 }
 0xae9   : > { %8252 = vmatmul.mubr.msk.f32.vlgmr.msra.gmra.mrb[128].mxu1 %vm479_vm0, %v10670_v23 }
 0xaea   : > { %8254 = vmatprep.mubr.msk.f32.mxu1 %vm479_vm0, %v10675_v58 }
 0xaed   : > { %8255 = vmatmul.mubr.msk.f32.gmra.mrb[130].mxu1 %vm479_vm0, %v10680_v27 }
 0xaee   : > { %8257 = vmatprep.mubr.msk.f32.mxu1 %vm479_vm0, %v10685_v19 }
 0xaf1   : > { %8258 = vmatmul.mubr.msk.f32.gmra.mrb[132].mxu1 %vm479_vm0, %v10690_v18 }
 0xaf2   : > { %8260 = vmatprep.mubr.msk.f32.mxu1 %vm479_vm0, %v10695_v39 }
 0xaf5   : > { %8261 = vmatmul.mubr.msk.f32.gmra.mrb[134].mxu1 %vm479_vm0, %v10700_v13 }
 0xaf6   : > { %8263 = vmatprep.mubr.msk.f32.mxu1 %vm479_vm0, %v10705_v16 }
 0xaf9   : > { %8264 = vmatmul.mubr.msk.f32.gmra.mrb[136].mxu1 %vm479_vm0, %v10710_v6 }
 0xafa   : > { %8266 = vmatprep.mubr.msk.f32.mxu1 %vm479_vm0, %v10715_v7 }
 0xafd   : > { %8267 = vmatmul.mubr.msk.f32.gmra.mrb[138].mxu1 %vm479_vm0, %v10720_v17 }
 0xafe   : > { %8269 = vmatprep.mubr.msk.f32.mxu1 %vm479_vm0, %v10725_v63 }
 0xb01   : > { %8270 = vmatmul.mubr.msk.f32.gmra.mrb[140].mxu1 %vm479_vm0, %v10933_v35 }
 0xb02   : > { %8272 = vmatprep.mubr.msk.f32.mxu1 %vm479_vm0, %v10938_v45 }
 0xb05   : > { %8273 = vmatmul.mubr.msk.f32.gmra.mrb[142].mxu1 %vm479_vm0, %v10943_v10 }
 0xb06   : > { %8315 = vmatprep.mubr.msk.f32.mxu1 %vm479_vm0, %v10555_v25 }
 0xb99   : > { %v8195_v52 = vpop.f32.mrb[112].mxu0 }
 0xb9a   : > { %v3914_v55 = vpop.f32.mrb[113].mxu0 }
 0xb9b   : > { %8219 = vmatprep.mubr.msk.f32.mxu0 %vm979_vm1, %v3914_v55 }
 0xb9c   : > { %8220 = vmatmul.mubr.msk.f32.vlgmr.msra.gmra.mrb[48].mxu0 %vm979_vm1, %v8195_v52 }
 0xb9d   : > { %8888 = vmatpush3.bf16.msra.mxu0 %v8885_v15  ;;  %v8198_v47 = vpop.f32.mrb[114].mxu0 }
 0xb9e   : > { %v3924_v56 = vpop.f32.mrb[115].mxu0  ;;  %8890 = vmatprep.subr.bf16.mxu0 %v8889_v26 }
 0xb9f   : > { %8222 = vmatprep.mubr.msk.f32.mxu0 %vm979_vm1, %v3924_v56 }
 0xba0   : > { %8223 = vmatmul.mubr.msk.f32.gmra.mrb[50].mxu0 %vm979_vm1, %v8198_v47 }
 0xba1   : > { %v8201_v31 = vpop.f32.mrb[116].mxu0  ;;  %8892 = vmatpush3.bf16.msra.mxu0 %v8889_v26  ;;  %v6815_v26 = vld [vmem:[%s11997_s2 + $0x7] ss:$0 sm:$0xff] }
 0xba2   : > { %v3934_v21 = vpop.f32.mrb[117].mxu0 }
 0xba3   : > { %8225 = vmatprep.mubr.msk.f32.mxu0 %vm979_vm1, %v3934_v21 }
 0xba4   : > { %8226 = vmatmul.mubr.msk.f32.gmra.mrb[52].mxu0 %vm979_vm1, %v8201_v31 }
 0xba5   : > { %v8204_v2 = vpop.f32.mrb[118].mxu0 }
 0xba6   : > { %v3944_v14 = vpop.f32.mrb[119].mxu0 }
 0xba7   : > { %8228 = vmatprep.mubr.msk.f32.mxu0 %vm979_vm1, %v3944_v14 }
 0xba8   : > { %8229 = vmatmul.mubr.msk.f32.gmra.mrb[54].mxu0 %vm979_vm1, %v8204_v2 }
 0xba9   : > { %v8207_v11 = vpop.f32.mrb[120].mxu0 }
 0xbaa   : > { %v3954_v61 = vpop.f32.mrb[121].mxu0 }
 0xbab   : > { %8231 = vmatprep.mubr.msk.f32.mxu0 %vm979_vm1, %v3954_v61 }
 0xbac   : > { %8232 = vmatmul.mubr.msk.f32.gmra.mrb[56].mxu0 %vm979_vm1, %v8207_v11 }
 0xbad   : > { %v8210_v12 = vpop.f32.mrb[122].mxu0 }
 0xbae   : > { %v3964_v44 = vpop.f32.mrb[123].mxu0 }
 0xbaf   : > { %8234 = vmatprep.mubr.msk.f32.mxu0 %vm979_vm1, %v3964_v44 }
 0xbb0   : > { %8235 = vmatmul.mubr.msk.f32.gmra.mrb[58].mxu0 %vm979_vm1, %v8210_v12 }
 0xbb1   : > { %v8213_v20 = vpop.f32.mrb[124].mxu0 }
 0xbb2   : > { %v3974_v24 = vpop.f32.mrb[125].mxu0 }
 0xbb3   : > { %8237 = vmatprep.mubr.msk.f32.mxu0 %vm979_vm1, %v3974_v24 }
 0xbb4   : > { %8238 = vmatmul.mubr.msk.f32.gmra.mrb[60].mxu0 %vm979_vm1, %v8213_v20 }
 0xbb5   : > { %v8216_v0 = vpop.f32.mrb[126].mxu0 }
 0xbb6   : > { %v3984_v42 = vpop.f32.mrb[127].mxu0 }
 0xbb7   : > { %8240 = vmatprep.mubr.msk.f32.mxu0 %vm979_vm1, %v3984_v42 }
 0xbb8   : > { %8241 = vmatmul.mubr.msk.f32.gmra.mrb[62].mxu0 %vm979_vm1, %v8216_v0 }
 0xbb9   : > { %8283 = vmatprep.mubr.msk.f32.mxu0 %vm479_vm0, %v10555_v25 }
 0xbbc   : > { %8284 = vmatmul.mubr.msk.f32.vlgmr.msra.gmra.mrb[128].mxu0 %vm479_vm0, %v10670_v23  ;;  %v8253_v25 = vpop.f32.mrb[128].mxu1 }
 0xbbd   : > { %8286 = vmatprep.mubr.msk.f32.mxu0 %vm479_vm0, %v10675_v58  ;;  %v11006_v60 = vadd.f32 %v8253_v25, %v6797_v41  ;;  %v4293_v53 = vpop.f32.mrb[129].mxu1 }
 0xbbe   : > { %v4294_v40 = vadd.f32 %v6797_v41, %v4293_v53 }
 0xbc0   : > { %8287 = vmatmul.mubr.msk.f32.gmra.mrb[130].mxu0 %vm479_vm0, %v10680_v27  ;;  %v8256_v50 = vpop.f32.mrb[130].mxu1 }
 0xbc1   : > { %8289 = vmatprep.mubr.msk.f32.mxu0 %vm479_vm0, %v10685_v19  ;;  %v11008_v30 = vadd.f32 %v8256_v50, %v6797_v41  ;;  %v4303_v9 = vpop.f32.mrb[131].mxu1 }
 0xbc2   : > { %v11011_v36 = vadd.f32 %v6797_v41, %v4303_v9 }
 0xbc4   : > { %8290 = vmatmul.mubr.msk.f32.gmra.mrb[132].mxu0 %vm479_vm0, %v10690_v18  ;;  %v8259_v62 = vpop.f32.mrb[132].mxu1 }
 0xbc5   : > { %8292 = vmatprep.mubr.msk.f32.mxu0 %vm479_vm0, %v10695_v39  ;;  %v11013_v46 = vadd.f32 %v8259_v62, %v6797_v41  ;;  %v4313_v51 = vpop.f32.mrb[133].mxu1 }
 0xbc6   : > { %v11015_v22 = vadd.f32 %v6797_v41, %v4313_v51 }
 0xbc8   : > { %8293 = vmatmul.mubr.msk.f32.gmra.mrb[134].mxu0 %vm479_vm0, %v10700_v13  ;;  %v8262_v54 = vpop.f32.mrb[134].mxu1 }
 0xbc9   : > { %8295 = vmatprep.mubr.msk.f32.mxu0 %vm479_vm0, %v10705_v16  ;;  %v11017_v8 = vadd.f32 %v8262_v54, %v6797_v41  ;;  %v4323_v59 = vpop.f32.mrb[135].mxu1 }
 0xbca   : > { %v11019_v43 = vadd.f32 %v6797_v41, %v4323_v59 }
 0xbcc   : > { %8296 = vmatmul.mubr.msk.f32.gmra.mrb[136].mxu0 %vm479_vm0, %v10710_v6  ;;  %v8265_v4 = vpop.f32.mrb[136].mxu1 }
 0xbcd   : > { %8298 = vmatprep.mubr.msk.f32.mxu0 %vm479_vm0, %v10715_v7  ;;  %v11021_v48 = vadd.f32 %v8265_v4, %v6797_v41  ;;  %v4333_v1 = vpop.f32.mrb[137].mxu1 }
 0xbce   : > { %v11023_v32 = vadd.f32 %v6797_v41, %v4333_v1 }
 0xbd0   : > { %8299 = vmatmul.mubr.msk.f32.gmra.mrb[138].mxu0 %vm479_vm0, %v10720_v17  ;;  %v8268_v34 = vpop.f32.mrb[138].mxu1 }
 0xbd1   : > { %8301 = vmatprep.mubr.msk.f32.mxu0 %vm479_vm0, %v10725_v63  ;;  %v11025_v15 = vadd.f32 %v8268_v34, %v6797_v41  ;;  %v4343_v57 = vpop.f32.mrb[139].mxu1 }
 0xbd2   : > { %v11027_v38 = vadd.f32 %v6797_v41, %v4343_v57 }
 0xbd4   : > { %8302 = vmatmul.mubr.msk.f32.gmra.mrb[140].mxu0 %vm479_vm0, %v10933_v35  ;;  %v8271_v5 = vpop.f32.mrb[140].mxu1 }
 0xbd5   : > { %8304 = vmatprep.mubr.msk.f32.mxu0 %vm479_vm0, %v10938_v45  ;;  %v11029_v3 = vadd.f32 %v8271_v5, %v6797_v41  ;;  %v4353_v28 = vpop.f32.mrb[141].mxu1 }
 0xbd6   : > { %v11031_v29 = vadd.f32 %v6797_v41, %v4353_v28 }
 0xbd8   : > { %8305 = vmatmul.mubr.msk.f32.gmra.mrb[142].mxu0 %vm479_vm0, %v10943_v10  ;;  %v8274_v49 = vpop.f32.mrb[142].mxu1 }
 0xbd9   : > { %8371 = vmatprep.mubr.msk.f32.mxu0 %vm979_vm1, %v4294_v40  ;;  %v11033_v33 = vadd.f32 %v8274_v49, %v6797_v41  ;;  %v4363_v52 = vpop.f32.mrb[143].mxu1 }
 0xbda   : > { %v11035_v55 = vadd.f32 %v6797_v41, %v4363_v52 }
 0xc8f   : > { %v8285_v47 = vpop.f32.mrb[128].mxu0 }
 0xc90   : > { %v4452_v56 = vadd.f32 %v8285_v47, %v6815_v26  ;;  %v4446_v31 = vpop.f32.mrb[129].mxu0 }
 0xc91   : > { %v4447_v21 = vadd.f32 %v6815_v26, %v4446_v31 }
 0xc93   : > { %v8901_v2 = vpack.c.bf16 %v4452_v56, %v4447_v21  ;;  %v8288_v14 = vpop.f32.mrb[130].mxu0 }
 0xc94   : > { %v4462_v11 = vadd.f32 %v8288_v14, %v6815_v26  ;;  %v4456_v61 = vpop.f32.mrb[131].mxu0 }
 0xc95   : > { %8903 = vmatprep.subr.msk.bf16.mxu0 %vm9712_vm2, %v8901_v2  ;;  %v4457_v12 = vadd.f32 %v6815_v26, %v4456_v61 }
 0xc96   : > { %8906 = vmatpush3.bf16.xpose.msk.msra.mxu0 %vm9712_vm2, %v8901_v2 }
 0xc97   : > { %v8907_v44 = vpack.c.bf16 %v4462_v11, %v4457_v12  ;;  %v8291_v20 = vpop.f32.mrb[132].mxu0 }
 0xc98   : > { %v4472_v24 = vadd.f32 %v8291_v20, %v6815_v26  ;;  %v4466_v0 = vpop.f32.mrb[133].mxu0 }
 0xc99   : > { %8909 = vmatprep.subr.msk.bf16.mxu0 %vm9712_vm2, %v8907_v44  ;;  %v4467_v42 = vadd.f32 %v6815_v26, %v4466_v0 }
 0xc9b   : > { %v8913_v25 = vpack.c.bf16 %v4472_v24, %v4467_v42  ;;  %v8294_v41 = vpop.f32.mrb[134].mxu0 }
 0xc9c   : > { %v4482_v53 = vadd.f32 %v8294_v41, %v6815_v26  ;;  %v4476_v40 = vpop.f32.mrb[135].mxu0 }
 0xc9d   : > { %v4477_v50 = vadd.f32 %v6815_v26, %v4476_v40 }
 0xc9e   : > { %8912 = vmatpush3.bf16.xpose.msk.msra.mxu0 %vm9712_vm2, %v8907_v44 }
 0xc9f   : > { %8915 = vmatprep.subr.msk.bf16.mxu0 %vm9712_vm2, %v8913_v25  ;;  %v8919_v9 = vpack.c.bf16 %v4482_v53, %v4477_v50  ;;  %v8297_v62 = vpop.f32.mrb[136].mxu0 }
 0xca0   : > { %v4492_v51 = vadd.f32 %v8297_v62, %v6815_v26  ;;  %v4486_v54 = vpop.f32.mrb[137].mxu0 }
 0xca1   : > { %v4487_v59 = vadd.f32 %v6815_v26, %v4486_v54 }
 0xca3   : > { %v8925_v4 = vpack.c.bf16 %v4492_v51, %v4487_v59  ;;  %v8300_v1 = vpop.f32.mrb[138].mxu0 }
 0xca4   : > { %v4502_v34 = vadd.f32 %v8300_v1, %v6815_v26  ;;  %v4496_v57 = vpop.f32.mrb[139].mxu0 }
 0xca5   : > { %v4497_v5 = vadd.f32 %v6815_v26, %v4496_v57 }
 0xca6   : > { %8918 = vmatpush3.bf16.xpose.msk.msra.mxu0 %vm9712_vm2, %v8913_v25  ;;  %v11195_v25 = vld [vmem:[%s11997_s2 + $0xb] ss:$0 sm:$0xff] }
 0xca7   : > { %8921 = vmatprep.subr.msk.bf16.mxu0 %vm9712_vm2, %v8919_v9  ;;  %v8931_v28 = vpack.c.bf16 %v4502_v34, %v4497_v5  ;;  %v8303_v49 = vpop.f32.mrb[140].mxu0 }
 0xca8   : > { %v4512_v52 = vadd.f32 %v8303_v49, %v6815_v26  ;;  %v4506_v47 = vpop.f32.mrb[141].mxu0 }
 0xca9   : > { %v4507_v56 = vadd.f32 %v6815_v26, %v4506_v47 }
 0xcab   : > { %v8937_v31 = vpack.c.bf16 %v4512_v52, %v4507_v56  ;;  %v8306_v21 = vpop.f32.mrb[142].mxu0 }
 0xcac   : > { %v4522_v2 = vadd.f32 %v8306_v21, %v6815_v26  ;;  %v4516_v14 = vpop.f32.mrb[143].mxu0 }
 0xcad   : > { %v4517_v11 = vadd.f32 %v6815_v26, %v4516_v14 }
 0xcae   : > { %8924 = vmatpush3.bf16.xpose.msk.msra.mxu0 %vm9712_vm2, %v8919_v9 }
 0xcaf   : > { %8927 = vmatprep.subr.msk.bf16.mxu0 %vm9712_vm2, %v8925_v4  ;;  %v8943_v61 = vpack.c.bf16 %v4522_v2, %v4517_v11 }
 0xcb6   : > { %8930 = vmatpush3.bf16.xpose.msk.msra.mxu0 %vm9712_vm2, %v8925_v4 }
 0xcb7   : > { %8933 = vmatprep.subr.msk.bf16.mxu0 %vm9712_vm2, %v8931_v28 }
 0xcbe   : > { %8936 = vmatpush3.bf16.xpose.msk.msra.mxu0 %vm9712_vm2, %v8931_v28 }
 0xcbf   : > { %8939 = vmatprep.subr.msk.bf16.mxu0 %vm9712_vm2, %v8937_v31 }
 0xcc6   : > { %8942 = vmatpush3.bf16.xpose.msk.msra.mxu0 %vm9712_vm2, %v8937_v31 }
 0xcc7   : > { %8945 = vmatprep.subr.msk.bf16.mxu0 %vm9712_vm2, %v8943_v61 }
 0xcce   : > { %8948 = vmatpush3.bf16.xpose.msk.msra.mxu0 %vm9712_vm2, %v8943_v61 }
 0xcd5   : > { %8372 = vmatmul.mubr.msk.f32.vlgmr.msra.gmra.mrb[144].mxu0 %vm979_vm1, %v11006_v60  ;;  %v6793_v60 = vld [vmem:[%s11996_s1 + $0x168] sm:$0xff] }
 0xcd6   : > { %8374 = vmatprep.mubr.msk.f32.mxu0 %vm979_vm1, %v11011_v36  ;;  %v8893_v36 = vpack.c.bf16 %v6793_v60, %v6792_v37 }
 0xcd8   : > { %8894 = vmatprep.subr.bf16.mxu1 %v8893_v36 }
 0xcd9   : > { %8375 = vmatmul.mubr.msk.f32.gmra.mrb[146].mxu0 %vm979_vm1, %v11008_v30  ;;  %v6794_v30 = vld [vmem:[%s11996_s1 + $0x170] sm:$0xff]  ;;  %8896 = vmatpush3.bf16.msra.mxu1 %v8893_v36 }
 0xcda   : > { %8377 = vmatprep.mubr.msk.f32.mxu0 %vm979_vm1, %v11015_v22 }
 0xcdd   : > { %8378 = vmatmul.mubr.msk.f32.gmra.mrb[148].mxu0 %vm979_vm1, %v11013_v46  ;;  %v6795_v46 = vld [vmem:[%s11996_s1 + $0x178] sm:$0xff] }
 0xcde   : > { %8380 = vmatprep.mubr.msk.f32.mxu0 %vm979_vm1, %v11019_v43  ;;  %v8897_v22 = vpack.c.bf16 %v6795_v46, %v6794_v30 }
 0xce0   : > { %8898 = vmatprep.subr.bf16.mxu1 %v8897_v22 }
 0xce1   : > { %8381 = vmatmul.mubr.msk.f32.gmra.mrb[150].mxu0 %vm979_vm1, %v11017_v8  ;;  %8900 = vmatpush3.bf16.msra.mxu1 %v8897_v22 }
 0xce2   : > { %8383 = vmatprep.mubr.msk.f32.mxu0 %vm979_vm1, %v11023_v32 }
 0xce4   : > { %8316 = vmatmul.mubr.msk.f32.vlgmr.msra.gmra.mrb[144].mxu1 %vm479_vm0, %v10670_v23 }
 0xce5   : > { %8384 = vmatmul.mubr.msk.f32.gmra.mrb[152].mxu0 %vm979_vm1, %v11021_v48  ;;  %8318 = vmatprep.mubr.msk.f32.mxu1 %vm479_vm0, %v10675_v58 }
 0xce6   : > { %8386 = vmatprep.mubr.msk.f32.mxu0 %vm979_vm1, %v11027_v38 }
 0xce8   : > { %8319 = vmatmul.mubr.msk.f32.gmra.mrb[146].mxu1 %vm479_vm0, %v10680_v27 }
 0xce9   : > { %8387 = vmatmul.mubr.msk.f32.gmra.mrb[154].mxu0 %vm979_vm1, %v11025_v15  ;;  %8321 = vmatprep.mubr.msk.f32.mxu1 %vm479_vm0, %v10685_v19 }
 0xcea   : > { %8389 = vmatprep.mubr.msk.f32.mxu0 %vm979_vm1, %v11031_v29 }
 0xcec   : > { %8322 = vmatmul.mubr.msk.f32.gmra.mrb[148].mxu1 %vm479_vm0, %v10690_v18 }
 0xced   : > { %8390 = vmatmul.mubr.msk.f32.gmra.mrb[156].mxu0 %vm979_vm1, %v11029_v3  ;;  %8324 = vmatprep.mubr.msk.f32.mxu1 %vm479_vm0, %v10695_v39 }
 0xcee   : > { %8392 = vmatprep.mubr.msk.f32.mxu0 %vm979_vm1, %v11035_v55 }
 0xcf0   : > { %8325 = vmatmul.mubr.msk.f32.gmra.mrb[150].mxu1 %vm479_vm0, %v10700_v13 }
 0xcf1   : > { %8393 = vmatmul.mubr.msk.f32.gmra.mrb[158].mxu0 %vm979_vm1, %v11033_v33  ;;  %8327 = vmatprep.mubr.msk.f32.mxu1 %vm479_vm0, %v10705_v16 }
 0xcf4   : > { %8328 = vmatmul.mubr.msk.f32.gmra.mrb[152].mxu1 %vm479_vm0, %v10710_v6 }
 0xcf5   : > { %8330 = vmatprep.mubr.msk.f32.mxu1 %vm479_vm0, %v10715_v7 }
 0xcf8   : > { %8331 = vmatmul.mubr.msk.f32.gmra.mrb[154].mxu1 %vm479_vm0, %v10720_v17 }
 0xcf9   : > { %8333 = vmatprep.mubr.msk.f32.mxu1 %vm479_vm0, %v10725_v63 }
 0xcfc   : > { %8334 = vmatmul.mubr.msk.f32.gmra.mrb[156].mxu1 %vm479_vm0, %v10933_v35 }
 0xcfd   : > { %8336 = vmatprep.mubr.msk.f32.mxu1 %vm479_vm0, %v10938_v45 }
 0xd00   : > { %8337 = vmatmul.mubr.msk.f32.gmra.mrb[158].mxu1 %vm479_vm0, %v10943_v10 }
 0xda8   : > { %v8373_v23 = vpop.f32.mrb[144].mxu0 }
 0xda9   : > { %v11144_v58 = vmul.f32 0.35355338, %v8373_v23  ;;  %v4840_v27 = vpop.f32.mrb[145].mxu0 }
 0xdaa   : > { %v11146_v19 = vmul.f32 0.35355338, %v4840_v27 }
 0xdab   : > { %4937 = vmax.xlane.f32.xlu1 %v11144_v58 }
 0xdac   : > { %4935 = vmax.xlane.f32.xlu0 %v11146_v19  ;;  %v8376_v18 = vpop.f32.mrb[146].mxu0 }
 0xdad   : > { %v11150_v39 = vmul.f32 0.35355338, %v8376_v18  ;;  %v4850_v13 = vpop.f32.mrb[147].mxu0 }
 0xdae   : > { %v11152_v16 = vmul.f32 0.35355338, %v4850_v13 }
 0xdaf   : > { %4941 = vmax.xlane.f32.xlu1 %v11150_v39 }
 0xdb0   : > { %4939 = vmax.xlane.f32.xlu0 %v11152_v16  ;;  %v8379_v6 = vpop.f32.mrb[148].mxu0 }
 0xdb1   : > { %v11156_v7 = vmul.f32 0.35355338, %v8379_v6  ;;  %v4860_v17 = vpop.f32.mrb[149].mxu0 }
 0xdb2   : > { %v11158_v63 = vmul.f32 0.35355338, %v4860_v17 }
 0xdb3   : > { %4945 = vmax.xlane.f32.xlu1 %v11156_v7 }
 0xdb4   : > { %4943 = vmax.xlane.f32.xlu0 %v11158_v63  ;;  %v8382_v35 = vpop.f32.mrb[150].mxu0 }
 0xdb5   : > { %v11162_v45 = vmul.f32 0.35355338, %v8382_v35  ;;  %v4870_v10 = vpop.f32.mrb[151].mxu0 }
 0xdb6   : > { %v11164_v8 = vmul.f32 0.35355338, %v4870_v10 }
 0xdb7   : > { %4949 = vmax.xlane.f32.xlu1 %v11162_v45  ;;  %v8317_v41 = vpop.f32.mrb[144].mxu1 }
 0xdb8   : > { %4947 = vmax.xlane.f32.xlu0 %v11164_v8  ;;  %v8385_v43 = vpop.f32.mrb[152].mxu0  ;;  %v4605_v53 = vadd.f32 %v8317_v41, %v11195_v25  ;;  %v4599_v40 = vpop.f32.mrb[145].mxu1 }
 0xdb9   : > { %v11168_v48 = vmul.f32 0.35355338, %v8385_v43  ;;  %v4880_v32 = vpop.f32.mrb[153].mxu0  ;;  %v4600_v50 = vadd.f32 %v11195_v25, %v4599_v40 }
 0xdba   : > { %v11170_v15 = vmul.f32 0.35355338, %v4880_v32 }
 0xdbb   : > { %4953 = vmax.xlane.f32.xlu1 %v11168_v48  ;;  %v8949_v9 = vpack.c.bf16 %v4605_v53, %v4600_v50  ;;  %v8320_v62 = vpop.f32.mrb[146].mxu1 }
 0xdbc   : > { %4951 = vmax.xlane.f32.xlu0 %v11170_v15  ;;  %v8388_v38 = vpop.f32.mrb[154].mxu0  ;;  %v4615_v51 = vadd.f32 %v8320_v62, %v11195_v25  ;;  %v4609_v54 = vpop.f32.mrb[147].mxu1 }
 0xdbd   : > { %v11174_v3 = vmul.f32 0.35355338, %v8388_v38  ;;  %v4890_v29 = vpop.f32.mrb[155].mxu0  ;;  %v4610_v59 = vadd.f32 %v11195_v25, %v4609_v54  ;;  %8950 = vmatprep.subr.bf16.mxu1 %v8949_v9 }
 0xdbe   : > { %v11176_v33 = vmul.f32 0.35355338, %v4890_v29  ;;  %8952 = vmatpush3.bf16.msra.mxu1 %v8949_v9 }
 0xdbf   : > { %4957 = vmax.xlane.f32.xlu1 %v11174_v3  ;;  %v8953_v4 = vpack.c.bf16 %v4615_v51, %v4610_v59  ;;  %v8323_v1 = vpop.f32.mrb[148].mxu1 }
 0xdc0   : > { %4955 = vmax.xlane.f32.xlu0 %v11176_v33  ;;  %v8391_v55 = vpop.f32.mrb[156].mxu0  ;;  %v4625_v34 = vadd.f32 %v8323_v1, %v11195_v25  ;;  %v4619_v57 = vpop.f32.mrb[149].mxu1 }
 0xdc1   : > { %v11180_v26 = vmul.f32 0.35355338, %v8391_v55  ;;  %v4900_v12 = vpop.f32.mrb[157].mxu0  ;;  %v4620_v5 = vadd.f32 %v11195_v25, %v4619_v57  ;;  %8954 = vmatprep.subr.bf16.mxu1 %v8953_v4 }
 0xdc2   : > { %v11182_v44 = vmul.f32 0.35355338, %v4900_v12  ;;  %8956 = vmatpush3.bf16.msra.mxu1 %v8953_v4 }
 0xdc3   : > { %4961 = vmax.xlane.f32.xlu1 %v11180_v26  ;;  %v8957_v28 = vpack.c.bf16 %v4625_v34, %v4620_v5  ;;  %v8326_v49 = vpop.f32.mrb[150].mxu1 }
 0xdc4   : > { %4959 = vmax.xlane.f32.xlu0 %v11182_v44  ;;  %v8394_v20 = vpop.f32.mrb[158].mxu0  ;;  %v4635_v52 = vadd.f32 %v8326_v49, %v11195_v25  ;;  %v4629_v47 = vpop.f32.mrb[151].mxu1 }
 0xdc5   : > { %v11186_v24 = vmul.f32 0.35355338, %v8394_v20  ;;  %v4910_v0 = vpop.f32.mrb[159].mxu0  ;;  %v4630_v56 = vadd.f32 %v11195_v25, %v4629_v47  ;;  %8958 = vmatprep.subr.bf16.mxu1 %v8957_v28 }
 0xdc6   : > { %v11188_v42 = vmul.f32 0.35355338, %v4910_v0  ;;  %8960 = vmatpush3.bf16.msra.mxu1 %v8957_v28 }
 0xdc7   : > { %4965 = vmax.xlane.f32.xlu1 %v11186_v24  ;;  %v8961_v31 = vpack.c.bf16 %v4635_v52, %v4630_v56  ;;  %v8329_v21 = vpop.f32.mrb[152].mxu1 }
 0xdc8   : > { %4963 = vmax.xlane.f32.xlu0 %v11188_v42  ;;  %v4645_v2 = vadd.f32 %v8329_v21, %v11195_v25  ;;  %v4639_v14 = vpop.f32.mrb[153].mxu1 }
 0xdc9   : > { %v4640_v61 = vadd.f32 %v11195_v25, %v4639_v14  ;;  %8962 = vmatprep.subr.bf16.mxu1 %v8961_v31 }
 0xdca   : > { %8964 = vmatpush3.bf16.msra.mxu1 %v8961_v31 }
 0xdcb   : > { %v8965_v36 = vpack.c.bf16 %v4645_v2, %v4640_v61  ;;  %v8332_v46 = vpop.f32.mrb[154].mxu1 }
 0xdcc   : > { %v4655_v23 = vadd.f32 %v8332_v46, %v11195_v25  ;;  %v4649_v27 = vpop.f32.mrb[155].mxu1 }
 0xdcd   : > { %v4650_v6 = vadd.f32 %v11195_v25, %v4649_v27  ;;  %8966 = vmatprep.subr.bf16.mxu1 %v8965_v36 }
 0xdce   : > { %8968 = vmatpush3.bf16.msra.mxu1 %v8965_v36 }
 0xdcf   : > { %v8335_v10 = vpop.f32.mrb[156].mxu1 }
 0xdd0   : > { %v4665_v32 = vadd.f32 %v8335_v10, %v11195_v25  ;;  %v4659_v38 = vpop.f32.mrb[157].mxu1 }
 0xdd1   : > { %v4660_v12 = vadd.f32 %v11195_v25, %v4659_v38 }
 0xdd3   : > { %v8338_v27 = vpop.f32.mrb[158].mxu1 }
 0xe38   : > { %v4938_v11 = vpop.xlane.xlu1 %4937 }
 0xe39   : > { %v4968_v37 = vsub.f32 %v11144_v58, %v4938_v11  ;;  %v4936_v60 = vpop.xlane.xlu0 %4935 }
 0xe3a   : > { %v4967_v30 = vsub.f32 %v11146_v19, %v4936_v60  ;;  %v8969_v19 = vpack.c.bf16 %v4655_v23, %v4650_v6 }
 0xe3b   : > { %v4985_v22 = vmul.f32 1.442695, %v4968_v37 }
 0xe3c   : > { %v4983_v18 = vmul.f32 1.442695, %v4967_v30  ;;  %v4942_v13 = vpop.xlane.xlu1 %4941  ;;  %8970 = vmatprep.subr.bf16.mxu1 %v8969_v19 }
 0xe3d   : > { %9285 = vpow2.f32 %v4985_v22  ;;  %v4970_v17 = vsub.f32 %v11150_v39, %v4942_v13  ;;  %v4940_v35 = vpop.xlane.xlu0 %4939  ;;  %8972 = vmatpush3.bf16.msra.mxu1 %v8969_v19 }
 0xe3e   : > { %9287 = vpow2.f32 %v4983_v18  ;;  %v4969_v58 = vsub.f32 %v11152_v16, %v4940_v35  ;;  %v8973_v16 = vpack.c.bf16 %v4665_v32, %v4660_v12  ;;  %v4669_v18 = vpop.f32.mrb[159].mxu1 }
 0xe3f   : > { %v4989_v43 = vmul.f32 1.442695, %v4970_v17  ;;  %v4670_v6 = vadd.f32 %v11195_v25, %v4669_v18 }
 0xe40   : > { %v4987_v29 = vmul.f32 1.442695, %v4969_v58  ;;  %v4946_v55 = vpop.xlane.xlu1 %4945  ;;  %8974 = vmatprep.subr.bf16.mxu1 %v8973_v16 }
 0xe41   : > { %9289 = vpow2.f32 %v4989_v43  ;;  %v4972_v20 = vsub.f32 %v11156_v7, %v4946_v55  ;;  %v4944_v39 = vpop.xlane.xlu0 %4943  ;;  %8976 = vmatpush3.bf16.msra.mxu1 %v8973_v16 }
 0xe42   : > { %9291 = vpow2.f32 %v4987_v29  ;;  %v4971_v0 = vsub.f32 %v11158_v63, %v4944_v39 }
 0xe43   : > { %v4993_v41 = vmul.f32 1.442695, %v4972_v20 }
 0xe44   : > { %v4991_v53 = vmul.f32 1.442695, %v4971_v0  ;;  %v4950_v40 = vpop.xlane.xlu1 %4949 }
 0xe45   : > { %9293 = vpow2.f32 %v4993_v41  ;;  %v4974_v50 = vsub.f32 %v11162_v45, %v4950_v40  ;;  %v4948_v9 = vpop.xlane.xlu0 %4947 }
 0xe46   : > { %9295 = vpow2.f32 %v4991_v53  ;;  %v4973_v62 = vsub.f32 %v11164_v8, %v4948_v9 }
 0xe47   : > { %v11219_v51 = vpop.eup %9285  ;;  %v4997_v7 = vmul.f32 1.442695, %v4974_v50 }
 0xe48   : > { %v11221_v54 = vpop.eup %9287  ;;  %v4995_v59 = vmul.f32 1.442695, %v4973_v62  ;;  %v4954_v63 = vpop.xlane.xlu1 %4953  ;;  %5017 = vadd.xlane.f32.xlu1 %v11219_v51 }
 0xe49   : > { %9297 = vpow2.f32 %v4997_v7  ;;  %v4976_v4 = vsub.f32 %v11168_v48, %v4954_v63  ;;  %v4952_v1 = vpop.xlane.xlu0 %4951  ;;  %5015 = vadd.xlane.f32.xlu0 %v11221_v54 }
 0xe4a   : > { %9299 = vpow2.f32 %v4995_v59  ;;  %v4975_v45 = vsub.f32 %v11170_v15, %v4952_v1 }
 0xe4b   : > { %v11227_v34 = vpop.eup %9289  ;;  %v5001_v8 = vmul.f32 1.442695, %v4976_v4 }
 0xe4c   : > { %v11229_v57 = vpop.eup %9291  ;;  %v4999_v5 = vmul.f32 1.442695, %v4975_v45  ;;  %v4958_v28 = vpop.xlane.xlu1 %4957  ;;  %5021 = vadd.xlane.f32.xlu1 %v11227_v34 }
 0xe4d   : > { %9301 = vpow2.f32 %v5001_v8  ;;  %v4978_v49 = vsub.f32 %v11174_v3, %v4958_v28  ;;  %v4956_v52 = vpop.xlane.xlu0 %4955  ;;  %5019 = vadd.xlane.f32.xlu0 %v11229_v57 }
 0xe4e   : > { %9303 = vpow2.f32 %v4999_v5  ;;  %v4977_v48 = vsub.f32 %v11176_v33, %v4956_v52 }
 0xe4f   : > { %v11235_v47 = vpop.eup %9293  ;;  %v5005_v15 = vmul.f32 1.442695, %v4978_v49 }
 0xe50   : > { %v11237_v56 = vpop.eup %9295  ;;  %v5003_v31 = vmul.f32 1.442695, %v4977_v48  ;;  %v4962_v21 = vpop.xlane.xlu1 %4961  ;;  %5025 = vadd.xlane.f32.xlu1 %v11235_v47 }
 0xe51   : > { %9305 = vpow2.f32 %v5005_v15  ;;  %v4980_v2 = vsub.f32 %v11180_v26, %v4962_v21  ;;  %v4960_v14 = vpop.xlane.xlu0 %4959  ;;  %5023 = vadd.xlane.f32.xlu0 %v11237_v56 }
 0xe52   : > { %9307 = vpow2.f32 %v5003_v31  ;;  %v4979_v3 = vsub.f32 %v11182_v44, %v4960_v14 }
 0xe53   : > { %v11243_v11 = vpop.eup %9297  ;;  %v5009_v33 = vmul.f32 1.442695, %v4980_v2 }
 0xe54   : > { %v11245_v61 = vpop.eup %9299  ;;  %v5007_v37 = vmul.f32 1.442695, %v4979_v3  ;;  %5029 = vadd.xlane.f32.xlu1 %v11243_v11  ;;  %v4966_v60 = vpop.xlane.xlu1 %4965 }
 0xe55   : > { %9309 = vpow2.f32 %v5009_v33  ;;  %v4982_v30 = vsub.f32 %v11186_v24, %v4966_v60  ;;  %5027 = vadd.xlane.f32.xlu0 %v11245_v61  ;;  %v4964_v26 = vpop.xlane.xlu0 %4963 }
 0xe56   : > { %9311 = vpow2.f32 %v5007_v37  ;;  %v4981_v36 = vsub.f32 %v11188_v42, %v4964_v26  ;;  %v4675_v42 = vadd.f32 %v8338_v27, %v11195_v25  ;;  %v6882_v25 = vld [vmem:[%s11998_s3 + $0x18] sm:$0xff] }
 0xe57   : > { %v11251_v46 = vpop.eup %9301  ;;  %v5013_v44 = vmul.f32 1.442695, %v4982_v30  ;;  %8451 = vmatprep.subr.mxu0 %v6882_v25 }
 0xe58   : > { %v11253_v22 = vpop.eup %9303  ;;  %v5011_v23 = vmul.f32 1.442695, %v4981_v36  ;;  %5033 = vadd.xlane.f32.xlu1 %v11251_v46  ;;  %v8977_v17 = vpack.c.bf16 %v4675_v42, %v4670_v6  ;;  %8452 = vmatpush3.msra.mxu0 %v6882_v25 }
 0xe59   : > { %9313 = vpow2.f32 %v5013_v44  ;;  %5031 = vadd.xlane.f32.xlu0 %v11253_v22 }
 0xe5a   : > { %9315 = vpow2.f32 %v5011_v23  ;;  %8978 = vmatprep.subr.bf16.mxu1 %v8977_v17 }
 0xe5b   : > { %v11257_v24 = vpop.eup %9305  ;;  %8980 = vmatpush3.bf16.msra.mxu1 %v8977_v17 }
 0xe5c   : > { %v11259_v13 = vpop.eup %9307  ;;  %5037 = vadd.xlane.f32.xlu1 %v11257_v24 }
 0xe5d   : > { %5035 = vadd.xlane.f32.xlu0 %v11259_v13 }
 0xe5f   : > { %v11265_v35 = vpop.eup %9309 }
 0xe60   : > { %v11267_v58 = vpop.eup %9311  ;;  %5041 = vadd.xlane.f32.xlu1 %v11265_v35 }
 0xe61   : > { %5039 = vadd.xlane.f32.xlu0 %v11267_v58 }
 0xe63   : > { %v11271_v19 = vpop.eup %9313 }
 0xe64   : > { %v11273_v10 = vpop.eup %9315  ;;  %5045 = vadd.xlane.f32.xlu1 %v11271_v19 }
 0xe65   : > { %5043 = vadd.xlane.f32.xlu0 %v11273_v10 }
 0xed5   : > { %v5018_v43 = vpop.xlane.xlu1 %5017 }
 0xed6   : > { %9317 = vrcp.f32 %v5018_v43  ;;  %v5016_v32 = vpop.xlane.xlu0 %5015  ;;  %v11315_v43 = vld [vmem:[%s11999_s4] ss:$0 sm:$0xff] }
 0xed7   : > { %9319 = vrcp.f32 %v5016_v32 }
 0xed9   : > { %v5022_v38 = vpop.xlane.xlu1 %5021 }
 0xeda   : > { %9321 = vrcp.f32 %v5022_v38  ;;  %v5020_v29 = vpop.xlane.xlu0 %5019 }
 0xedb   : > { %9323 = vrcp.f32 %v5020_v29 }
 0xedd   : > { %v5026_v55 = vpop.xlane.xlu1 %5025 }
 0xede   : > { %9325 = vrcp.f32 %v5026_v55  ;;  %v5024_v12 = vpop.xlane.xlu0 %5023 }
 0xedf   : > { %9327 = vrcp.f32 %v5024_v12  ;;  %v9445_v12 = vld [vmem:[%s9579_s14 + $0x8] sm:$0xff] }
 0xee0   : > { %v9318_v20 = vpop.eup %9317 }
 0xee1   : > { %v9320_v39 = vpop.eup %9319  ;;  %v5030_v0 = vpop.xlane.xlu1 %5029  ;;  %v5050_v53 = vmul.f32 %v9318_v20, %v11219_v51 }
 0xee2   : > { %9329 = vrcp.f32 %v5030_v0  ;;  %v5028_v16 = vpop.xlane.xlu0 %5027  ;;  %v5048_v41 = vmul.f32 %v9320_v39, %v11221_v54  ;;  %v9446_v39 = vld [vmem:[%s9579_s14] sm:$0xff] }
 0xee3   : > { %9331 = vrcp.f32 %v5028_v16 }
 0xee4   : > { %v9322_v40 = vpop.eup %9321  ;;  %8427 = vmatprep.mubr.f32.mxu1 %v5048_v41 }
 0xee5   : > { %v9324_v50 = vpop.eup %9323  ;;  %v5034_v9 = vpop.xlane.xlu1 %5033  ;;  %8428 = vmatmul.mubr.f32.vlgmr.msra.gmra.mrb[160].mxu1 %v5050_v53  ;;  %v5054_v59 = vmul.f32 %v9322_v40, %v11227_v34 }
 0xee6   : > { %9333 = vrcp.f32 %v5034_v9  ;;  %v5032_v62 = vpop.xlane.xlu0 %5031  ;;  %v5052_v7 = vmul.f32 %v9324_v50, %v11229_v57 }
 0xee7   : > { %9335 = vrcp.f32 %v5032_v62  ;;  %v9447_v62 = vld [vmem:[%s9579_s14 + $0x18] sm:$0xff] }
 0xee8   : > { %v9326_v63 = vpop.eup %9325  ;;  %8430 = vmatprep.mubr.f32.mxu1 %v5052_v7 }
 0xee9   : > { %v9328_v4 = vpop.eup %9327  ;;  %v5038_v1 = vpop.xlane.xlu1 %5037  ;;  %8431 = vmatmul.mubr.f32.gmra.mrb[162].mxu1 %v5054_v59  ;;  %v5058_v45 = vmul.f32 %v9326_v63, %v11235_v47  ;;  %v9448_v59 = vld [vmem:[%s9579_s14 + $0x10] sm:$0xff] }
 0xeea   : > { %9337 = vrcp.f32 %v5038_v1  ;;  %v5036_v51 = vpop.xlane.xlu0 %5035  ;;  %v5056_v54 = vmul.f32 %v9328_v4, %v11237_v56 }
 0xeeb   : > { %9339 = vrcp.f32 %v5036_v51 }
 0xeec   : > { %v9330_v8 = vpop.eup %9329  ;;  %8433 = vmatprep.mubr.f32.mxu1 %v5056_v54 }
 0xeed   : > { %v9332_v5 = vpop.eup %9331  ;;  %v5042_v28 = vpop.xlane.xlu1 %5041  ;;  %8434 = vmatmul.mubr.f32.gmra.mrb[164].mxu1 %v5058_v45  ;;  %v5062_v49 = vmul.f32 %v9330_v8, %v11243_v11 }
 0xeee   : > { %9341 = vrcp.f32 %v5042_v28  ;;  %v5040_v57 = vpop.xlane.xlu0 %5039  ;;  %v5060_v34 = vmul.f32 %v9332_v5, %v11245_v61  ;;  %v9449_v5 = vld [vmem:[%s9579_s14 + $0x28] sm:$0xff] }
 0xeef   : > { %9343 = vrcp.f32 %v5040_v57  ;;  %v9450_v57 = vld [vmem:[%s9579_s14 + $0x20] sm:$0xff] }
 0xef0   : > { %v9334_v52 = vpop.eup %9333  ;;  %8436 = vmatprep.mubr.f32.mxu1 %v5060_v34 }
 0xef1   : > { %v9336_v48 = vpop.eup %9335  ;;  %v5046_v15 = vpop.xlane.xlu1 %5045  ;;  %8437 = vmatmul.mubr.f32.gmra.mrb[166].mxu1 %v5062_v49  ;;  %v5066_v31 = vmul.f32 %v9334_v52, %v11251_v46 }
 0xef2   : > { %9345 = vrcp.f32 %v5046_v15  ;;  %v5044_v56 = vpop.xlane.xlu0 %5043  ;;  %v5064_v47 = vmul.f32 %v9336_v48, %v11253_v22 }
 0xef3   : > { %9347 = vrcp.f32 %v5044_v56 }
 0xef4   : > { %v9338_v21 = vpop.eup %9337  ;;  %8439 = vmatprep.mubr.f32.mxu1 %v5064_v47 }
 0xef5   : > { %v9340_v2 = vpop.eup %9339  ;;  %8440 = vmatmul.mubr.f32.gmra.mrb[168].mxu1 %v5066_v31  ;;  %v5070_v3 = vmul.f32 %v9338_v21, %v11257_v24  ;;  %v9451_v31 = vld [vmem:[%s9579_s14 + $0x38] sm:$0xff] }
 0xef6   : > { %v5068_v14 = vmul.f32 %v9340_v2, %v11259_v13  ;;  %v9452_v2 = vld [vmem:[%s9579_s14 + $0x30] sm:$0xff] }
 0xef8   : > { %v9342_v11 = vpop.eup %9341  ;;  %8442 = vmatprep.mubr.f32.mxu1 %v5068_v14 }
 0xef9   : > { %v9344_v33 = vpop.eup %9343  ;;  %8443 = vmatmul.mubr.f32.gmra.mrb[170].mxu1 %v5070_v3  ;;  %v5074_v37 = vmul.f32 %v9342_v11, %v11265_v35 }
 0xefa   : > { %v5072_v61 = vmul.f32 %v9344_v33, %v11267_v58 }
 0xefc   : > { %v9346_v60 = vpop.eup %9345  ;;  %8445 = vmatprep.mubr.f32.mxu1 %v5072_v61 }
 0xefd   : > { %v9348_v30 = vpop.eup %9347  ;;  %8446 = vmatmul.mubr.f32.gmra.mrb[172].mxu1 %v5074_v37  ;;  %v5078_v36 = vmul.f32 %v9346_v60, %v11271_v19 }
 0xefe   : > { %v5076_v26 = vmul.f32 %v9348_v30, %v11273_v10  ;;  %v9453_v30 = vld [vmem:[%s9579_s14 + $0x48] sm:$0xff] }
 0xf00   : > { %8448 = vmatprep.mubr.f32.mxu1 %v5076_v26 }
 0xf01   : > { %8449 = vmatmul.mubr.f32.gmra.mrb[174].mxu1 %v5078_v36  ;;  %v9454_v36 = vld [vmem:[%s9579_s14 + $0x40] sm:$0xff] }
 0xfb8   : > { %v8429_v46 = vpop.f32.mrb[160].mxu1 }
 0xfb9   : > { %v5145_v44 = vpop.f32.mrb[161].mxu1 }
 0xfba   : > { %8453 = vmatprep.mubr.msk.f32.mxu0 %vm979_vm1, %v5145_v44 }
 0xfbb   : > { %8454 = vmatmul.mubr.msk.f32.vlgmr.msra.gmra.mrb[48].mxu0 %vm979_vm1, %v8429_v46 }
 0xfbc   : > { %v8432_v22 = vpop.f32.mrb[162].mxu1 }
 0xfbd   : > { %v5155_v23 = vpop.f32.mrb[163].mxu1 }
 0xfbe   : > { %8456 = vmatprep.mubr.msk.f32.mxu0 %vm979_vm1, %v5155_v23 }
 0xfbf   : > { %8457 = vmatmul.mubr.msk.f32.gmra.mrb[50].mxu0 %vm979_vm1, %v8432_v22 }
 0xfc0   : > { %v8435_v27 = vpop.f32.mrb[164].mxu1 }
 0xfc1   : > { %v5165_v24 = vpop.f32.mrb[165].mxu1 }
 0xfc2   : > { %8459 = vmatprep.mubr.msk.f32.mxu0 %vm979_vm1, %v5165_v24 }
 0xfc3   : > { %8460 = vmatmul.mubr.msk.f32.gmra.mrb[52].mxu0 %vm979_vm1, %v8435_v27 }
 0xfc4   : > { %v8438_v18 = vpop.f32.mrb[166].mxu1 }
 0xfc5   : > { %v5175_v13 = vpop.f32.mrb[167].mxu1 }
 0xfc6   : > { %8462 = vmatprep.mubr.msk.f32.mxu0 %vm979_vm1, %v5175_v13  ;;  %v9455_v13 = vld [vmem:[%s9579_s14 + $0x58] sm:$0xff] }
 0xfc7   : > { %8463 = vmatmul.mubr.msk.f32.gmra.mrb[54].mxu0 %vm979_vm1, %v8438_v18 }
 0xfc8   : > { %v8441_v42 = vpop.f32.mrb[168].mxu1 }
 0xfc9   : > { %v5185_v6 = vpop.f32.mrb[169].mxu1 }
 0xfca   : > { %8465 = vmatprep.mubr.msk.f32.mxu0 %vm979_vm1, %v5185_v6  ;;  %v9456_v6 = vld [vmem:[%s9579_s14 + $0x50] sm:$0xff] }
 0xfcb   : > { %8466 = vmatmul.mubr.msk.f32.gmra.mrb[56].mxu0 %vm979_vm1, %v8441_v42 }
 0xfcc   : > { %v8444_v17 = vpop.f32.mrb[170].mxu1 }
 0xfcd   : > { %v5195_v35 = vpop.f32.mrb[171].mxu1 }
 0xfce   : > { %8468 = vmatprep.mubr.msk.f32.mxu0 %vm979_vm1, %v5195_v35 }
 0xfcf   : > { %8469 = vmatmul.mubr.msk.f32.gmra.mrb[58].mxu0 %vm979_vm1, %v8444_v17 }
 0xfd0   : > { %v8447_v58 = vpop.f32.mrb[172].mxu1 }
 0xfd1   : > { %v5205_v19 = vpop.f32.mrb[173].mxu1 }
 0xfd2   : > { %8471 = vmatprep.mubr.msk.f32.mxu0 %vm979_vm1, %v5205_v19 }
 0xfd3   : > { %8472 = vmatmul.mubr.msk.f32.gmra.mrb[60].mxu0 %vm979_vm1, %v8447_v58 }
 0xfd4   : > { %v8450_v10 = vpop.f32.mrb[174].mxu1 }
 0xfd5   : > { %v5215_v25 = vpop.f32.mrb[175].mxu1 }
 0xfd6   : > { %8474 = vmatprep.mubr.msk.f32.mxu0 %vm979_vm1, %v5215_v25 }
 0xfd7   : > { %8475 = vmatmul.mubr.msk.f32.gmra.mrb[62].mxu0 %vm979_vm1, %v8450_v10 }
0x108e   : > { %v8455_v32 = vpop.f32.mrb[48].mxu0 }
0x108f   : > { %v9021_v38 = vadd.f32 %v8455_v32, %v11315_v43  ;;  %v5340_v29 = vpop.f32.mrb[49].mxu0 }
0x1090   : > { %v9022_v55 = vadd.f32 %v11315_v43, %v5340_v29 }
0x1091   : > { %v11320_v20 = vadd.f32 %v9445_v12, %v9021_v38  ;;  %v9457_v38 = vld [vmem:[%s9579_s14 + $0x68] sm:$0xff] }
0x1092   : > { %v11323_v0 = vadd.f32 %v9446_v39, %v9022_v55  ;;  %v8458_v16 = vpop.f32.mrb[50].mxu0  ;;  %v9458_v55 = vld [vmem:[%s9579_s14 + $0x60] sm:$0xff] }
0x1093   : > { %v9023_v41 = vadd.f32 %v8458_v16, %v11315_v43  ;;  %v5350_v53 = vpop.f32.mrb[51].mxu0  ;;  %v5456_v40 = vsel %vm479_vm0, %v11320_v20, 0.0 }
0x1094   : > { %v9024_v50 = vadd.f32 %v11315_v43, %v5350_v53  ;;  %5457 = vadd.xlane.f32.xlu1 %v5456_v40  ;;  %v5453_v9 = vsel %vm479_vm0, %v11323_v0, 0.0 }
0x1095   : > { %v11332_v7 = vadd.f32 %v9447_v62, %v9023_v41  ;;  %5454 = vadd.xlane.f32.xlu0 %v5453_v9  ;;  %v9459_v9 = vld [vmem:[%s9579_s14 + $0x78] sm:$0xff] }
0x1096   : > { %v11335_v63 = vadd.f32 %v9448_v59, %v9024_v50  ;;  %v8461_v4 = vpop.f32.mrb[52].mxu0  ;;  %v9460_v59 = vld [vmem:[%s9579_s14 + $0x70] sm:$0xff] }
0x1097   : > { %v9025_v1 = vadd.f32 %v8461_v4, %v11315_v43  ;;  %v5360_v51 = vpop.f32.mrb[53].mxu0  ;;  %v5462_v54 = vsel %vm479_vm0, %v11332_v7, 0.0 }
0x1098   : > { %v9026_v45 = vadd.f32 %v11315_v43, %v5360_v51  ;;  %5463 = vadd.xlane.f32.xlu1 %v5462_v54  ;;  %v5459_v8 = vsel %vm479_vm0, %v11335_v63, 0.0  ;;  %v5707_v54 = vld [vmem:[%s12002_s7 + $0x8] sm:$0xff] }
0x1099   : > { %v11344_v28 = vadd.f32 %v9449_v5, %v9025_v1  ;;  %5460 = vadd.xlane.f32.xlu0 %v5459_v8 }
0x109a   : > { %v11347_v34 = vadd.f32 %v9450_v57, %v9026_v45  ;;  %v8464_v49 = vpop.f32.mrb[54].mxu0 }
0x109b   : > { %v9027_v52 = vadd.f32 %v8464_v49, %v11315_v43  ;;  %v5370_v48 = vpop.f32.mrb[55].mxu0  ;;  %v5468_v15 = vsel %vm479_vm0, %v11344_v28, 0.0 }
0x109c   : > { %v9028_v56 = vadd.f32 %v11315_v43, %v5370_v48  ;;  %5469 = vadd.xlane.f32.xlu1 %v5468_v15  ;;  %v5465_v47 = vsel %vm479_vm0, %v11347_v34, 0.0 }
0x109d   : > { %v11356_v21 = vadd.f32 %v9451_v31, %v9027_v52  ;;  %5466 = vadd.xlane.f32.xlu0 %v5465_v47 }
0x109e   : > { %v11359_v14 = vadd.f32 %v9452_v2, %v9028_v56  ;;  %v8467_v3 = vpop.f32.mrb[56].mxu0 }
0x109f   : > { %v9029_v11 = vadd.f32 %v8467_v3, %v11315_v43  ;;  %v5380_v33 = vpop.f32.mrb[57].mxu0  ;;  %v5474_v61 = vsel %vm479_vm0, %v11356_v21, 0.0 }
0x10a0   : > { %v9030_v37 = vadd.f32 %v11315_v43, %v5380_v33  ;;  %5475 = vadd.xlane.f32.xlu1 %v5474_v61  ;;  %v5471_v60 = vsel %vm479_vm0, %v11359_v14, 0.0 }
0x10a1   : > { %v11368_v26 = vadd.f32 %v9453_v30, %v9029_v11  ;;  %5472 = vadd.xlane.f32.xlu0 %v5471_v60 }
0x10a2   : > { %v11371_v46 = vadd.f32 %v9454_v36, %v9030_v37  ;;  %v8470_v44 = vpop.f32.mrb[58].mxu0 }
0x10a3   : > { %v9031_v22 = vadd.f32 %v8470_v44, %v11315_v43  ;;  %v5390_v23 = vpop.f32.mrb[59].mxu0  ;;  %v5480_v27 = vsel %vm479_vm0, %v11368_v26, 0.0 }
0x10a4   : > { %v9032_v24 = vadd.f32 %v11315_v43, %v5390_v23  ;;  %5481 = vadd.xlane.f32.xlu1 %v5480_v27  ;;  %v5477_v18 = vsel %vm479_vm0, %v11371_v46, 0.0 }
0x10a5   : > { %v11380_v42 = vadd.f32 %v9455_v13, %v9031_v22  ;;  %5478 = vadd.xlane.f32.xlu0 %v5477_v18 }
0x10a6   : > { %v11383_v17 = vadd.f32 %v9456_v6, %v9032_v24  ;;  %v8473_v35 = vpop.f32.mrb[60].mxu0 }
0x10a7   : > { %v9033_v58 = vadd.f32 %v8473_v35, %v11315_v43  ;;  %v5400_v19 = vpop.f32.mrb[61].mxu0  ;;  %v5486_v10 = vsel %vm479_vm0, %v11380_v42, 0.0 }
0x10a8   : > { %v9034_v25 = vadd.f32 %v11315_v43, %v5400_v19  ;;  %5487 = vadd.xlane.f32.xlu1 %v5486_v10  ;;  %v5483_v32 = vsel %vm479_vm0, %v11383_v17, 0.0 }
0x10a9   : > { %v11392_v29 = vadd.f32 %v9457_v38, %v9033_v58  ;;  %5484 = vadd.xlane.f32.xlu0 %v5483_v32 }
0x10aa   : > { %v11395_v12 = vadd.f32 %v9458_v55, %v9034_v25  ;;  %v8476_v39 = vpop.f32.mrb[62].mxu0 }
0x10ab   : > { %v9035_v16 = vadd.f32 %v8476_v39, %v11315_v43  ;;  %v5410_v41 = vpop.f32.mrb[63].mxu0  ;;  %v5492_v53 = vsel %vm479_vm0, %v11392_v29, 0.0 }
0x10ac   : > { %v9036_v40 = vadd.f32 %v11315_v43, %v5410_v41  ;;  %5493 = vadd.xlane.f32.xlu1 %v5492_v53  ;;  %v5489_v50 = vsel %vm479_vm0, %v11395_v12, 0.0  ;;  %v5706_v43 = vld [vmem:[%s12002_s7] sm:$0xff] }
0x10ad   : > { %v11404_v62 = vadd.f32 %v9459_v9, %v9035_v16  ;;  %5490 = vadd.xlane.f32.xlu0 %v5489_v50  ;;  %v8981_v45 = vpack.c.bf16 %v5707_v54, %v5706_v43 }
0x10ae   : > { %v11407_v4 = vadd.f32 %v9460_v59, %v9036_v40 }
0x10af   : > { %v5498_v1 = vsel %vm479_vm0, %v11404_v62, 0.0  ;;  %8982 = vmatprep.subr.bf16.mxu1 %v8981_v45 }
0x10b0   : > { %5499 = vadd.xlane.f32.xlu1 %v5498_v1  ;;  %v5495_v51 = vsel %vm479_vm0, %v11407_v4, 0.0  ;;  %8984 = vmatpush3.bf16.msra.mxu1 %v8981_v45 }
0x10b1   : > { %5496 = vadd.xlane.f32.xlu0 %v5495_v51 }
0x1121   : > { %v5458_v8 = vpop.xlane.xlu1 %5457 }
0x1122   : > { %v5503_v5 = vmul.f32 0.03125, %v5458_v8  ;;  %v5455_v57 = vpop.xlane.xlu0 %5454 }
0x1123   : > { %v5502_v49 = vmul.f32 0.03125, %v5455_v57 }
0x1124   : > { %v11420_v52 = vsub.f32 %v11320_v20, %v5503_v5 }
0x1125   : > { %v11423_v48 = vsub.f32 %v11323_v0, %v5502_v49  ;;  %v5464_v15 = vpop.xlane.xlu1 %5463 }
0x1126   : > { %v5505_v56 = vmul.f32 0.03125, %v5464_v15  ;;  %v5461_v47 = vpop.xlane.xlu0 %5460  ;;  %v5535_v31 = vmul.f32 %v11420_v52, %v11420_v52 }
0x1127   : > { %v5504_v2 = vmul.f32 0.03125, %v5461_v47  ;;  %v5534_v3 = vmul.f32 %v11423_v48, %v11423_v48 }
0x1128   : > { %v11430_v11 = vsub.f32 %v11332_v7, %v5505_v56  ;;  %v5553_v33 = vsel %vm479_vm0, %v5535_v31, 0.0 }
0x1129   : > { %v11434_v20 = vsub.f32 %v11335_v63, %v5504_v2  ;;  %v5470_v0 = vpop.xlane.xlu1 %5469  ;;  %5554 = vadd.xlane.f32.xlu1 %v5553_v33  ;;  %v5550_v61 = vsel %vm479_vm0, %v5534_v3, 0.0 }
0x112a   : > { %v5507_v37 = vmul.f32 0.03125, %v5470_v0  ;;  %5551 = vadd.xlane.f32.xlu0 %v5550_v61  ;;  %v5467_v60 = vpop.xlane.xlu0 %5466  ;;  %v5537_v30 = vmul.f32 %v11430_v11, %v11430_v11 }
0x112b   : > { %v5506_v36 = vmul.f32 0.03125, %v5467_v60  ;;  %v5536_v7 = vmul.f32 %v11434_v20, %v11434_v20 }
0x112c   : > { %v11442_v44 = vsub.f32 %v11344_v28, %v5507_v37  ;;  %v5559_v63 = vsel %vm479_vm0, %v5537_v30, 0.0 }
0x112d   : > { %v11446_v22 = vsub.f32 %v11347_v34, %v5506_v36  ;;  %v5476_v23 = vpop.xlane.xlu1 %5475  ;;  %5560 = vadd.xlane.f32.xlu1 %v5559_v63  ;;  %v5556_v27 = vsel %vm479_vm0, %v5536_v7, 0.0  ;;  %v5709_v7 = vld [vmem:[%s12002_s7 + $0x18] sm:$0xff] }
0x112e   : > { %v5509_v24 = vmul.f32 0.03125, %v5476_v23  ;;  %5557 = vadd.xlane.f32.xlu0 %v5556_v27  ;;  %v5473_v18 = vpop.xlane.xlu0 %5472  ;;  %v5539_v13 = vmul.f32 %v11442_v44, %v11442_v44  ;;  %v5926_v23 = vld [vmem:[%s12004_s9] sm:$0xff]  ;;  %v5927_v27 = vld [vmem:[%s12004_s9 + $0x8] sm:$0xff] }
0x112f   : > { %v5508_v6 = vmul.f32 0.03125, %v5473_v18  ;;  %v5538_v28 = vmul.f32 %v11446_v22, %v11446_v22 }
0x1130   : > { %v11454_v35 = vsub.f32 %v11356_v21, %v5509_v24  ;;  %v5565_v34 = vsel %vm479_vm0, %v5539_v13, 0.0  ;;  %v11527_v24 = vpack.c.bf16 %v5927_v27, %v5926_v23 }
0x1131   : > { %v11458_v58 = vsub.f32 %v11359_v14, %v5508_v6  ;;  %v5482_v19 = vpop.xlane.xlu1 %5481  ;;  %5566 = vadd.xlane.f32.xlu1 %v5565_v34  ;;  %v5562_v10 = vsel %vm479_vm0, %v5538_v28, 0.0 }
0x1132   : > { %v5511_v25 = vmul.f32 0.03125, %v5482_v19  ;;  %5563 = vadd.xlane.f32.xlu0 %v5562_v10  ;;  %v5479_v32 = vpop.xlane.xlu0 %5478  ;;  %v5541_v38 = vmul.f32 %v11454_v35, %v11454_v35 }
0x1133   : > { %v5510_v55 = vmul.f32 0.03125, %v5479_v32  ;;  %v5540_v21 = vmul.f32 %v11458_v58, %v11458_v58 }
0x1134   : > { %v11466_v39 = vsub.f32 %v11368_v26, %v5511_v25  ;;  %v5571_v14 = vsel %vm479_vm0, %v5541_v38, 0.0 }
0x1135   : > { %v11470_v16 = vsub.f32 %v11371_v46, %v5510_v55  ;;  %v5488_v41 = vpop.xlane.xlu1 %5487  ;;  %5572 = vadd.xlane.f32.xlu1 %v5571_v14  ;;  %v5568_v53 = vsel %vm479_vm0, %v5540_v21, 0.0 }
0x1136   : > { %v5513_v40 = vmul.f32 0.03125, %v5488_v41  ;;  %5569 = vadd.xlane.f32.xlu0 %v5568_v53  ;;  %v5485_v50 = vpop.xlane.xlu0 %5484  ;;  %v5543_v9 = vmul.f32 %v11466_v39, %v11466_v39 }
0x1137   : > { %v5512_v59 = vmul.f32 0.03125, %v5485_v50  ;;  %v5542_v26 = vmul.f32 %v11470_v16, %v11470_v16 }
0x1138   : > { %v11478_v1 = vsub.f32 %v11380_v42, %v5513_v40  ;;  %v5577_v46 = vsel %vm479_vm0, %v5543_v9, 0.0 }
0x1139   : > { %v11482_v51 = vsub.f32 %v11383_v17, %v5512_v59  ;;  %v5494_v43 = vpop.xlane.xlu1 %5493  ;;  %5578 = vadd.xlane.f32.xlu1 %v5577_v46  ;;  %v5574_v54 = vsel %vm479_vm0, %v5542_v26, 0.0 }
0x113a   : > { %v5515_v45 = vmul.f32 0.03125, %v5494_v43  ;;  %5575 = vadd.xlane.f32.xlu0 %v5574_v54  ;;  %v5491_v8 = vpop.xlane.xlu0 %5490  ;;  %v5545_v5 = vmul.f32 %v11478_v1, %v11478_v1 }
0x113b   : > { %v5514_v57 = vmul.f32 0.03125, %v5491_v8  ;;  %v5544_v42 = vmul.f32 %v11482_v51, %v11482_v51 }
0x113c   : > { %v11490_v49 = vsub.f32 %v11392_v29, %v5515_v45  ;;  %v5583_v17 = vsel %vm479_vm0, %v5545_v5, 0.0  ;;  %v11533_v45 = vld [vmem:[%s12000_s5] ss:$0 sm:$0xff] }
0x113d   : > { %v11494_v15 = vsub.f32 %v11395_v12, %v5514_v57  ;;  %5584 = vadd.xlane.f32.xlu1 %v5583_v17  ;;  %v5500_v56 = vpop.xlane.xlu1 %5499  ;;  %v5580_v47 = vsel %vm479_vm0, %v5544_v42, 0.0 }
0x113e   : > { %v5517_v31 = vmul.f32 0.03125, %v5500_v56  ;;  %5581 = vadd.xlane.f32.xlu0 %v5580_v47  ;;  %v5497_v2 = vpop.xlane.xlu0 %5496  ;;  %v5547_v3 = vmul.f32 %v11490_v49, %v11490_v49 }
0x113f   : > { %v5516_v33 = vmul.f32 0.03125, %v5497_v2  ;;  %v5546_v29 = vmul.f32 %v11494_v15, %v11494_v15  ;;  %v5928_v2 = vld [vmem:[%s12004_s9 + $0x10] sm:$0xff] }
0x1140   : > { %v11502_v0 = vsub.f32 %v11404_v62, %v5517_v31  ;;  %v5589_v12 = vsel %vm479_vm0, %v5547_v3, 0.0  ;;  %v5929_v3 = vld [vmem:[%s12004_s9 + $0x18] sm:$0xff] }
0x1141   : > { %v11506_v61 = vsub.f32 %v11407_v4, %v5516_v33  ;;  %5590 = vadd.xlane.f32.xlu1 %v5589_v12  ;;  %v5586_v37 = vsel %vm479_vm0, %v5546_v29, 0.0  ;;  %v5708_v4 = vld [vmem:[%s12002_s7 + $0x10] sm:$0xff]  ;;  %v11546_v33 = vld [vmem:[%s12001_s6] ss:$0 sm:$0xff] }
0x1142   : > { %5587 = vadd.xlane.f32.xlu0 %v5586_v37  ;;  %v5549_v60 = vmul.f32 %v11502_v0, %v11502_v0  ;;  %v8985_v63 = vpack.c.bf16 %v5709_v7, %v5708_v4  ;;  %v8993_v4 = vpack.c.bf16 %v5929_v3, %v5928_v2 }
0x1143   : > { %v5548_v30 = vmul.f32 %v11506_v61, %v11506_v61 }
0x1144   : > { %v5595_v36 = vsel %vm479_vm0, %v5549_v60, 0.0  ;;  %8986 = vmatprep.subr.bf16.mxu1 %v8985_v63 }
0x1145   : > { %5596 = vadd.xlane.f32.xlu1 %v5595_v36  ;;  %v5592_v62 = vsel %vm479_vm0, %v5548_v30, 0.0  ;;  %8988 = vmatpush3.bf16.msra.mxu1 %v8985_v63 }
0x1146   : > { %5593 = vadd.xlane.f32.xlu0 %v5592_v62  ;;  %8990 = vmatprep.subr.bf16.mxu1 %v11527_v24 }
0x11b6   : > { %v5555_v18 = vpop.xlane.xlu1 %5554 }
0x11b7   : > { %v5599_v13 = vmul.f32 0.03125, %v5555_v18  ;;  %v5552_v6 = vpop.xlane.xlu0 %5551  ;;  %v5930_v18 = vld [vmem:[%s12004_s9 + $0x20] sm:$0xff] }
0x11b8   : > { %v5598_v28 = vmul.f32 0.03125, %v5552_v6 }
0x11b9   : > { %v5615_v34 = vadd.f32 1e-05, %v5599_v13  ;;  %v5931_v13 = vld [vmem:[%s12004_s9 + $0x28] sm:$0xff] }
0x11ba   : > { %v5614_v19 = vadd.f32 1e-05, %v5598_v28  ;;  %v5561_v10 = vpop.xlane.xlu1 %5560 }
0x11bb   : > { %9349 = vrsqrt.f32 %v5615_v34  ;;  %v5601_v25 = vmul.f32 0.03125, %v5561_v10  ;;  %v5558_v32 = vpop.xlane.xlu0 %5557 }
0x11bc   : > { %9351 = vrsqrt.f32 %v5614_v19  ;;  %v5600_v38 = vmul.f32 0.03125, %v5558_v32 }
0x11bd   : > { %v5617_v55 = vadd.f32 1e-05, %v5601_v25 }
0x11be   : > { %v5616_v21 = vadd.f32 1e-05, %v5600_v38  ;;  %v5567_v14 = vpop.xlane.xlu1 %5566 }
0x11bf   : > { %9353 = vrsqrt.f32 %v5617_v55  ;;  %v5603_v41 = vmul.f32 0.03125, %v5567_v14  ;;  %v5564_v53 = vpop.xlane.xlu0 %5563  ;;  %v8997_v55 = vpack.c.bf16 %v5931_v13, %v5930_v18 }
0x11c0   : > { %9355 = vrsqrt.f32 %v5616_v21  ;;  %v5602_v40 = vmul.f32 0.03125, %v5564_v53 }
0x11c1   : > { %v5619_v50 = vadd.f32 1e-05, %v5603_v41 }
0x11c2   : > { %v5618_v9 = vadd.f32 1e-05, %v5602_v40  ;;  %v5573_v59 = vpop.xlane.xlu1 %5572  ;;  %v5932_v40 = vld [vmem:[%s12004_s9 + $0x30] sm:$0xff] }
0x11c3   : > { %9357 = vrsqrt.f32 %v5619_v50  ;;  %v5605_v26 = vmul.f32 0.03125, %v5573_v59  ;;  %v5570_v46 = vpop.xlane.xlu0 %5569  ;;  %v5933_v50 = vld [vmem:[%s12004_s9 + $0x38] sm:$0xff] }
0x11c4   : > { %9359 = vrsqrt.f32 %v5618_v9  ;;  %v5604_v43 = vmul.f32 0.03125, %v5570_v46 }
0x11c5   : > { %v9350_v54 = vpop.eup %9349  ;;  %v5621_v8 = vadd.f32 1e-05, %v5605_v26 }
0x11c6   : > { %v9352_v5 = vpop.eup %9351  ;;  %v5647_v57 = vmul.f32 %v9350_v54, %v11420_v52  ;;  %v5620_v42 = vadd.f32 1e-05, %v5604_v43  ;;  %v5579_v17 = vpop.xlane.xlu1 %5578 }
0x11c7   : > { %9361 = vrsqrt.f32 %v5621_v8  ;;  %v5607_v56 = vmul.f32 0.03125, %v5579_v17  ;;  %v5576_v47 = vpop.xlane.xlu0 %5575  ;;  %v5646_v31 = vmul.f32 %v9352_v5, %v11423_v48  ;;  %v9001_v5 = vpack.c.bf16 %v5933_v50, %v5932_v40 }
0x11c8   : > { %v5669_v52 = vmul.f32 %v11533_v45, %v5647_v57  ;;  %9363 = vrsqrt.f32 %v5620_v42  ;;  %v5606_v29 = vmul.f32 0.03125, %v5576_v47 }
0x11c9   : > { %v9354_v12 = vpop.eup %9353  ;;  %v5623_v37 = vadd.f32 1e-05, %v5607_v56  ;;  %v5668_v48 = vmul.f32 %v11533_v45, %v5646_v31 }
0x11ca   : > { %v9356_v60 = vpop.eup %9355  ;;  %v5622_v30 = vadd.f32 1e-05, %v5606_v29  ;;  %v5585_v36 = vpop.xlane.xlu1 %5584  ;;  %v5649_v62 = vmul.f32 %v9354_v12, %v11430_v11  ;;  %v11562_v6 = vadd.f32 %v11546_v33, %v5669_v52  ;;  %v5935_v29 = vld [vmem:[%s12004_s9 + $0x48] sm:$0xff] }
0x11cb   : > { %9365 = vrsqrt.f32 %v5623_v37  ;;  %v5609_v7 = vmul.f32 0.03125, %v5585_v36  ;;  %v5582_v63 = vpop.xlane.xlu0 %5581  ;;  %v11552_v23 = vadd.f32 %v11546_v33, %v5668_v48  ;;  %v5648_v27 = vmul.f32 %v9356_v60, %v11434_v20 }
0x11cc   : > { %9367 = vrsqrt.f32 %v5622_v30  ;;  %v5608_v11 = vmul.f32 0.03125, %v5582_v63  ;;  %v5671_v28 = vmul.f32 %v11533_v45, %v5649_v62  ;;  %v5936_v63 = vld [vmem:[%s12004_s9 + $0x50] sm:$0xff] }
0x11cd   : > { %v9358_v34 = vpop.eup %9357  ;;  %v5625_v19 = vadd.f32 1e-05, %v5609_v7  ;;  %8485 = vmatprep.mubr.msk.f32.mxu1 %vm479_vm0, %v11552_v23  ;;  %v5670_v20 = vmul.f32 %v11533_v45, %v5648_v27 }
0x11ce   : > { %v9360_v10 = vpop.eup %9359  ;;  %v5624_v25 = vadd.f32 1e-05, %v5608_v11  ;;  %v5591_v32 = vpop.xlane.xlu1 %5590  ;;  %8486 = vmatmul.mubr.msk.f32.vlgmr.msra.gmra.mrb[176].mxu1 %vm479_vm0, %v11562_v6  ;;  %v5651_v38 = vmul.f32 %v9358_v34, %v11442_v44  ;;  %v11583_v9 = vadd.f32 %v11546_v33, %v5671_v28 }
0x11cf   : > { %9369 = vrsqrt.f32 %v5625_v19  ;;  %v5611_v21 = vmul.f32 0.03125, %v5591_v32  ;;  %v5588_v14 = vpop.xlane.xlu0 %5587  ;;  %v11572_v41 = vadd.f32 %v11546_v33, %v5670_v20  ;;  %v5650_v53 = vmul.f32 %v9360_v10, %v11446_v22  ;;  %8992 = vmatpush3.bf16.msra.mxu1 %v11527_v24 }
0x11d0   : > { %9371 = vrsqrt.f32 %v5624_v25  ;;  %v5610_v44 = vmul.f32 0.03125, %v5588_v14  ;;  %v5673_v59 = vmul.f32 %v11533_v45, %v5651_v38  ;;  %8994 = vmatprep.subr.bf16.mxu1 %v8993_v4 }
0x11d1   : > { %v9362_v26 = vpop.eup %9361  ;;  %v5627_v22 = vadd.f32 1e-05, %v5611_v21  ;;  %8488 = vmatprep.mubr.msk.f32.mxu1 %vm479_vm0, %v11572_v41  ;;  %v5672_v24 = vmul.f32 %v11533_v45, %v5650_v53 }
0x11d2   : > { %v9364_v46 = vpop.eup %9363  ;;  %v5626_v43 = vadd.f32 1e-05, %v5610_v44  ;;  %v5597_v54 = vpop.xlane.xlu1 %5596  ;;  %8489 = vmatmul.mubr.msk.f32.gmra.mrb[178].mxu1 %vm479_vm0, %v11583_v9  ;;  %v5653_v8 = vmul.f32 %v9362_v26, %v11454_v35  ;;  %v11597_v31 = vadd.f32 %v11546_v33, %v5673_v59 }
0x11d3   : > { %9373 = vrsqrt.f32 %v5627_v22  ;;  %v5613_v57 = vmul.f32 0.03125, %v5597_v54  ;;  %v5594_v42 = vpop.xlane.xlu0 %5593  ;;  %v11593_v17 = vadd.f32 %v11546_v33, %v5672_v24  ;;  %v5652_v56 = vmul.f32 %v9364_v46, %v11458_v58  ;;  %8996 = vmatpush3.bf16.msra.mxu1 %v8993_v4  ;;  %v5934_v58 = vld [vmem:[%s12004_s9 + $0x40] sm:$0xff]  ;;  %v5941_v46 = vld [vmem:[%s12004_s9 + $0x78] sm:$0xff] }
0x11d4   : > { %9375 = vrsqrt.f32 %v5626_v43  ;;  %v5612_v47 = vmul.f32 0.03125, %v5594_v42  ;;  %v5675_v2 = vmul.f32 %v11533_v45, %v5653_v8  ;;  %8998 = vmatprep.subr.bf16.mxu1 %v8997_v55  ;;  %v9005_v4 = vpack.c.bf16 %v5935_v29, %v5934_v58 }
0x11d5   : > { %v9366_v3 = vpop.eup %9365  ;;  %v5629_v35 = vadd.f32 1e-05, %v5613_v57  ;;  %8491 = vmatprep.mubr.msk.f32.mxu1 %vm479_vm0, %v11593_v17  ;;  %v5674_v52 = vmul.f32 %v11533_v45, %v5652_v56 }
0x11d6   : > { %v9368_v12 = vpop.eup %9367  ;;  %v5628_v37 = vadd.f32 1e-05, %v5612_v47  ;;  %8492 = vmatmul.mubr.msk.f32.gmra.mrb[180].mxu1 %vm479_vm0, %v11597_v31  ;;  %v5655_v48 = vmul.f32 %v9366_v3, %v11466_v39  ;;  %v11617_v36 = vadd.f32 %v11546_v33, %v5675_v2 }
0x11d7   : > { %9377 = vrsqrt.f32 %v5629_v35  ;;  %v11613_v60 = vadd.f32 %v11546_v33, %v5674_v52  ;;  %v5654_v30 = vmul.f32 %v9368_v12, %v11470_v16  ;;  %9000 = vmatpush3.bf16.msra.mxu1 %v8997_v55  ;;  %v5937_v16 = vld [vmem:[%s12004_s9 + $0x58] sm:$0xff] }
0x11d8   : > { %9379 = vrsqrt.f32 %v5628_v37  ;;  %v5677_v62 = vmul.f32 %v11533_v45, %v5655_v48  ;;  %9002 = vmatprep.subr.bf16.mxu1 %v9001_v5  ;;  %v9009_v19 = vpack.c.bf16 %v5937_v16, %v5936_v63 }
0x11d9   : > { %v9370_v7 = vpop.eup %9369  ;;  %8494 = vmatprep.mubr.msk.f32.mxu1 %vm479_vm0, %v11613_v60  ;;  %v5676_v39 = vmul.f32 %v11533_v45, %v5654_v30 }
0x11da   : > { %v9372_v27 = vpop.eup %9371  ;;  %8495 = vmatmul.mubr.msk.f32.gmra.mrb[182].mxu1 %vm479_vm0, %v11617_v36  ;;  %v5657_v18 = vmul.f32 %v9370_v7, %v11478_v1  ;;  %v11637_v28 = vadd.f32 %v11546_v33, %v5677_v62  ;;  %v5938_v1 = vld [vmem:[%s12004_s9 + $0x60] sm:$0xff] }
0x11db   : > { %v11633_v13 = vadd.f32 %v11546_v33, %v5676_v39  ;;  %v5656_v11 = vmul.f32 %v9372_v27, %v11482_v51  ;;  %9004 = vmatpush3.bf16.msra.mxu1 %v9001_v5  ;;  %v5939_v51 = vld [vmem:[%s12004_s9 + $0x68] sm:$0xff] }
0x11dc   : > { %v5679_v34 = vmul.f32 %v11533_v45, %v5657_v18  ;;  %9006 = vmatprep.subr.bf16.mxu1 %v9005_v4  ;;  %v9013_v53 = vpack.c.bf16 %v5939_v51, %v5938_v1 }
0x11dd   : > { %v9374_v20 = vpop.eup %9373  ;;  %8497 = vmatprep.mubr.msk.f32.mxu1 %vm479_vm0, %v11633_v13  ;;  %v5678_v10 = vmul.f32 %v11533_v45, %v5656_v11 }
0x11de   : > { %v9376_v25 = vpop.eup %9375  ;;  %8498 = vmatmul.mubr.msk.f32.gmra.mrb[184].mxu1 %vm479_vm0, %v11637_v28  ;;  %v5659_v32 = vmul.f32 %v9374_v20, %v11490_v49  ;;  %v11657_v21 = vadd.f32 %v11546_v33, %v5679_v34 }
0x11df   : > { %v11653_v38 = vadd.f32 %v11546_v33, %v5678_v10  ;;  %v5658_v55 = vmul.f32 %v9376_v25, %v11494_v15  ;;  %9008 = vmatpush3.bf16.msra.mxu1 %v9005_v4 }
0x11e0   : > { %v5681_v14 = vmul.f32 %v11533_v45, %v5659_v32  ;;  %9010 = vmatprep.subr.bf16.mxu1 %v9009_v19 }
0x11e1   : > { %v9378_v40 = vpop.eup %9377  ;;  %8500 = vmatprep.mubr.msk.f32.mxu1 %vm479_vm0, %v11653_v38  ;;  %v5680_v50 = vmul.f32 %v11533_v45, %v5658_v55 }
0x11e2   : > { %v9380_v49 = vpop.eup %9379  ;;  %8501 = vmatmul.mubr.msk.f32.gmra.mrb[186].mxu1 %vm479_vm0, %v11657_v21  ;;  %v5661_v15 = vmul.f32 %v9378_v40, %v11502_v0  ;;  %v11671_v26 = vadd.f32 %v11546_v33, %v5681_v14 }
0x11e3   : > { %v11667_v44 = vadd.f32 %v11546_v33, %v5680_v50  ;;  %v5660_v59 = vmul.f32 %v9380_v49, %v11506_v61  ;;  %9012 = vmatpush3.bf16.msra.mxu1 %v9009_v19 }
0x11e4   : > { %v5683_v22 = vmul.f32 %v11533_v45, %v5661_v15  ;;  %9014 = vmatprep.subr.bf16.mxu1 %v9013_v53 }
0x11e5   : > { %8503 = vmatprep.mubr.msk.f32.mxu1 %vm479_vm0, %v11667_v44  ;;  %v5682_v24 = vmul.f32 %v11533_v45, %v5660_v59  ;;  %v5940_v45 = vld [vmem:[%s12004_s9 + $0x70] sm:$0xff] }
0x11e6   : > { %8504 = vmatmul.mubr.msk.f32.gmra.mrb[188].mxu1 %vm479_vm0, %v11671_v26  ;;  %v11683_v61 = vadd.f32 %v11546_v33, %v5683_v22  ;;  %v9017_v43 = vpack.c.bf16 %v5941_v46, %v5940_v45 }
0x11e7   : > { %v11680_v0 = vadd.f32 %v11546_v33, %v5682_v24  ;;  %9016 = vmatpush3.bf16.msra.mxu1 %v9013_v53  ;;  %v6901_v33 = vld [vmem:[%s12003_s8] ss:$0 sm:$0xff] }
0x11e8   : > { %9018 = vmatprep.subr.bf16.mxu1 %v9017_v43 }
0x11e9   : > { %8506 = vmatprep.mubr.msk.f32.mxu1 %vm479_vm0, %v11680_v0 }
0x11ea   : > { %8507 = vmatmul.mubr.msk.f32.gmra.mrb[190].mxu1 %vm479_vm0, %v11683_v61 }
0x11eb   : > { %9020 = vmatpush3.bf16.msra.mxu1 %v9017_v43 }
0x12a1   : > { %v8487_v54 = vpop.f32.mrb[176].mxu1 }
0x12a2   : > { %v5837_v8 = vadd.f32 %v8487_v54, %v6901_v33  ;;  %v5831_v5 = vpop.f32.mrb[177].mxu1 }
0x12a3   : > { %v5832_v57 = vadd.f32 %v6901_v33, %v5831_v5 }
0x12a4   : > { %v5911_v47 = vmax.f32 %v5837_v8, 0.0  ;;  %v11701_v8 = vld [vmem:[%s12005_s10] ss:$0 sm:$0xff] }
0x12a5   : > { %v5910_v42 = vmax.f32 %v5832_v57, 0.0  ;;  %v8490_v56 = vpop.f32.mrb[178].mxu1 }
0x12a6   : > { %v5847_v2 = vadd.f32 %v8490_v56, %v6901_v33  ;;  %v5841_v3 = vpop.f32.mrb[179].mxu1 }
0x12a7   : > { %v5842_v35 = vadd.f32 %v6901_v33, %v5841_v3  ;;  %8541 = vmatprep.mubr.f32.mxu1 %v5910_v42 }
0x12a8   : > { %8542 = vmatmul.mubr.f32.vlgmr.msra.gmra.mrb[192].mxu1 %v5911_v47  ;;  %v5913_v29 = vmax.f32 %v5847_v2, 0.0 }
0x12a9   : > { %v5912_v52 = vmax.f32 %v5842_v35, 0.0  ;;  %v8493_v58 = vpop.f32.mrb[180].mxu1 }
0x12aa   : > { %v5857_v12 = vadd.f32 %v8493_v58, %v6901_v33  ;;  %v5851_v37 = vpop.f32.mrb[181].mxu1 }
0x12ab   : > { %v5852_v48 = vadd.f32 %v6901_v33, %v5851_v37  ;;  %8544 = vmatprep.mubr.f32.mxu1 %v5912_v52 }
0x12ac   : > { %8545 = vmatmul.mubr.f32.gmra.mrb[194].mxu1 %v5913_v29  ;;  %v5915_v4 = vmax.f32 %v5857_v12, 0.0 }
0x12ad   : > { %v5914_v30 = vmax.f32 %v5852_v48, 0.0  ;;  %v8496_v62 = vpop.f32.mrb[182].mxu1 }
0x12ae   : > { %v5867_v7 = vadd.f32 %v8496_v62, %v6901_v33  ;;  %v5861_v39 = vpop.f32.mrb[183].mxu1 }
0x12af   : > { %v5862_v63 = vadd.f32 %v6901_v33, %v5861_v39  ;;  %8547 = vmatprep.mubr.f32.mxu1 %v5914_v30 }
0x12b0   : > { %8548 = vmatmul.mubr.f32.gmra.mrb[196].mxu1 %v5915_v4  ;;  %v5917_v18 = vmax.f32 %v5867_v7, 0.0 }
0x12b1   : > { %v5916_v16 = vmax.f32 %v5862_v63, 0.0  ;;  %v8499_v27 = vpop.f32.mrb[184].mxu1 }
0x12b2   : > { %v5877_v11 = vadd.f32 %v8499_v27, %v6901_v33  ;;  %v5871_v34 = vpop.f32.mrb[185].mxu1 }
0x12b3   : > { %v5872_v19 = vadd.f32 %v6901_v33, %v5871_v34  ;;  %8550 = vmatprep.mubr.f32.mxu1 %v5916_v16 }
0x12b4   : > { %8551 = vmatmul.mubr.f32.gmra.mrb[198].mxu1 %v5917_v18  ;;  %v5919_v1 = vmax.f32 %v5877_v11, 0.0 }
0x12b5   : > { %v5918_v20 = vmax.f32 %v5872_v19, 0.0  ;;  %v8502_v10 = vpop.f32.mrb[186].mxu1 }
0x12b6   : > { %v5887_v51 = vadd.f32 %v8502_v10, %v6901_v33  ;;  %v5881_v25 = vpop.f32.mrb[187].mxu1 }
0x12b7   : > { %v5882_v32 = vadd.f32 %v6901_v33, %v5881_v25  ;;  %8553 = vmatprep.mubr.f32.mxu1 %v5918_v20 }
0x12b8   : > { %8554 = vmatmul.mubr.f32.gmra.mrb[200].mxu1 %v5919_v1  ;;  %v5921_v53 = vmax.f32 %v5887_v51, 0.0 }
0x12b9   : > { %v5920_v55 = vmax.f32 %v5882_v32, 0.0  ;;  %v8505_v14 = vpop.f32.mrb[188].mxu1 }
0x12ba   : > { %v5897_v40 = vadd.f32 %v8505_v14, %v6901_v33  ;;  %v5891_v50 = vpop.f32.mrb[189].mxu1 }
0x12bb   : > { %v5892_v49 = vadd.f32 %v6901_v33, %v5891_v50  ;;  %8556 = vmatprep.mubr.f32.mxu1 %v5920_v55 }
0x12bc   : > { %8557 = vmatmul.mubr.f32.gmra.mrb[202].mxu1 %v5921_v53  ;;  %v5923_v22 = vmax.f32 %v5897_v40, 0.0 }
0x12bd   : > { %v5922_v15 = vmax.f32 %v5892_v49, 0.0  ;;  %v8508_v59 = vpop.f32.mrb[190].mxu1 }
0x12be   : > { %v5907_v24 = vadd.f32 %v8508_v59, %v6901_v33  ;;  %v5901_v45 = vpop.f32.mrb[191].mxu1 }
0x12bf   : > { %v5902_v46 = vadd.f32 %v6901_v33, %v5901_v45  ;;  %8559 = vmatprep.mubr.f32.mxu1 %v5922_v15 }
0x12c0   : > { %8560 = vmatmul.mubr.f32.gmra.mrb[204].mxu1 %v5923_v22  ;;  %v5925_v54 = vmax.f32 %v5907_v24, 0.0 }
0x12c1   : > { %v5924_v43 = vmax.f32 %v5902_v46, 0.0 }
0x12c3   : > { %8562 = vmatprep.mubr.f32.mxu1 %v5924_v43 }
0x12c4   : > { %8563 = vmatmul.mubr.f32.gmra.mrb[206].mxu1 %v5925_v54 }
0x137b   : > { %v8543_v5 = vpop.f32.mrb[192].mxu1 }
0x137c   : > { %v6021_v57 = vadd.f32 %v8543_v5, %v11701_v8  ;;  %v6015_v42 = vpop.f32.mrb[193].mxu1 }
0x137d   : > { %v6016_v56 = vadd.f32 %v11701_v8, %v6015_v42 }
0x137e   : > { %v11706_v47 = vadd.f32 %v6021_v57, %v11562_v6 }
0x137f   : > { %v11709_v33 = vadd.f32 %v6016_v56, %v11552_v23  ;;  %v8546_v2 = vpop.f32.mrb[194].mxu1 }
0x1380   : > { %v6031_v3 = vadd.f32 %v8546_v2, %v11701_v8  ;;  %v6025_v35 = vpop.f32.mrb[195].mxu1  ;;  %v6115_v52 = vsel %vm479_vm0, %v11706_v47, 0.0 }
0x1381   : > { %v6026_v58 = vadd.f32 %v11701_v8, %v6025_v35  ;;  %6116 = vadd.xlane.f32.xlu1 %v6115_v52  ;;  %v6112_v29 = vsel %vm479_vm0, %v11709_v33, 0.0 }
0x1382   : > { %v11718_v12 = vadd.f32 %v6031_v3, %v11583_v9  ;;  %6113 = vadd.xlane.f32.xlu0 %v6112_v29 }
0x1383   : > { %v11721_v23 = vadd.f32 %v6026_v58, %v11572_v41  ;;  %v8549_v6 = vpop.f32.mrb[196].mxu1 }
0x1384   : > { %v6041_v37 = vadd.f32 %v8549_v6, %v11701_v8  ;;  %v6035_v48 = vpop.f32.mrb[197].mxu1  ;;  %v6121_v30 = vsel %vm479_vm0, %v11718_v12, 0.0 }
0x1385   : > { %v6036_v62 = vadd.f32 %v11701_v8, %v6035_v48  ;;  %6122 = vadd.xlane.f32.xlu1 %v6121_v30  ;;  %v6118_v4 = vsel %vm479_vm0, %v11721_v23, 0.0 }
0x1386   : > { %v11730_v9 = vadd.f32 %v6041_v37, %v11597_v31  ;;  %6119 = vadd.xlane.f32.xlu0 %v6118_v4 }
0x1387   : > { %v11733_v41 = vadd.f32 %v6036_v62, %v11593_v17  ;;  %v8552_v7 = vpop.f32.mrb[198].mxu1 }
0x1388   : > { %v6051_v39 = vadd.f32 %v8552_v7, %v11701_v8  ;;  %v6045_v63 = vpop.f32.mrb[199].mxu1  ;;  %v6127_v16 = vsel %vm479_vm0, %v11730_v9, 0.0 }
0x1389   : > { %v6046_v27 = vadd.f32 %v11701_v8, %v6045_v63  ;;  %6128 = vadd.xlane.f32.xlu1 %v6127_v16  ;;  %v6124_v18 = vsel %vm479_vm0, %v11733_v41, 0.0 }
0x138a   : > { %v11742_v31 = vadd.f32 %v6051_v39, %v11617_v36  ;;  %6125 = vadd.xlane.f32.xlu0 %v6124_v18 }
0x138b   : > { %v11745_v17 = vadd.f32 %v6046_v27, %v11613_v60  ;;  %v8555_v11 = vpop.f32.mrb[200].mxu1 }
0x138c   : > { %v6061_v34 = vadd.f32 %v8555_v11, %v11701_v8  ;;  %v6055_v19 = vpop.f32.mrb[201].mxu1  ;;  %v6133_v20 = vsel %vm479_vm0, %v11742_v31, 0.0 }
0x138d   : > { %v6056_v10 = vadd.f32 %v11701_v8, %v6055_v19  ;;  %6134 = vadd.xlane.f32.xlu1 %v6133_v20  ;;  %v6130_v1 = vsel %vm479_vm0, %v11745_v17, 0.0 }
0x138e   : > { %v11754_v36 = vadd.f32 %v6061_v34, %v11637_v28  ;;  %6131 = vadd.xlane.f32.xlu0 %v6130_v1 }
0x138f   : > { %v11757_v60 = vadd.f32 %v6056_v10, %v11633_v13  ;;  %v8558_v51 = vpop.f32.mrb[202].mxu1 }
0x1390   : > { %v6071_v25 = vadd.f32 %v8558_v51, %v11701_v8  ;;  %v6065_v32 = vpop.f32.mrb[203].mxu1  ;;  %v6139_v55 = vsel %vm479_vm0, %v11754_v36, 0.0 }
0x1391   : > { %v6066_v14 = vadd.f32 %v11701_v8, %v6065_v32  ;;  %6140 = vadd.xlane.f32.xlu1 %v6139_v55  ;;  %v6136_v53 = vsel %vm479_vm0, %v11757_v60, 0.0 }
0x1392   : > { %v11766_v28 = vadd.f32 %v6071_v25, %v11657_v21  ;;  %6137 = vadd.xlane.f32.xlu0 %v6136_v53 }
0x1393   : > { %v11769_v13 = vadd.f32 %v6066_v14, %v11653_v38  ;;  %v8561_v40 = vpop.f32.mrb[204].mxu1 }
0x1394   : > { %v6081_v50 = vadd.f32 %v8561_v40, %v11701_v8  ;;  %v6075_v49 = vpop.f32.mrb[205].mxu1  ;;  %v6145_v15 = vsel %vm479_vm0, %v11766_v28, 0.0 }
0x1395   : > { %v6076_v59 = vadd.f32 %v11701_v8, %v6075_v49  ;;  %6146 = vadd.xlane.f32.xlu1 %v6145_v15  ;;  %v6142_v22 = vsel %vm479_vm0, %v11769_v13, 0.0 }
0x1396   : > { %v11778_v21 = vadd.f32 %v6081_v50, %v11671_v26  ;;  %6143 = vadd.xlane.f32.xlu0 %v6142_v22 }
0x1397   : > { %v11781_v38 = vadd.f32 %v6076_v59, %v11667_v44  ;;  %v8564_v24 = vpop.f32.mrb[206].mxu1 }
0x1398   : > { %v6091_v45 = vadd.f32 %v8564_v24, %v11701_v8  ;;  %v6085_v46 = vpop.f32.mrb[207].mxu1  ;;  %v6151_v43 = vsel %vm479_vm0, %v11778_v21, 0.0 }
0x1399   : > { %v6086_v54 = vadd.f32 %v11701_v8, %v6085_v46  ;;  %6152 = vadd.xlane.f32.xlu1 %v6151_v43  ;;  %v6148_v5 = vsel %vm479_vm0, %v11781_v38, 0.0 }
0x139a   : > { %v11790_v26 = vadd.f32 %v6091_v45, %v11683_v61  ;;  %6149 = vadd.xlane.f32.xlu0 %v6148_v5 }
0x139b   : > { %v11793_v44 = vadd.f32 %v6086_v54, %v11680_v0 }
0x139c   : > { %v6157_v57 = vsel %vm479_vm0, %v11790_v26, 0.0 }
0x139d   : > { %6158 = vadd.xlane.f32.xlu1 %v6157_v57  ;;  %v6154_v42 = vsel %vm479_vm0, %v11793_v44, 0.0 }
0x139e   : > { %6155 = vadd.xlane.f32.xlu0 %v6154_v42 }
0x140e   : > { %v6117_v8 = vpop.xlane.xlu1 %6116 }
0x140f   : > { %v6161_v56 = vmul.f32 0.03125, %v6117_v8  ;;  %v6114_v2 = vpop.xlane.xlu0 %6113 }
0x1410   : > { %v6160_v3 = vmul.f32 0.03125, %v6114_v2 }
0x1411   : > { %v11800_v35 = vsub.f32 %v11706_v47, %v6161_v56 }
0x1412   : > { %v11803_v61 = vsub.f32 %v11709_v33, %v6160_v3  ;;  %v6123_v0 = vpop.xlane.xlu1 %6122 }
0x1413   : > { %v6163_v52 = vmul.f32 0.03125, %v6123_v0  ;;  %v6120_v58 = vpop.xlane.xlu0 %6119  ;;  %v6193_v29 = vmul.f32 %v11800_v35, %v11800_v35 }
0x1414   : > { %v6162_v6 = vmul.f32 0.03125, %v6120_v58  ;;  %v6192_v37 = vmul.f32 %v11803_v61, %v11803_v61 }
0x1415   : > { %v11810_v48 = vsub.f32 %v11718_v12, %v6163_v52  ;;  %v6211_v30 = vsel %vm479_vm0, %v6193_v29, 0.0 }
0x1416   : > { %v11814_v47 = vsub.f32 %v11721_v23, %v6162_v6  ;;  %v6129_v33 = vpop.xlane.xlu1 %6128  ;;  %6212 = vadd.xlane.f32.xlu1 %v6211_v30  ;;  %v6208_v62 = vsel %vm479_vm0, %v6192_v37, 0.0 }
0x1417   : > { %v6165_v4 = vmul.f32 0.03125, %v6129_v33  ;;  %v6126_v7 = vpop.xlane.xlu0 %6125  ;;  %6209 = vadd.xlane.f32.xlu0 %v6208_v62  ;;  %v6195_v39 = vmul.f32 %v11810_v48, %v11810_v48 }
0x1418   : > { %v6164_v63 = vmul.f32 0.03125, %v6126_v7  ;;  %v6194_v12 = vmul.f32 %v11814_v47, %v11814_v47 }
0x1419   : > { %v11822_v16 = vsub.f32 %v11730_v9, %v6165_v4  ;;  %v6217_v23 = vsel %vm479_vm0, %v6195_v39, 0.0 }
0x141a   : > { %v11826_v27 = vsub.f32 %v11733_v41, %v6164_v63  ;;  %v6135_v18 = vpop.xlane.xlu1 %6134  ;;  %6218 = vadd.xlane.f32.xlu1 %v6217_v23  ;;  %v6214_v11 = vsel %vm479_vm0, %v6194_v12, 0.0 }
0x141b   : > { %v6167_v34 = vmul.f32 0.03125, %v6135_v18  ;;  %v6132_v19 = vpop.xlane.xlu0 %6131  ;;  %6215 = vadd.xlane.f32.xlu0 %v6214_v11  ;;  %v6197_v20 = vmul.f32 %v11822_v16, %v11822_v16 }
0x141c   : > { %v6166_v10 = vmul.f32 0.03125, %v6132_v19  ;;  %v6196_v9 = vmul.f32 %v11826_v27, %v11826_v27 }
0x141d   : > { %v11834_v1 = vsub.f32 %v11742_v31, %v6167_v34  ;;  %v6223_v41 = vsel %vm479_vm0, %v6197_v20, 0.0 }
0x141e   : > { %v11838_v51 = vsub.f32 %v11745_v17, %v6166_v10  ;;  %v6141_v25 = vpop.xlane.xlu1 %6140  ;;  %6224 = vadd.xlane.f32.xlu1 %v6223_v41  ;;  %v6220_v32 = vsel %vm479_vm0, %v6196_v9, 0.0 }
0x141f   : > { %v6169_v55 = vmul.f32 0.03125, %v6141_v25  ;;  %v6138_v14 = vpop.xlane.xlu0 %6137  ;;  %6221 = vadd.xlane.f32.xlu0 %v6220_v32  ;;  %v6199_v53 = vmul.f32 %v11834_v1, %v11834_v1 }
0x1420   : > { %v6168_v40 = vmul.f32 0.03125, %v6138_v14  ;;  %v6198_v31 = vmul.f32 %v11838_v51, %v11838_v51 }
0x1421   : > { %v11846_v50 = vsub.f32 %v11754_v36, %v6169_v55  ;;  %v6229_v17 = vsel %vm479_vm0, %v6199_v53, 0.0 }
0x1422   : > { %v11850_v49 = vsub.f32 %v11757_v60, %v6168_v40  ;;  %v6147_v15 = vpop.xlane.xlu1 %6146  ;;  %6230 = vadd.xlane.f32.xlu1 %v6229_v17  ;;  %v6226_v59 = vsel %vm479_vm0, %v6198_v31, 0.0 }
0x1423   : > { %v6171_v22 = vmul.f32 0.03125, %v6147_v15  ;;  %v6144_v24 = vpop.xlane.xlu0 %6143  ;;  %6227 = vadd.xlane.f32.xlu0 %v6226_v59  ;;  %v6201_v45 = vmul.f32 %v11846_v50, %v11846_v50 }
0x1424   : > { %v6170_v46 = vmul.f32 0.03125, %v6144_v24  ;;  %v6200_v36 = vmul.f32 %v11850_v49, %v11850_v49 }
0x1425   : > { %v11858_v43 = vsub.f32 %v11766_v28, %v6171_v22  ;;  %v6235_v60 = vsel %vm479_vm0, %v6201_v45, 0.0  ;;  %v11898_v45 = vld [vmem:[%s12006_s11] ss:$0 sm:$0xff] }
0x1426   : > { %v11862_v54 = vsub.f32 %v11769_v13, %v6170_v46  ;;  %v6153_v5 = vpop.xlane.xlu1 %6152  ;;  %6236 = vadd.xlane.f32.xlu1 %v6235_v60  ;;  %v6232_v57 = vsel %vm479_vm0, %v6200_v36, 0.0 }
0x1427   : > { %v6173_v42 = vmul.f32 0.03125, %v6153_v5  ;;  %v6150_v8 = vpop.xlane.xlu0 %6149  ;;  %6233 = vadd.xlane.f32.xlu0 %v6232_v57  ;;  %v6203_v56 = vmul.f32 %v11858_v43, %v11858_v43 }
0x1428   : > { %v6172_v2 = vmul.f32 0.03125, %v6150_v8  ;;  %v6202_v28 = vmul.f32 %v11862_v54, %v11862_v54 }
0x1429   : > { %v11870_v3 = vsub.f32 %v11778_v21, %v6173_v42  ;;  %v6241_v13 = vsel %vm479_vm0, %v6203_v56, 0.0  ;;  %v11904_v42 = vld [vmem:[%s12007_s12] ss:$0 sm:$0xff] }
0x142a   : > { %v11874_v0 = vsub.f32 %v11781_v38, %v6172_v2  ;;  %6242 = vadd.xlane.f32.xlu1 %v6241_v13  ;;  %v6159_v52 = vpop.xlane.xlu1 %6158  ;;  %v6238_v58 = vsel %vm479_vm0, %v6202_v28, 0.0 }
0x142b   : > { %v6175_v29 = vmul.f32 0.03125, %v6159_v52  ;;  %6239 = vadd.xlane.f32.xlu0 %v6238_v58  ;;  %v6156_v6 = vpop.xlane.xlu0 %6155  ;;  %v6205_v37 = vmul.f32 %v11870_v3, %v11870_v3 }
0x142c   : > { %v6174_v30 = vmul.f32 0.03125, %v6156_v6  ;;  %v6204_v21 = vmul.f32 %v11874_v0, %v11874_v0 }
0x142d   : > { %v11882_v33 = vsub.f32 %v11790_v26, %v6175_v29  ;;  %v6247_v38 = vsel %vm479_vm0, %v6205_v37, 0.0 }
0x142e   : > { %v11886_v62 = vsub.f32 %v11793_v44, %v6174_v30  ;;  %6248 = vadd.xlane.f32.xlu1 %v6247_v38  ;;  %v6244_v4 = vsel %vm479_vm0, %v6204_v21, 0.0 }
0x142f   : > { %6245 = vadd.xlane.f32.xlu0 %v6244_v4  ;;  %v6207_v7 = vmul.f32 %v11882_v33, %v11882_v33 }
0x1430   : > { %v6206_v39 = vmul.f32 %v11886_v62, %v11886_v62 }
0x1431   : > { %v6253_v63 = vsel %vm479_vm0, %v6207_v7, 0.0 }
0x1432   : > { %6254 = vadd.xlane.f32.xlu1 %v6253_v63  ;;  %v6250_v26 = vsel %vm479_vm0, %v6206_v39, 0.0 }
0x1433   : > { %6251 = vadd.xlane.f32.xlu0 %v6250_v26 }
0x14a3   : > { %v6213_v12 = vpop.xlane.xlu1 %6212 }
0x14a4   : > { %v6257_v23 = vmul.f32 0.03125, %v6213_v12  ;;  %v6210_v44 = vpop.xlane.xlu0 %6209 }
0x14a5   : > { %v6256_v18 = vmul.f32 0.03125, %v6210_v44 }
0x14a6   : > { %v6273_v11 = vadd.f32 1e-05, %v6257_v23 }
0x14a7   : > { %v6272_v34 = vadd.f32 1e-05, %v6256_v18  ;;  %v6219_v19 = vpop.xlane.xlu1 %6218 }
0x14a8   : > { %9381 = vrsqrt.f32 %v6273_v11  ;;  %v6259_v20 = vmul.f32 0.03125, %v6219_v19  ;;  %v6216_v10 = vpop.xlane.xlu0 %6215 }
0x14a9   : > { %9383 = vrsqrt.f32 %v6272_v34  ;;  %v6258_v9 = vmul.f32 0.03125, %v6216_v10 }
0x14aa   : > { %v6275_v41 = vadd.f32 1e-05, %v6259_v20 }
0x14ab   : > { %v6274_v25 = vadd.f32 1e-05, %v6258_v9  ;;  %v6225_v32 = vpop.xlane.xlu1 %6224 }
0x14ac   : > { %9385 = vrsqrt.f32 %v6275_v41  ;;  %v6261_v55 = vmul.f32 0.03125, %v6225_v32  ;;  %v6222_v14 = vpop.xlane.xlu0 %6221 }
0x14ad   : > { %9387 = vrsqrt.f32 %v6274_v25  ;;  %v6260_v53 = vmul.f32 0.03125, %v6222_v14 }
0x14ae   : > { %v6277_v40 = vadd.f32 1e-05, %v6261_v55 }
0x14af   : > { %v6276_v31 = vadd.f32 1e-05, %v6260_v53  ;;  %v6231_v17 = vpop.xlane.xlu1 %6230 }
0x14b0   : > { %9389 = vrsqrt.f32 %v6277_v40  ;;  %v6263_v15 = vmul.f32 0.03125, %v6231_v17  ;;  %v6228_v59 = vpop.xlane.xlu0 %6227 }
0x14b1   : > { %9391 = vrsqrt.f32 %v6276_v31  ;;  %v6262_v22 = vmul.f32 0.03125, %v6228_v59 }
0x14b2   : > { %v9382_v24 = vpop.eup %9381  ;;  %v6279_v46 = vadd.f32 1e-05, %v6263_v15 }
0x14b3   : > { %v9384_v36 = vpop.eup %9383  ;;  %v6305_v60 = vmul.f32 %v9382_v24, %v11800_v35  ;;  %v6278_v5 = vadd.f32 1e-05, %v6262_v22  ;;  %v6237_v57 = vpop.xlane.xlu1 %6236 }
0x14b4   : > { %v6304_v8 = vmul.f32 %v9384_v36, %v11803_v61  ;;  %9393 = vrsqrt.f32 %v6279_v46  ;;  %v6265_v56 = vmul.f32 0.03125, %v6237_v57  ;;  %v6234_v2 = vpop.xlane.xlu0 %6233 }
0x14b5   : > { %v6327_v28 = vmul.f32 %v11898_v45, %v6305_v60  ;;  %9395 = vrsqrt.f32 %v6278_v5  ;;  %v6264_v13 = vmul.f32 0.03125, %v6234_v2 }
0x14b6   : > { %v9386_v52 = vpop.eup %9385  ;;  %v6326_v35 = vmul.f32 %v11898_v45, %v6304_v8  ;;  %v6281_v58 = vadd.f32 1e-05, %v6265_v56 }
0x14b7   : > { %v9388_v61 = vpop.eup %9387  ;;  %v6349_v29 = vadd.f32 %v11904_v42, %v6327_v28  ;;  %v6307_v6 = vmul.f32 %v9386_v52, %v11810_v48  ;;  %v6280_v37 = vadd.f32 1e-05, %v6264_v13  ;;  %v6243_v30 = vpop.xlane.xlu1 %6242 }
0x14b8   : > { %v6348_v21 = vadd.f32 %v11904_v42, %v6326_v35  ;;  %v6306_v38 = vmul.f32 %v9388_v61, %v11814_v47  ;;  %9397 = vrsqrt.f32 %v6281_v58  ;;  %v6267_v4 = vmul.f32 0.03125, %v6243_v30  ;;  %v6240_v7 = vpop.xlane.xlu0 %6239 }
0x14b9   : > { %6365 = vst.msk [vmem:[%s11913_s23 + $0x8] sm:$0xff] %vm479_vm0, %v6349_v29  ;;  %v6329_v39 = vmul.f32 %v11898_v45, %v6307_v6  ;;  %9399 = vrsqrt.f32 %v6280_v37  ;;  %v6266_v63 = vmul.f32 0.03125, %v6240_v7 }
0x14ba   : > { %v9390_v26 = vpop.eup %9389  ;;  %6364 = vst.msk [vmem:[%s11913_s23] sm:$0xff] %vm479_vm0, %v6348_v21  ;;  %v6328_v48 = vmul.f32 %v11898_v45, %v6306_v38  ;;  %v6283_v12 = vadd.f32 1e-05, %v6267_v4 }
0x14bb   : > { %v9392_v23 = vpop.eup %9391  ;;  %v6351_v47 = vadd.f32 %v11904_v42, %v6329_v39  ;;  %v6309_v44 = vmul.f32 %v9390_v26, %v11822_v16  ;;  %v6282_v18 = vadd.f32 1e-05, %v6266_v63  ;;  %v6249_v11 = vpop.xlane.xlu1 %6248 }
0x14bc   : > { %v6350_v34 = vadd.f32 %v11904_v42, %v6328_v48  ;;  %v6308_v19 = vmul.f32 %v9392_v23, %v11826_v27  ;;  %9401 = vrsqrt.f32 %v6283_v12  ;;  %v6269_v20 = vmul.f32 0.03125, %v6249_v11  ;;  %v6246_v10 = vpop.xlane.xlu0 %6245 }
0x14bd   : > { %6367 = vst.msk [vmem:[%s11913_s23 + $0x18] sm:$0xff] %vm479_vm0, %v6351_v47  ;;  %v6331_v9 = vmul.f32 %v11898_v45, %v6309_v44  ;;  %9403 = vrsqrt.f32 %v6282_v18  ;;  %v6268_v41 = vmul.f32 0.03125, %v6246_v10 }
0x14be   : > { %v9394_v25 = vpop.eup %9393  ;;  %6366 = vst.msk [vmem:[%s11913_s23 + $0x10] sm:$0xff] %vm479_vm0, %v6350_v34  ;;  %v6330_v16 = vmul.f32 %v11898_v45, %v6308_v19  ;;  %v6285_v32 = vadd.f32 1e-05, %v6269_v20 }
0x14bf   : > { %v9396_v55 = vpop.eup %9395  ;;  %v6353_v27 = vadd.f32 %v11904_v42, %v6331_v9  ;;  %v6311_v14 = vmul.f32 %v9394_v25, %v11834_v1  ;;  %v6284_v53 = vadd.f32 1e-05, %v6268_v41  ;;  %v6255_v40 = vpop.xlane.xlu1 %6254 }
0x14c0   : > { %v6352_v31 = vadd.f32 %v11904_v42, %v6330_v16  ;;  %v6310_v17 = vmul.f32 %v9396_v55, %v11838_v51  ;;  %9405 = vrsqrt.f32 %v6285_v32  ;;  %v6271_v15 = vmul.f32 0.03125, %v6255_v40  ;;  %v6252_v59 = vpop.xlane.xlu0 %6251 }
0x14c1   : > { %6369 = vst.msk [vmem:[%s11913_s23 + $0x28] sm:$0xff] %vm479_vm0, %v6353_v27  ;;  %v6333_v22 = vmul.f32 %v11898_v45, %v6311_v14  ;;  %9407 = vrsqrt.f32 %v6284_v53  ;;  %v6270_v24 = vmul.f32 0.03125, %v6252_v59 }
0x14c2   : > { %v9398_v46 = vpop.eup %9397  ;;  %6368 = vst.msk [vmem:[%s11913_s23 + $0x20] sm:$0xff] %vm479_vm0, %v6352_v31  ;;  %v6332_v1 = vmul.f32 %v11898_v45, %v6310_v17  ;;  %v6287_v36 = vadd.f32 1e-05, %v6271_v15 }
0x14c3   : > { %v9400_v60 = vpop.eup %9399  ;;  %v6355_v51 = vadd.f32 %v11904_v42, %v6333_v22  ;;  %v6313_v5 = vmul.f32 %v9398_v46, %v11846_v50  ;;  %v6286_v57 = vadd.f32 1e-05, %v6270_v24 }
0x14c4   : > { %v6354_v8 = vadd.f32 %v11904_v42, %v6332_v1  ;;  %v6312_v56 = vmul.f32 %v9400_v60, %v11850_v49  ;;  %9409 = vrsqrt.f32 %v6287_v36 }
0x14c5   : > { %6371 = vst.msk [vmem:[%s11913_s23 + $0x38] sm:$0xff] %vm479_vm0, %v6355_v51  ;;  %v6335_v2 = vmul.f32 %v11898_v45, %v6313_v5  ;;  %9411 = vrsqrt.f32 %v6286_v57 }
0x14c6   : > { %v9402_v28 = vpop.eup %9401  ;;  %6370 = vst.msk [vmem:[%s11913_s23 + $0x30] sm:$0xff] %vm479_vm0, %v6354_v8  ;;  %v6334_v13 = vmul.f32 %v11898_v45, %v6312_v56 }
0x14c7   : > { %v9404_v50 = vpop.eup %9403  ;;  %v6357_v52 = vadd.f32 %v11904_v42, %v6335_v2  ;;  %v6315_v35 = vmul.f32 %v9402_v28, %v11858_v43 }
0x14c8   : > { %v6356_v49 = vadd.f32 %v11904_v42, %v6334_v13  ;;  %v6314_v58 = vmul.f32 %v9404_v50, %v11862_v54 }
0x14c9   : > { %6373 = vst.msk [vmem:[%s11913_s23 + $0x48] sm:$0xff] %vm479_vm0, %v6357_v52  ;;  %v6337_v61 = vmul.f32 %v11898_v45, %v6315_v35 }
0x14ca   : > { %v9406_v29 = vpop.eup %9405  ;;  %6372 = vst.msk [vmem:[%s11913_s23 + $0x40] sm:$0xff] %vm479_vm0, %v6356_v49  ;;  %v6336_v6 = vmul.f32 %v11898_v45, %v6314_v58 }
0x14cb   : > { %v9408_v37 = vpop.eup %9407  ;;  %v6359_v30 = vadd.f32 %v11904_v42, %v6337_v61  ;;  %v6317_v43 = vmul.f32 %v9406_v29, %v11870_v3 }
0x14cc   : > { %v6358_v21 = vadd.f32 %v11904_v42, %v6336_v6  ;;  %v6316_v54 = vmul.f32 %v9408_v37, %v11874_v0 }
0x14cd   : > { %6375 = vst.msk [vmem:[%s11913_s23 + $0x58] sm:$0xff] %vm479_vm0, %v6359_v30  ;;  %v6339_v38 = vmul.f32 %v11898_v45, %v6317_v43 }
0x14ce   : > { %v9410_v4 = vpop.eup %9409  ;;  %6374 = vst.msk [vmem:[%s11913_s23 + $0x50] sm:$0xff] %vm479_vm0, %v6358_v21  ;;  %v6338_v7 = vmul.f32 %v11898_v45, %v6316_v54 }
0x14cf   : > { %v9412_v39 = vpop.eup %9411  ;;  %v6361_v63 = vadd.f32 %v11904_v42, %v6339_v38  ;;  %v6319_v3 = vmul.f32 %v9410_v4, %v11882_v33 }
0x14d0   : > { %v6360_v26 = vadd.f32 %v11904_v42, %v6338_v7  ;;  %v6318_v0 = vmul.f32 %v9412_v39, %v11886_v62 }
0x14d1   : > { %6377 = vst.msk [vmem:[%s11913_s23 + $0x68] sm:$0xff] %vm479_vm0, %v6361_v63  ;;  %v6341_v48 = vmul.f32 %v11898_v45, %v6319_v3 }
0x14d2   : > { %6376 = vst.msk [vmem:[%s11913_s23 + $0x60] sm:$0xff] %vm479_vm0, %v6360_v26  ;;  %v6340_v12 = vmul.f32 %v11898_v45, %v6318_v0 }
0x14d3   : > { %v6363_v23 = vadd.f32 %v11904_v42, %v6341_v48 }
0x14d4   : > { %v6362_v47 = vadd.f32 %v11904_v42, %v6340_v12 }
0x14d5   : > { %6379 = vst.msk [vmem:[%s11913_s23 + $0x78] sm:$0xff] %vm479_vm0, %v6363_v23 }
0x14d6   : > { %6378 = vst.msk [vmem:[%s11913_s23 + $0x70] sm:$0xff] %vm479_vm0, %v6362_v47 }
0x14d7 PF: > { %s23_s25 = sadd.s32 1, %s9467_s25  }
0x14d8   : > { %p20_p4 = scmp.ge.s32.totalorder %s23_s25, 4  }
0x14da   :  { %22 = sbr.rel (!%p20_p4) target bundleno = 1 (0x1), region = 127 }

</bundles_post_ra>
